<compile_context>
chip_gen: v6e
topology: v6e:2x2x1
jax: 0.10.0
libtpu: 0.0.40
codegen_flags: <defaults>
</compile_context>

<pallas_src>
import jax
import jax.numpy as jnp
import numpy as np
from jax import lax
from jax.experimental import pallas as pl
from jax.experimental.pallas import tpu as pltpu


# ----------------------------------------------------------------------------
# Kernel 1: fused (upsample x2 -> conv3x3 pad1) + per-image BN partial stats.
# ----------------------------------------------------------------------------
def _conv_stats_kernel(xp_ref, w_ref, y_ref, stats_ref, patch_ref, acc_ref):
    # xp_ref:    (1, H+2, W+2, Cin)  bf16, zero-padded original-res input
    # w_ref:     (9*Cin, 4*Cout)     bf16, upsample-folded effective weights
    # y_ref:     (1, H*W, 4*Cout)    bf16, conv output (pre-BN), parity-packed
    # stats_ref: (1, 2, Cout)        f32, per-image [sum, centred sum-of-squares]
    # patch_ref: (H*W, 9*Cin)        bf16 VMEM scratch (im2col)
    # acc_ref:   (H*W, 4*Cout)       f32  VMEM scratch (matmul accumulator)
    _, Hp, Wp, Cin = xp_ref.shape
    H, W = Hp - 2, Wp - 2
    Cout = stats_ref.shape[2]

    # Load once; do the (cheap, small) im2col gather in f32 (proven-safe slice
    # + reshape pattern), cast to bf16 only when storing into the scratch.
    x = xp_ref[0].astype(jnp.float32)                     # (H+2, W+2, Cin)
    for oy in range(3):
        for ox in range(3):
            t = oy * 3 + ox
            patch_ref[:, t * Cin:(t + 1) * Cin] = (
                x[oy:oy + H, ox:ox + W, :]
                .reshape(H * W, Cin)
                .astype(jnp.bfloat16))

    # Single MXU matmul: K = 9*Cin, N = 4*Cout, f32 accumulation in VMEM.
    acc_ref[...] = jnp.dot(patch_ref[...], w_ref[...],
                           preferred_element_type=jnp.float32)
    acc = acc_ref[...]                                    # (H*W, 4*Cout) f32

    # Conv output (pre-BN) in bf16; the channel axis is parity-packed
    # (lane index = parity*Cout + channel), which is lane-dense for Cout >= 32.
    y_ref[0] = acc.astype(y_ref.dtype)

    # --- per-image BatchNorm partials (f32, computed before the bf16 cast) ---
    col_sum = jnp.sum(acc, axis=0, keepdims=True)         # (1, 4*Cout)
    s = (col_sum[:, 0 * Cout:1 * Cout] + col_sum[:, 1 * Cout:2 * Cout] +
         col_sum[:, 2 * Cout:3 * Cout] + col_sum[:, 3 * Cout:4 * Cout])
    mean_n = s * (1.0 / float(4 * H * W))                 # per-image channel mean
    m4 = jnp.concatenate([mean_n, mean_n, mean_n, mean_n], axis=1)
    diff = acc - m4
    col_sq = jnp.sum(diff * diff, axis=0, keepdims=True)  # (1, 4*Cout)
    m2 = (col_sq[:, 0 * Cout:1 * Cout] + col_sq[:, 1 * Cout:2 * Cout] +
          col_sq[:, 2 * Cout:3 * Cout] + col_sq[:, 3 * Cout:4 * Cout])
    stats_ref[0] = jnp.concatenate([s, m2], axis=0)       # (2, Cout)


# ----------------------------------------------------------------------------
# Kernel 2: y = relu(conv_out * scale + shift)  (BN folded into scale/shift),
# operating on lane-dense (row, W*4*Cout) tiles.
# ----------------------------------------------------------------------------
def _bn_relu_kernel(y_ref, scale_ref, shift_ref, o_ref):
    y = y_ref[0].astype(jnp.float32)              # (TH, L)
    o = y * scale_ref[...] + shift_ref[...]       # (1, L) broadcasts over rows
    o_ref[0] = jnp.maximum(o, 0.0).astype(o_ref.dtype)


# ----------------------------------------------------------------------------
# Helpers
# ----------------------------------------------------------------------------
def _padded_bytes(shape, itemsize):
    """Rough VMEM footprint of a block, padded to (8, 128) tiling."""
    s = list(shape)
    s[-1] = ((s[-1] + 127) // 128) * 128
    if len(s) >= 2:
        s[-2] = ((s[-2] + 7) // 8) * 8
    n = 1
    for d in s:
        n *= d
    return n * itemsize


def _row_tile(h, lanes):
    """Largest row-tile of `h` that is <= 512 rows and keeps blocks legal."""
    if h <= 512:
        return h
    if lanes % 128 != 0:
        return h
    for t in range(512, 7, -1):
        if h % t == 0 and t % 8 == 0:
            return t
    return h


# ----------------------------------------------------------------------------
# Wrapper
# ----------------------------------------------------------------------------
def up_convolution(x_nchw, weight, bias, gamma, beta, eps=1e-5):
    """Forward pass of UpConvolution.

    x_nchw: (N, Cin, H, W) float32
    weight: (3, 3, Cin, Cout)  (HWIO)
    bias:   (Cout,)   -- accepted for API parity; a constant channel offset
                         before training-mode BatchNorm cancels exactly, so it
                         is not applied (self-test verifies this).
    gamma, beta: (Cout,) BatchNorm affine params
    Returns (N, Cout, 2H, 2W) float32.
    """
    del bias  # exactly absorbed by the batch-statistics BatchNorm
    N, Cin, H, W = x_nchw.shape
    Cout = weight.shape[3]
    L = W * 4 * Cout  # lane width of the parity-packed flat layout

    # --- small XLA glue on the *un-upsampled* input (bf16 halves its bytes) ---
    x = jnp.transpose(x_nchw, (0, 2, 3, 1)).astype(jnp.bfloat16)   # NHWC
    x_p = jnp.pad(x, ((0, 0), (1, 1), (1, 1), (0, 0)))             # (N,H+2,W+2,Cin)

    # Fold the nearest x2 upsample into the weights.  For output parity a,
    # R[a, o, dy] = 1 iff conv tap dy reads padded-input row i + o.
    R = jnp.array([[[1., 0., 0.], [0., 1., 1.], [0., 0., 0.]],
                   [[0., 0., 0.], [1., 1., 0.], [0., 0., 1.]]], jnp.float32)
    weff = jnp.einsum('ard,bce,deio->rciabo', R, R, weight.astype(jnp.float32))
    w_all = weff.reshape(9 * Cin, 4 * Cout).astype(jnp.bfloat16)

    # --- kernel 1: fused upsample+conv + per-image BN partials ----------------
    # TODO(synk): for very large decoder feature maps, row-tile kernel 1 (1-row
    # halo on the padded input) so whole-image blocks also fit v7x's 64 MiB VMEM.
    vmem1 = (2 * (_padded_bytes((H + 2, W + 2, Cin), 2)
                  + _padded_bytes((9 * Cin, 4 * Cout), 2)
                  + _padded_bytes((H * W, 4 * Cout), 2)
                  + _padded_bytes((2, Cout), 4))
             + _padded_bytes((H * W, 9 * Cin), 2)
             + _padded_bytes((H * W, 4 * Cout), 4))
    conv_out, stats = pl.pallas_call(
        _conv_stats_kernel,
        out_shape=(
            jax.ShapeDtypeStruct((N, H * W, 4 * Cout), jnp.bfloat16),
            jax.ShapeDtypeStruct((N, 2, Cout), jnp.float32),
        ),
        grid_spec=pltpu.PrefetchScalarGridSpec(
            num_scalar_prefetch=0,
            grid=(N,),
            in_specs=[
                pl.BlockSpec((1, H + 2, W + 2, Cin), lambda n: (n, 0, 0, 0)),
                pl.BlockSpec((9 * Cin, 4 * Cout), lambda n: (0, 0)),
            ],
            out_specs=[
                pl.BlockSpec((1, H * W, 4 * Cout), lambda n: (n, 0, 0)),
                pl.BlockSpec((1, 2, Cout), lambda n: (n, 0, 0)),
            ],
            scratch_shapes=[
                pltpu.VMEM((H * W, 9 * Cin), jnp.bfloat16),
                pltpu.VMEM((H * W, 4 * Cout), jnp.float32),
            ],
        ),
        compiler_params=pltpu.CompilerParams(
            dimension_semantics=("parallel",),   # per-image partials: no carry
            vmem_limit_bytes=int(min(64 << 20, max(32 << 20, 2 * vmem1))),
        ),
    )(x_p, w_all)

    # --- finish BN stats: Welford/Chan combine of per-image partials ---------
    cnt = jnp.float32(4 * H * W)                 # pixels per image (= 2H * 2W)
    total = jnp.float32(N) * cnt
    sums = stats[:, 0, :]                        # (N, Cout)
    m2s = stats[:, 1, :]                         # (N, Cout)
    mean_n = sums / cnt
    mean = jnp.sum(sums, axis=0) / total
    m2 = jnp.sum(m2s, axis=0) + cnt * jnp.sum((mean_n - mean[None, :]) ** 2, axis=0)
    var = m2 / total                             # biased var (PyTorch BN training)
    scale = gamma.astype(jnp.float32) * lax.rsqrt(var + eps)
    shift = beta.astype(jnp.float32) - mean * scale

    # Free row-major reinterpretation -> lane-dense (N, H, W*4*Cout) slab.
    conv_flat = conv_out.reshape(N, H, L)
    scale_l = jnp.tile(scale, W * 4).reshape(1, L)
    shift_l = jnp.tile(shift, W * 4).reshape(1, L)

    # --- kernel 2: BN affine + ReLU over row tiles of the flat layout --------
    TH = _row_tile(H, L)
    vmem2 = 2 * (_padded_bytes((TH, L), 2) + _padded_bytes((TH, L), 4)
                 + 2 * _padded_bytes((1, L), 4))
    out_flat = pl.pallas_call(
        _bn_relu_kernel,
        out_shape=jax.ShapeDtypeStruct((N, H, L), jnp.float32),
        grid_spec=pltpu.PrefetchScalarGridSpec(
            num_scalar_prefetch=0,
            grid=(N, H // TH),
            in_specs=[
                pl.BlockSpec((1, TH, L), lambda n, r: (n, r, 0)),
                pl.BlockSpec((1, L), lambda n, r: (0, 0)),
                pl.BlockSpec((1, L), lambda n, r: (0, 0)),
            ],
            out_specs=pl.BlockSpec((1, TH, L), lambda n, r: (n, r, 0)),
        ),
        compiler_params=pltpu.CompilerParams(
            dimension_semantics=("parallel", "parallel"),
            vmem_limit_bytes=int(min(64 << 20, max(32 << 20, 2 * vmem2))),
        ),
    )(conv_flat, scale_l, shift_l)

    # --- assemble NCHW: single XLA transpose also de-interleaves parities ----
    out = out_flat.reshape(N, H, W, 2, 2, Cout)        # (n, i, j, a, b, co)
    out = jnp.transpose(out, (0, 5, 1, 3, 2, 4))       # (n, co, i, a, j, b)
    return out.reshape(N, Cout, 2 * H, 2 * W)


# ----------------------------------------------------------------------------
# Pure-JAX reference (applies the bias, upsamples explicitly) for sanity check.
# ----------------------------------------------------------------------------
def _reference(x_nchw, weight, bias, gamma, beta, eps=1e-5):
    x = jnp.transpose(x_nchw, (0, 2, 3, 1))
    x = jnp.repeat(jnp.repeat(x, 2, axis=1), 2, axis=2)
    y = lax.conv_general_dilated(
        x, weight, window_strides=(1, 1), padding="SAME",
        dimension_numbers=("NHWC", "HWIO", "NHWC"),
    ) + bias
    mean = jnp.mean(y, axis=(0, 1, 2))
    var = jnp.mean((y - mean) ** 2, axis=(0, 1, 2))
    y = (y - mean) / jnp.sqrt(var + eps) * gamma + beta
    y = jnp.maximum(y, 0.0)
    return jnp.transpose(y, (0, 3, 1, 2))


if __name__ == "__main__":
    key = jax.random.PRNGKey(0)
    k_x, k_w, k_b = jax.random.split(key, 3)

    N, Cin, Cout, H, W = 2, 4, 8, 16, 16

    x = jax.random.normal(k_x, (N, Cin, H, W), dtype=jnp.float32)
    fan_in = Cin * 3 * 3
    bound = 1.0 / np.sqrt(fan_in)
    weight = jax.random.uniform(k_w, (3, 3, Cin, Cout), jnp.float32, -bound, bound)
    bias = jax.random.uniform(k_b, (Cout,), jnp.float32, -bound, bound)
    gamma = jnp.ones((Cout,), jnp.float32)   # BatchNorm default init
    beta = jnp.zeros((Cout,), jnp.float32)

    out = jax.jit(up_convolution)(x, weight, bias, gamma, beta)
    out = jax.block_until_ready(out)
    assert out.shape == (N, Cout, 2 * H, 2 * W), out.shape

    ref = jax.block_until_ready(_reference(x, weight, bias, gamma, beta))
    # bf16 matmul operands + bf16 intermediate => compare at bf16-level tolerance.
    np.testing.assert_allclose(np.asarray(out), np.asarray(ref), rtol=2e-2, atol=3e-2)

    print("KERNEL_OK")
</pallas_src>

<mosaic_0001>
module attributes {stable_mosaic.version = 11 : i64} {
  func.func @_conv_stats_kernel(%arg0: i32, %arg1: memref<1x18x18x4xbf16, #tpu.memory_space<vmem>>, %arg2: memref<36x32xbf16, #tpu.memory_space<vmem>>, %arg3: memref<1x256x32xbf16, #tpu.memory_space<vmem>>, %arg4: memref<1x2x8xf32, #tpu.memory_space<vmem>>, %arg5: memref<256x36xbf16, #tpu.memory_space<vmem>>, %arg6: memref<256x32xf32, #tpu.memory_space<vmem>>) attributes {dimension_semantics = [#tpu.dimension_semantics<parallel>], iteration_bounds = array<i64: 2>, scalar_prefetch = 0 : i64, scratch_operands = 2 : i64, tpu.core_type = #tpu.core_type<tc>, window_params = [{transform_indices = @transform_0, window_bounds = array<i64: 1, 18, 18, 4>}, {pipeline_mode = #tpu.pipeline_mode<synchronous>, transform_indices = @transform_1, window_bounds = array<i64: 36, 32>}, {transform_indices = @transform_2, window_bounds = array<i64: 1, 256, 32>}, {transform_indices = @transform_3, window_bounds = array<i64: 1, 2, 8>}]} {
    %c0 = arith.constant 0 : index
    %c0_0 = arith.constant 0 : index
    %c0_1 = arith.constant 0 : index
    %c0_2 = arith.constant 0 : index
    %0 = vector.load %arg1[%c0, %c0_0, %c0_1, %c0_2] : memref<1x18x18x4xbf16, #tpu.memory_space<vmem>>, vector<1x18x18x4xbf16>
    %1 = vector.shape_cast %0 : vector<1x18x18x4xbf16> to vector<18x18x4xbf16>
    %2 = arith.extf %1 : vector<18x18x4xbf16> to vector<18x18x4xf32>
    %3 = vector.extract_strided_slice %2 {offsets = [0, 0, 0], sizes = [16, 16, 4], strides = [1, 1, 1]} : vector<18x18x4xf32> to vector<16x16x4xf32>
    %4 = vector.shape_cast %3 : vector<16x16x4xf32> to vector<256x4xf32>
    %5 = arith.truncf %4 : vector<256x4xf32> to vector<256x4xbf16>
    %c0_3 = arith.constant 0 : index
    %c0_4 = arith.constant 0 : index
    %6 = vector.load %arg5[%c0_3, %c0_4] : memref<256x36xbf16, #tpu.memory_space<vmem>>, vector<256x4xbf16>
    tpu.vector_store %arg5[%c0_3, %c0_4], %5 {strides = array<i32>} : memref<256x36xbf16, #tpu.memory_space<vmem>>, vector<256x4xbf16>,
    %7 = vector.extract_strided_slice %2 {offsets = [0, 1, 0], sizes = [16, 16, 4], strides = [1, 1, 1]} : vector<18x18x4xf32> to vector<16x16x4xf32>
    %8 = vector.shape_cast %7 : vector<16x16x4xf32> to vector<256x4xf32>
    %9 = arith.truncf %8 : vector<256x4xf32> to vector<256x4xbf16>
    %c0_5 = arith.constant 0 : index
    %c4 = arith.constant 4 : index
    %10 = vector.load %arg5[%c0_5, %c4] : memref<256x36xbf16, #tpu.memory_space<vmem>>, vector<256x4xbf16>
    tpu.vector_store %arg5[%c0_5, %c4], %9 {strides = array<i32>} : memref<256x36xbf16, #tpu.memory_space<vmem>>, vector<256x4xbf16>,
    %11 = vector.extract_strided_slice %2 {offsets = [0, 2, 0], sizes = [16, 16, 4], strides = [1, 1, 1]} : vector<18x18x4xf32> to vector<16x16x4xf32>
    %12 = vector.shape_cast %11 : vector<16x16x4xf32> to vector<256x4xf32>
    %13 = arith.truncf %12 : vector<256x4xf32> to vector<256x4xbf16>
    %c0_6 = arith.constant 0 : index
    %c8 = arith.constant 8 : index
    %14 = vector.load %arg5[%c0_6, %c8] : memref<256x36xbf16, #tpu.memory_space<vmem>>, vector<256x4xbf16>
    tpu.vector_store %arg5[%c0_6, %c8], %13 {strides = array<i32>} : memref<256x36xbf16, #tpu.memory_space<vmem>>, vector<256x4xbf16>,
    %15 = vector.extract_strided_slice %2 {offsets = [1, 0, 0], sizes = [16, 16, 4], strides = [1, 1, 1]} : vector<18x18x4xf32> to vector<16x16x4xf32>
    %16 = vector.shape_cast %15 : vector<16x16x4xf32> to vector<256x4xf32>
    %17 = arith.truncf %16 : vector<256x4xf32> to vector<256x4xbf16>
    %c0_7 = arith.constant 0 : index
    %c12 = arith.constant 12 : index
    %18 = vector.load %arg5[%c0_7, %c12] : memref<256x36xbf16, #tpu.memory_space<vmem>>, vector<256x4xbf16>
    tpu.vector_store %arg5[%c0_7, %c12], %17 {strides = array<i32>} : memref<256x36xbf16, #tpu.memory_space<vmem>>, vector<256x4xbf16>,
    %19 = vector.extract_strided_slice %2 {offsets = [1, 1, 0], sizes = [16, 16, 4], strides = [1, 1, 1]} : vector<18x18x4xf32> to vector<16x16x4xf32>
    %20 = vector.shape_cast %19 : vector<16x16x4xf32> to vector<256x4xf32>
    %21 = arith.truncf %20 : vector<256x4xf32> to vector<256x4xbf16>
    %c0_8 = arith.constant 0 : index
    %c16 = arith.constant 16 : index
    %22 = vector.load %arg5[%c0_8, %c16] : memref<256x36xbf16, #tpu.memory_space<vmem>>, vector<256x4xbf16>
    tpu.vector_store %arg5[%c0_8, %c16], %21 {strides = array<i32>} : memref<256x36xbf16, #tpu.memory_space<vmem>>, vector<256x4xbf16>,
    %23 = vector.extract_strided_slice %2 {offsets = [1, 2, 0], sizes = [16, 16, 4], strides = [1, 1, 1]} : vector<18x18x4xf32> to vector<16x16x4xf32>
    %24 = vector.shape_cast %23 : vector<16x16x4xf32> to vector<256x4xf32>
    %25 = arith.truncf %24 : vector<256x4xf32> to vector<256x4xbf16>
    %c0_9 = arith.constant 0 : index
    %c20 = arith.constant 20 : index
    %26 = vector.load %arg5[%c0_9, %c20] : memref<256x36xbf16, #tpu.memory_space<vmem>>, vector<256x4xbf16>
    tpu.vector_store %arg5[%c0_9, %c20], %25 {strides = array<i32>} : memref<256x36xbf16, #tpu.memory_space<vmem>>, vector<256x4xbf16>,
    %27 = vector.extract_strided_slice %2 {offsets = [2, 0, 0], sizes = [16, 16, 4], strides = [1, 1, 1]} : vector<18x18x4xf32> to vector<16x16x4xf32>
    %28 = vector.shape_cast %27 : vector<16x16x4xf32> to vector<256x4xf32>
    %29 = arith.truncf %28 : vector<256x4xf32> to vector<256x4xbf16>
    %c0_10 = arith.constant 0 : index
    %c24 = arith.constant 24 : index
    %30 = vector.load %arg5[%c0_10, %c24] : memref<256x36xbf16, #tpu.memory_space<vmem>>, vector<256x4xbf16>
    tpu.vector_store %arg5[%c0_10, %c24], %29 {strides = array<i32>} : memref<256x36xbf16, #tpu.memory_space<vmem>>, vector<256x4xbf16>,
    %31 = vector.extract_strided_slice %2 {offsets = [2, 1, 0], sizes = [16, 16, 4], strides = [1, 1, 1]} : vector<18x18x4xf32> to vector<16x16x4xf32>
    %32 = vector.shape_cast %31 : vector<16x16x4xf32> to vector<256x4xf32>
    %33 = arith.truncf %32 : vector<256x4xf32> to vector<256x4xbf16>
    %c0_11 = arith.constant 0 : index
    %c28 = arith.constant 28 : index
    %34 = vector.load %arg5[%c0_11, %c28] : memref<256x36xbf16, #tpu.memory_space<vmem>>, vector<256x4xbf16>
    tpu.vector_store %arg5[%c0_11, %c28], %33 {strides = array<i32>} : memref<256x36xbf16, #tpu.memory_space<vmem>>, vector<256x4xbf16>,
    %35 = vector.extract_strided_slice %2 {offsets = [2, 2, 0], sizes = [16, 16, 4], strides = [1, 1, 1]} : vector<18x18x4xf32> to vector<16x16x4xf32>
    %36 = vector.shape_cast %35 : vector<16x16x4xf32> to vector<256x4xf32>
    %37 = arith.truncf %36 : vector<256x4xf32> to vector<256x4xbf16>
    %c0_12 = arith.constant 0 : index
    %c32 = arith.constant 32 : index
    %38 = vector.load %arg5[%c0_12, %c32] : memref<256x36xbf16, #tpu.memory_space<vmem>>, vector<256x4xbf16>
    tpu.vector_store %arg5[%c0_12, %c32], %37 {strides = array<i32>} : memref<256x36xbf16, #tpu.memory_space<vmem>>, vector<256x4xbf16>,
    %c0_13 = arith.constant 0 : index
    %c0_14 = arith.constant 0 : index
    %39 = vector.load %arg5[%c0_13, %c0_14] : memref<256x36xbf16, #tpu.memory_space<vmem>>, vector<256x36xbf16>
    %c0_15 = arith.constant 0 : index
    %c0_16 = arith.constant 0 : index
    %40 = vector.load %arg2[%c0_15, %c0_16] : memref<36x32xbf16, #tpu.memory_space<vmem>>, vector<36x32xbf16>
    %cst = arith.constant dense<0.000000e+00> : vector<256x32xf32>
    %41 = tpu.matmul %39, %40, %cst {dimension_numbers = #tpu.dot_dimension_numbers<[1], [0], [0], [1], [0, 0, 1, 1], [], []>} : vector<256x36xbf16>, vector<36x32xbf16>, vector<256x32xf32> -> vector<256x32xf32>
    %c0_17 = arith.constant 0 : index
    %c0_18 = arith.constant 0 : index
    %42 = vector.load %arg6[%c0_17, %c0_18] : memref<256x32xf32, #tpu.memory_space<vmem>>, vector<256x32xf32>
    tpu.vector_store %arg6[%c0_17, %c0_18], %41 {strides = array<i32>} : memref<256x32xf32, #tpu.memory_space<vmem>>, vector<256x32xf32>,
    %c0_19 = arith.constant 0 : index
    %c0_20 = arith.constant 0 : index
    %43 = vector.load %arg6[%c0_19, %c0_20] : memref<256x32xf32, #tpu.memory_space<vmem>>, vector<256x32xf32>
    %44 = arith.truncf %43 : vector<256x32xf32> to vector<256x32xbf16>
    %c0_21 = arith.constant 0 : index
    %c0_22 = arith.constant 0 : index
    %c0_23 = arith.constant 0 : index
    %45 = vector.load %arg3[%c0_21, %c0_22, %c0_23] : memref<1x256x32xbf16, #tpu.memory_space<vmem>>, vector<1x256x32xbf16>
    %46 = vector.shape_cast %45 : vector<1x256x32xbf16> to vector<256x32xbf16>
    %47 = vector.shape_cast %44 : vector<256x32xbf16> to vector<1x256x32xbf16>
    tpu.vector_store %arg3[%c0_21, %c0_22, %c0_23], %47 {strides = array<i32>} : memref<1x256x32xbf16, #tpu.memory_space<vmem>>, vector<1x256x32xbf16>,
    %cst_24 = arith.constant dense<0.000000e+00> : vector<32xf32>
    %48 = vector.multi_reduction <add>, %43, %cst_24 [0] : vector<256x32xf32> to vector<32xf32>
    %49 = vector.shape_cast %48 : vector<32xf32> to vector<1x32xf32>
    %50 = vector.extract_strided_slice %49 {offsets = [0, 0], sizes = [1, 8], strides = [1, 1]} : vector<1x32xf32> to vector<1x8xf32>
    %51 = vector.extract_strided_slice %49 {offsets = [0, 8], sizes = [1, 8], strides = [1, 1]} : vector<1x32xf32> to vector<1x8xf32>
    %52 = arith.addf %50, %51 : vector<1x8xf32>
    %53 = vector.extract_strided_slice %49 {offsets = [0, 16], sizes = [1, 8], strides = [1, 1]} : vector<1x32xf32> to vector<1x8xf32>
    %54 = arith.addf %52, %53 : vector<1x8xf32>
    %55 = vector.extract_strided_slice %49 {offsets = [0, 24], sizes = [1, 8], strides = [1, 1]} : vector<1x32xf32> to vector<1x8xf32>
    %56 = arith.addf %54, %55 : vector<1x8xf32>
    %cst_25 = arith.constant 9.765625E-4 : f32
    %57 = vector.broadcast %cst_25 : f32 to vector<1x8xf32>
    %58 = arith.mulf %56, %57 : vector<1x8xf32>
    %59 = tpu.concatenate %58, %58, %58, %58 in 1 : vector<1x8xf32>, vector<1x8xf32>, vector<1x8xf32>, vector<1x8xf32> -> vector<1x32xf32>
    %60 = vector.broadcast %59 : vector<1x32xf32> to vector<256x32xf32>
    %61 = arith.subf %43, %60 : vector<256x32xf32>
    %62 = arith.mulf %61, %61 : vector<256x32xf32>
    %cst_26 = arith.constant dense<0.000000e+00> : vector<32xf32>
    %63 = vector.multi_reduction <add>, %62, %cst_26 [0] : vector<256x32xf32> to vector<32xf32>
    %64 = vector.shape_cast %63 : vector<32xf32> to vector<1x32xf32>
    %65 = vector.extract_strided_slice %64 {offsets = [0, 0], sizes = [1, 8], strides = [1, 1]} : vector<1x32xf32> to vector<1x8xf32>
    %66 = vector.extract_strided_slice %64 {offsets = [0, 8], sizes = [1, 8], strides = [1, 1]} : vector<1x32xf32> to vector<1x8xf32>
    %67 = arith.addf %65, %66 : vector<1x8xf32>
    %68 = vector.extract_strided_slice %64 {offsets = [0, 16], sizes = [1, 8], strides = [1, 1]} : vector<1x32xf32> to vector<1x8xf32>
    %69 = arith.addf %67, %68 : vector<1x8xf32>
    %70 = vector.extract_strided_slice %64 {offsets = [0, 24], sizes = [1, 8], strides = [1, 1]} : vector<1x32xf32> to vector<1x8xf32>
    %71 = arith.addf %69, %70 : vector<1x8xf32>
    %72 = tpu.concatenate %56, %71 in 0 : vector<1x8xf32>, vector<1x8xf32> -> vector<2x8xf32>
    %c0_27 = arith.constant 0 : index
    %c0_28 = arith.constant 0 : index
    %c0_29 = arith.constant 0 : index
    %73 = vector.load %arg4[%c0_27, %c0_28, %c0_29] : memref<1x2x8xf32, #tpu.memory_space<vmem>>, vector<1x2x8xf32>
    %74 = vector.shape_cast %73 : vector<1x2x8xf32> to vector<2x8xf32>
    %75 = vector.shape_cast %72 : vector<2x8xf32> to vector<1x2x8xf32>
    tpu.vector_store %arg4[%c0_27, %c0_28, %c0_29], %75 {strides = array<i32>} : memref<1x2x8xf32, #tpu.memory_space<vmem>>, vector<1x2x8xf32>,
    return
  }
  func.func @transform_0(%arg0: i32) -> (i32, i32, i32, i32) {
    %c0_i32 = arith.constant 0 : i32
    %c0_i32_0 = arith.constant 0 : i32
    %c0_i32_1 = arith.constant 0 : i32
    %c0_i32_2 = arith.constant 0 : i32
    return %arg0, %c0_i32, %c0_i32_0, %c0_i32_1 : i32, i32, i32, i32
  }
  func.func @transform_1(%arg0: i32) -> (i32, i32) {
    %c0_i32 = arith.constant 0 : i32
    %c0_i32_0 = arith.constant 0 : i32
    %c0_i32_1 = arith.constant 0 : i32
    return %c0_i32, %c0_i32_0 : i32, i32
  }
  func.func @transform_2(%arg0: i32) -> (i32, i32, i32) {
    %c0_i32 = arith.constant 0 : i32
    %c0_i32_0 = arith.constant 0 : i32
    %c0_i32_1 = arith.constant 0 : i32
    return %arg0, %c0_i32, %c0_i32_0 : i32, i32, i32
  }
  func.func @transform_3(%arg0: i32) -> (i32, i32, i32) {
    %c0_i32 = arith.constant 0 : i32
    %c0_i32_0 = arith.constant 0 : i32
    %c0_i32_1 = arith.constant 0 : i32
    return %arg0, %c0_i32, %c0_i32_0 : i32, i32, i32
  }
}

module attributes {stable_mosaic.version = 11 : i64} {
  func.func @_bn_relu_kernel(%arg0: i32, %arg1: i32, %arg2: memref<1x16x512xbf16, #tpu.memory_space<vmem>>, %arg3: memref<1x512xf32, #tpu.memory_space<vmem>>, %arg4: memref<1x512xf32, #tpu.memory_space<vmem>>, %arg5: memref<1x16x512xf32, #tpu.memory_space<vmem>>) attributes {dimension_semantics = [#tpu.dimension_semantics<parallel>, #tpu.dimension_semantics<parallel>], iteration_bounds = array<i64: 2, 1>, scalar_prefetch = 0 : i64, scratch_operands = 0 : i64, tpu.core_type = #tpu.core_type<tc>, window_params = [{transform_indices = @transform_0, window_bounds = array<i64: 1, 16, 512>}, {pipeline_mode = #tpu.pipeline_mode<synchronous>, transform_indices = @transform_1, window_bounds = array<i64: 1, 512>}, {pipeline_mode = #tpu.pipeline_mode<synchronous>, transform_indices = @transform_2, window_bounds = array<i64: 1, 512>}, {transform_indices = @transform_3, window_bounds = array<i64: 1, 16, 512>}]} {
    %c0 = arith.constant 0 : index
    %c0_0 = arith.constant 0 : index
    %c0_1 = arith.constant 0 : index
    %0 = vector.load %arg2[%c0, %c0_0, %c0_1] : memref<1x16x512xbf16, #tpu.memory_space<vmem>>, vector<1x16x512xbf16>
    %1 = vector.shape_cast %0 : vector<1x16x512xbf16> to vector<16x512xbf16>
    %2 = arith.extf %1 : vector<16x512xbf16> to vector<16x512xf32>
    %c0_2 = arith.constant 0 : index
    %c0_3 = arith.constant 0 : index
    %3 = vector.load %arg3[%c0_2, %c0_3] : memref<1x512xf32, #tpu.memory_space<vmem>>, vector<1x512xf32>
    %4 = vector.broadcast %3 : vector<1x512xf32> to vector<16x512xf32>
    %5 = arith.mulf %2, %4 : vector<16x512xf32>
    %c0_4 = arith.constant 0 : index
    %c0_5 = arith.constant 0 : index
    %6 = vector.load %arg4[%c0_4, %c0_5] : memref<1x512xf32, #tpu.memory_space<vmem>>, vector<1x512xf32>
    %7 = vector.broadcast %6 : vector<1x512xf32> to vector<16x512xf32>
    %8 = arith.addf %5, %7 : vector<16x512xf32>
    %cst = arith.constant 0.000000e+00 : f32
    %9 = vector.broadcast %cst : f32 to vector<16x512xf32>
    %10 = arith.maximumf %8, %9 : vector<16x512xf32>
    %c0_6 = arith.constant 0 : index
    %c0_7 = arith.constant 0 : index
    %c0_8 = arith.constant 0 : index
    %11 = vector.load %arg5[%c0_6, %c0_7, %c0_8] : memref<1x16x512xf32, #tpu.memory_space<vmem>>, vector<1x16x512xf32>
    %12 = vector.shape_cast %11 : vector<1x16x512xf32> to vector<16x512xf32>
    %13 = vector.shape_cast %10 : vector<16x512xf32> to vector<1x16x512xf32>
    tpu.vector_store %arg5[%c0_6, %c0_7, %c0_8], %13 {strides = array<i32>} : memref<1x16x512xf32, #tpu.memory_space<vmem>>, vector<1x16x512xf32>,
    return
  }
  func.func @transform_0(%arg0: i32, %arg1: i32) -> (i32, i32, i32) {
    %c0_i32 = arith.constant 0 : i32
    %c0_i32_0 = arith.constant 0 : i32
    return %arg0, %arg1, %c0_i32 : i32, i32, i32
  }
  func.func @transform_1(%arg0: i32, %arg1: i32) -> (i32, i32) {
    %c0_i32 = arith.constant 0 : i32
    %c0_i32_0 = arith.constant 0 : i32
    %c0_i32_1 = arith.constant 0 : i32
    return %c0_i32, %c0_i32_0 : i32, i32
  }
  func.func @transform_2(%arg0: i32, %arg1: i32) -> (i32, i32) {
    %c0_i32 = arith.constant 0 : i32
    %c0_i32_0 = arith.constant 0 : i32
    %c0_i32_1 = arith.constant 0 : i32
    return %c0_i32, %c0_i32_0 : i32, i32
  }
  func.func @transform_3(%arg0: i32, %arg1: i32) -> (i32, i32, i32) {
    %c0_i32 = arith.constant 0 : i32
    %c0_i32_0 = arith.constant 0 : i32
    return %arg0, %arg1, %c0_i32 : i32, i32, i32
  }
}

</mosaic_0001>

<bundles_post_ra>
// kernel: tile.18
= control target key start
LH: loop header
LB: loop body
LE: loop exit
PB: predicated region body
PF: predicated region fallthrough
CT: control target
= control target key end

     0   :  { %s64_s0 = inlined_call_operand.vmem [shape: f32[8], index: 0, kind: input, shape index: {}]   ;;  %s65_s1 = inlined_call_operand.vmem [shape: f32[64,8], index: 1, kind: output, shape index: {}]  }
   0x1   :  { %v4_v0 = vld [vmem:[%s64_s0] ss:$0 sm:$0xff] }
   0x2   :  { %5 = vst [vmem:[%s65_s1] sm:$0xff] %v4_v0  ;;  %20 = vst [vmem:[%s65_s1 + $0x8] sm:$0xff] %v4_v0 }
   0x3   :  { %21 = vst [vmem:[%s65_s1 + $0x10] sm:$0xff] %v4_v0  ;;  %22 = vst [vmem:[%s65_s1 + $0x18] sm:$0xff] %v4_v0 }
   0x4   :  { %23 = vst [vmem:[%s65_s1 + $0x20] sm:$0xff] %v4_v0  ;;  %24 = vst [vmem:[%s65_s1 + $0x28] sm:$0xff] %v4_v0 }
   0x5   :  { %25 = vst [vmem:[%s65_s1 + $0x30] sm:$0xff] %v4_v0  ;;  %26 = vst [vmem:[%s65_s1 + $0x38] sm:$0xff] %v4_v0 }

// kernel: tile.19
= control target key start
LH: loop header
LB: loop body
LE: loop exit
PB: predicated region body
PF: predicated region fallthrough
CT: control target
= control target key end

     0   :  { %vm6_vm0 = vcmask 1043458   ;;  %s11_s6 = smov 3  ;;  %s14_s7 = smov 12  ;;  %vm8_vm1 = vcmask 64512   ;;  %vm20_vm2 = vcmask 1048512   ;;  %vm32_vm3 = vcmask 982912   ;;  %s417_s0 = inlined_call_operand.vmem [shape: f32[64,8], index: 0, kind: input, shape index: {}]   ;;  %s418_s1 = inlined_call_operand.vmem [shape: f32[1,512], index: 1, kind: output, shape index: {}]  }
   0x1   :  { %v220_v0 = vld [vmem:[%s417_s0 + $0xf] ss:$16 sm:%s11_s6]   ;;  %s35_s12 = smov 3  ;;  %s38_s15 = smov 12  ;;  %vm44_vm4 = vcmask 917312   ;;  %vm56_vm5 = vcmask 851712  }
   0x2   :  { %v221_v1 = vld [vmem:[%s417_s0 + $0xf] ss:$16 sm:%s14_s7]   ;;  %v224_v3 = vld [vmem:[%s417_s0 + $0xd] ss:$16 sm:%s35_s12]   ;;  %s268_s16 = smov 120   ;;  %s23_s19 = smov 3 }
   0x3   :  { %v17_v2 = vsel %vm6_vm0, %v221_v1, %v220_v0  ;;  %v225_v4 = vld [vmem:[%s417_s0 + $0xd] ss:$16 sm:%s38_s15]   ;;  %s26_s20 = smov 12  ;;  %v222_v6 = vld [vmem:[%s417_s0 + $0xe] ss:$16 sm:%s23_s19]   ;;  %s47_s25 = smov 3 }
   0x4   :  { %18 = vrot.lane.b32.xlu0 %v17_v2, %s268_s16  ;;  %v41_v5 = vsel %vm6_vm0, %v225_v4, %v224_v3  ;;  %v223_v7 = vld [vmem:[%s417_s0 + $0xe] ss:$16 sm:%s26_s20]   ;;  %s269_s26 = smov 104   ;;  %s50_s29 = smov 12  ;;  %vm68_vm6 = vcmask 786112   ;;  %vm80_vm7 = vcmask 720512  }
   0x5   :  { %42 = vrot.lane.b32.xlu1 %v41_v5, %s269_s26  ;;  %v29_v8 = vsel %vm6_vm0, %v223_v7, %v222_v6  ;;  %v226_v9 = vld [vmem:[%s417_s0 + $0xc] ss:$16 sm:%s47_s25]   ;;  %s59_s3 = smov 3  ;;  %s62_s4 = smov 12  ;;  %vm92_vm8 = vcmask 654912   ;;  %vm104_vm9 = vcmask 589312  }
   0x6   :  { %v227_v10 = vld [vmem:[%s417_s0 + $0xc] ss:$16 sm:%s50_s29]   ;;  %s270_s5 = smov 112   ;;  %v228_v12 = vld [vmem:[%s417_s0 + $0xb] ss:$16 sm:%s59_s3]   ;;  %s71_s8 = smov 3 }
   0x7   :  { %v53_v11 = vsel %vm6_vm0, %v227_v10, %v226_v9  ;;  %v229_v13 = vld [vmem:[%s417_s0 + $0xb] ss:$16 sm:%s62_s4]   ;;  %v230_v14 = vld [vmem:[%s417_s0 + $0xa] ss:$16 sm:%s71_s8]   ;;  %s74_s13 = smov 12  ;;  %s271_s14 = smov 96  }
   0x8   :  { %30 = vrot.lane.b32.xlu0 %v29_v8, %s270_s5  ;;  %v65_v15 = vsel %vm6_vm0, %v229_v13, %v228_v12  ;;  %v231_v16 = vld [vmem:[%s417_s0 + $0xa] ss:$16 sm:%s74_s13]   ;;  %s83_s17 = smov 3  ;;  %s86_s18 = smov 12  ;;  %vm116_vm10 = vcmask 523712   ;;  %vm128_vm11 = vcmask 458112  }
   0x9   :  { %54 = vrot.lane.b32.xlu1 %v53_v11, %s271_s14  ;;  %v77_v17 = vsel %vm6_vm0, %v231_v16, %v230_v14  ;;  %v232_v18 = vld [vmem:[%s417_s0 + $0x9] ss:$16 sm:%s83_s17]   ;;  %s95_s23 = smov 3  ;;  %s272_s24 = smov 88   ;;  %vm140_vm12 = vcmask 392512   ;;  %vm152_vm13 = vcmask 326912  }
   0xa   :  { %v233_v19 = vld [vmem:[%s417_s0 + $0x9] ss:$16 sm:%s86_s18]   ;;  %v234_v20 = vld [vmem:[%s417_s0 + $0x8] ss:$16 sm:%s95_s23]   ;;  %s98_s27 = smov 12  ;;  %s107_s30 = smov 3 }
   0xb   :  { %v89_v21 = vsel %vm6_vm0, %v233_v19, %v232_v18  ;;  %v235_v22 = vld [vmem:[%s417_s0 + $0x8] ss:$16 sm:%s98_s27]   ;;  %s110_s2 = smov 12  ;;  %s273_s3 = smov 80   ;;  %v236_v23 = vld [vmem:[%s417_s0 + $0x7] ss:$16 sm:%s107_s30]  }
   0xc   :  { %66 = vrot.lane.b32.xlu0 %v65_v15, %s272_s24  ;;  %s119_s6 = smov 3  ;;  %v101_v24 = vsel %vm6_vm0, %v235_v22, %v234_v20  ;;  %v237_v25 = vld [vmem:[%s417_s0 + $0x7] ss:$16 sm:%s110_s2]   ;;  %s122_s11 = smov 12  ;;  %vm164_vm14 = vcmask 261312   ;;  %vm176_vm15 = vcmask 195712  }
   0xd   :  { %78 = vrot.lane.b32.xlu1 %v77_v17, %s273_s3  ;;  %v238_v26 = vld [vmem:[%s417_s0 + $0x6] ss:$16 sm:%s119_s6]   ;;  %s274_s12 = smov 72   ;;  %s131_s15 = smov 3  ;;  %v113_v28 = vsel %vm6_vm0, %v237_v25, %v236_v23 }
   0xe   :  { %v239_v27 = vld [vmem:[%s417_s0 + $0x6] ss:$16 sm:%s122_s11]   ;;  %s134_s16 = smov 12  ;;  %v240_v29 = vld [vmem:[%s417_s0 + $0x5] ss:$16 sm:%s131_s15]   ;;  %s143_s19 = smov 3 }
   0xf   :  { %s275_s20 = smov 64   ;;  %v241_v30 = vld [vmem:[%s417_s0 + $0x5] ss:$16 sm:%s134_s16]   ;;  %s146_s23 = smov 12  ;;  %v125_v31 = vsel %vm6_vm0, %v239_v27, %v238_v26  ;;  %v242_v32 = vld [vmem:[%s417_s0 + $0x4] ss:$16 sm:%s143_s19]  }
  0x10   :  { %90 = vrot.lane.b32.xlu0 %v89_v21, %s274_s12  ;;  %s155_s26 = smov 3  ;;  %s158_s27 = smov 12  ;;  %v243_v33 = vld [vmem:[%s417_s0 + $0x4] ss:$16 sm:%s146_s23]   ;;  %v137_v34 = vsel %vm6_vm0, %v241_v30, %v240_v29 }
  0x11   :  { %102 = vrot.lane.b32.xlu1 %v101_v24, %s275_s20  ;;  %s276_s28 = smov 56   ;;  %s167_s2 = smov 3  ;;  %v244_v35 = vld [vmem:[%s417_s0 + $0x3] ss:$16 sm:%s155_s26]   ;;  %v149_v37 = vsel %vm6_vm0, %v243_v33, %v242_v32 }
  0x12   :  { %s170_s5 = smov 12  ;;  %s277_s6 = smov 48   ;;  %v245_v36 = vld [vmem:[%s417_s0 + $0x3] ss:$16 sm:%s158_s27]   ;;  %v246_v38 = vld [vmem:[%s417_s0 + $0x2] ss:$16 sm:%s167_s2]  }
  0x13   :  { %s179_s9 = smov 3  ;;  %v247_v39 = vld [vmem:[%s417_s0 + $0x2] ss:$16 sm:%s170_s5]   ;;  %s182_s14 = smov 12  ;;  %v161_v41 = vsel %vm6_vm0, %v245_v36, %v244_v35 }
  0x14   :  { %114 = vrot.lane.b32.xlu0 %v113_v28, %s276_s28  ;;  %s2_s15 = smov 3  ;;  %s278_s16 = smov 40   ;;  %v248_v42 = vld [vmem:[%s417_s0 + $0x1] ss:$16 sm:%s179_s9]   ;;  %v173_v46 = vsel %vm6_vm0, %v247_v39, %v246_v38 }
  0x15   :  { %126 = vrot.lane.b32.xlu1 %v125_v31, %s277_s6  ;;  %v3_v40 = vld [vmem:[%s417_s0] ss:$16 sm:%s2_s15]   ;;  %s4_s19 = smov 12  ;;  %s279_s24 = smov 32  }
  0x16   :  { %v5_v43 = vld [vmem:[%s417_s0] ss:$16 sm:%s4_s19]   ;;  %v249_v44 = vld [vmem:[%s417_s0 + $0x1] ss:$16 sm:%s182_s14]   ;;  %s280_s0 = smov 24   ;;  %s281_s27 = smov 16  }
  0x17   :  { %v7_v45 = vsel %vm6_vm0, %v5_v43, %v3_v40  ;;  %v185_v47 = vsel %vm6_vm0, %v249_v44, %v248_v42  ;;  %s282_s28 = smov 8   ;;  %vm188_vm0 = vcmask 130112  }
  0x18   :  { %138 = vrot.lane.b32.xlu0 %v137_v34, %s278_s16  ;;  %9 = vst.msk [vmem:[#allocation0] ss:$8 sm:$0xf] %vm8_vm1, %v7_v45  }
  0x19   :  { %150 = vrot.lane.b32.xlu1 %v149_v37, %s279_s24 }
  0x1c   :  { %162 = vrot.lane.b32.xlu0 %v161_v41, %s280_s0 }
  0x1d   :  { %174 = vrot.lane.b32.xlu1 %v173_v46, %s281_s27 }
  0x20   :  { %186 = vrot.lane.b32.xlu0 %v185_v47, %s282_s28 }
  0x76   :  { %v19_v48 = vpop.permute.xlu0 %18  }
  0x77   :  { %21 = vst.msk [vmem:[#allocation0] ss:$8 sm:$0xf] %vm20_vm2, %v19_v48   ;;  %v43_v49 = vpop.permute.xlu1 %42  }
  0x7a   :  { %v31_v50 = vpop.permute.xlu0 %30  }
  0x7b   :  { %33 = vst.msk [vmem:[#allocation0] ss:$8 sm:$0xf] %vm32_vm3, %v31_v50   ;;  %v55_v51 = vpop.permute.xlu1 %54  }
  0x7c   :  { %45 = vst.msk [vmem:[#allocation0] ss:$8 sm:$0xf] %vm44_vm4, %v43_v49  }
  0x7d   :  { %57 = vst.msk [vmem:[#allocation0] ss:$8 sm:$0xf] %vm56_vm5, %v55_v51  }
  0x7e   :  { %v67_v52 = vpop.permute.xlu0 %66  }
  0x7f   :  { %69 = vst.msk [vmem:[#allocation0] ss:$8 sm:$0xf] %vm68_vm6, %v67_v52   ;;  %v79_v53 = vpop.permute.xlu1 %78  }
  0x80   :  { %81 = vst.msk [vmem:[#allocation0] ss:$8 sm:$0xf] %vm80_vm7, %v79_v53  }
  0x82   :  { %v91_v54 = vpop.permute.xlu0 %90  }
  0x83   :  { %93 = vst.msk [vmem:[#allocation0] ss:$8 sm:$0xf] %vm92_vm8, %v91_v54   ;;  %v103_v55 = vpop.permute.xlu1 %102  }
  0x84   :  { %105 = vst.msk [vmem:[#allocation0] ss:$8 sm:$0xf] %vm104_vm9, %v103_v55  }
  0x86   :  { %v115_v56 = vpop.permute.xlu0 %114  }
  0x87   :  { %117 = vst.msk [vmem:[#allocation0] ss:$8 sm:$0xf] %vm116_vm10, %v115_v56   ;;  %v127_v57 = vpop.permute.xlu1 %126  }
  0x88   :  { %129 = vst.msk [vmem:[#allocation0] ss:$8 sm:$0xf] %vm128_vm11, %v127_v57  }
  0x8a   :  { %v139_v58 = vpop.permute.xlu0 %138  }
  0x8b   :  { %141 = vst.msk [vmem:[#allocation0] ss:$8 sm:$0xf] %vm140_vm12, %v139_v58   ;;  %v151_v59 = vpop.permute.xlu1 %150  }
  0x8c   :  { %153 = vst.msk [vmem:[#allocation0] ss:$8 sm:$0xf] %vm152_vm13, %v151_v59  }
  0x8e   :  { %v163_v60 = vpop.permute.xlu0 %162  }
  0x8f   :  { %165 = vst.msk [vmem:[#allocation0] ss:$8 sm:$0xf] %vm164_vm14, %v163_v60   ;;  %v175_v61 = vpop.permute.xlu1 %174  }
  0x90   :  { %177 = vst.msk [vmem:[#allocation0] ss:$8 sm:$0xf] %vm176_vm15, %v175_v61  }
  0x92   :  { %v187_v62 = vpop.permute.xlu0 %186  }
  0x93   :  { %189 = vst.msk [vmem:[#allocation0] ss:$8 sm:$0xf] %vm188_vm0, %v187_v62  }
  0x9a   :  { %v194_v63 = vld [vmem:[#allocation0] sm:$0x1]  ;;  %v199_v0 = vld [vmem:[#allocation0 + $0x8] sm:$0x1]  ;;  %v205_v1 = vld [vmem:[#allocation0 + $0x10] sm:$0x1] }
  0x9b   :  { %197 = vst [vmem:[%s418_s1] sm:$0x1] %v194_v63  ;;  %250 = vst [vmem:[%s418_s1 + $0x1] sm:$0x1] %v199_v0  ;;  %v212_v2 = vld [vmem:[#allocation0 + $0x18] sm:$0x1] }
  0x9c   :  { %251 = vst [vmem:[%s418_s1 + $0x2] sm:$0x1] %v205_v1  ;;  %252 = vst [vmem:[%s418_s1 + $0x3] sm:$0x1] %v212_v2 }

// kernel: up_convolution.3
= control target key start
LH: loop header
LB: loop body
LE: loop exit
PB: predicated region body
PF: predicated region fallthrough
CT: control target
= control target key end

     0   :  { %s480_s12 = smov 0   ;;  %s482_s13 = smov 0   ;;  %s523_s0 = inlined_call_operand.vmem [shape: bf16[2,16,512], index: 0, kind: input, shape index: {}]   ;;  %s524_s1 = inlined_call_operand.vmem [shape: f32[1,512], index: 1, kind: input, shape index: {}]   ;;  %s525_s2 = inlined_call_operand.vmem [shape: f32[1,512], index: 2, kind: input, shape index: {}]   ;;  %s526_s3 = inlined_call_operand.vmem [shape: f32[2,16,512], index: 3, kind: output, shape index: {}]  }
   0x1   :  { %s484_s14 = smov 0  }
   0x2 LB: > { %s25_s15 = sadd.s32 1, %s454_s13  ;;  %p403_p0 = scmp.ge.s32.totalorder %s458_s14, 1  ;;  %s458_s14 = sphi %s484_s14, %s13_s14   ;;  %s454_s13 = sphi %s482_s13, %s528_s13   ;;  %s450_s12 = sphi %s480_s12, %s527_s12  }
   0x3   : > { %p27_p1 = scmp.ge.s32.totalorder %s25_s15, 2  ;;  %p159_p2 = scmp.lt.s32.totalorder %s458_s14, 3 }
   0x5   : > { %s530_s15 = smov (%p27_p1, %s25_s15), 0  ;;  %p160_p3 = pnand %p403_p0, %p159_p2 }
   0x6   : > { %p194_p4 = scmp.lt.s32.totalorder (!%p160_p3), %s450_s12, 1 }
   0x7   : > { %163 = sbr.rel (%p160_p3) target bundleno = 30 (0x1e), region = 32 }
   0xc   : > { %v229_v0 = vlaneseq  ;;  %s532_s12 = smov (!%p194_p4, %s450_s12), 1  ;;  %v227_v2 = vld [vmem:[%s524_s1] sm:$0xf] }
   0xd   : > { %v257_v3 = vld [vmem:[%s525_s2] sm:$0xf]  ;;  %s410_s20 = sshll.u32 %s532_s12, 5  ;;  %s411_s24 = sshll.u32 %s532_s12, 6 }
   0xe   : > { %v230_v1 = vshrl.u32 %v229_v0, 7  ;;  %s202_s23 = scalar_lea.vmem %s523_s0, %s410_s20  ;;  %s213_s27 = scalar_lea.vmem %s526_s3, %s411_s24 }
   0xf   : > { %v215_v8 = vld [vmem:[%s202_s23] sm:$0xff]  ;;  %v216_v13 = vld [vmem:[%s202_s23 + $0x8] sm:$0xff]  ;;  %v217_v14 = vld [vmem:[%s202_s23 + $0x10] sm:$0xff] }
  0x10   : > { %v231_v4 = vsub.s32 0, %v230_v1  ;;  %v235_v5 = vsub.s32 1, %v230_v1  ;;  %v239_v6 = vsub.s32 2, %v230_v1  ;;  %v243_v7 = vsub.s32 3, %v230_v1  ;;  %v218_v19 = vld [vmem:[%s202_s23 + $0x18] sm:$0xff] }
  0x11   : > { %v219_v15 = vunpack.c.l.bf16 %v215_v8  ;;  %v220_v16 = vunpack.c.h.bf16 %v215_v8  ;;  %v221_v17 = vunpack.c.l.bf16 %v216_v13  ;;  %v222_v21 = vunpack.c.h.bf16 %v216_v13 }
  0x12   : > { %v232_v9 = vrot.slane %v227_v2, %v231_v4  ;;  %v262_v10 = vrot.slane %v257_v3, %v231_v4  ;;  %v236_v11 = vrot.slane %v227_v2, %v235_v5  ;;  %v266_v12 = vrot.slane %v257_v3, %v235_v5 }
  0x13   : > { %v240_v18 = vrot.slane %v227_v2, %v239_v6  ;;  %v270_v20 = vrot.slane %v257_v3, %v239_v6  ;;  %v244_v22 = vrot.slane %v227_v2, %v243_v7  ;;  %v274_v23 = vrot.slane %v257_v3, %v243_v7 }
  0x14   : > { %v249_v24 = vmul.f32 %v232_v9, %v219_v15  ;;  %v250_v25 = vmul.f32 %v236_v11, %v220_v16  ;;  %v223_v27 = vunpack.c.l.bf16 %v217_v14  ;;  %v224_v29 = vunpack.c.h.bf16 %v217_v14 }
  0x15   : > { %v251_v26 = vmul.f32 %v240_v18, %v221_v17  ;;  %v252_v28 = vmul.f32 %v244_v22, %v222_v21  ;;  %v225_v30 = vunpack.c.l.bf16 %v218_v19  ;;  %v226_v31 = vunpack.c.h.bf16 %v218_v19 }
  0x16   : > { %v279_v32 = vadd.f32 %v262_v10, %v249_v24  ;;  %v280_v33 = vadd.f32 %v266_v12, %v250_v25  ;;  %v253_v35 = vmul.f32 %v232_v9, %v223_v27  ;;  %v254_v37 = vmul.f32 %v236_v11, %v224_v29 }
  0x17   : > { %v281_v34 = vadd.f32 %v270_v20, %v251_v26  ;;  %v282_v36 = vadd.f32 %v274_v23, %v252_v28  ;;  %v255_v38 = vmul.f32 %v240_v18, %v225_v30  ;;  %v256_v39 = vmul.f32 %v244_v22, %v226_v31 }
  0x18   : > { %v287_v40 = vmax.f32 %v279_v32, 0.0  ;;  %v288_v41 = vmax.f32 %v280_v33, 0.0  ;;  %v283_v43 = vadd.f32 %v262_v10, %v253_v35  ;;  %v284_v45 = vadd.f32 %v266_v12, %v254_v37 }
  0x19   : > { %v289_v42 = vmax.f32 %v281_v34, 0.0  ;;  %v290_v44 = vmax.f32 %v282_v36, 0.0  ;;  %v285_v46 = vadd.f32 %v270_v20, %v255_v38  ;;  %v286_v47 = vadd.f32 %v274_v23, %v256_v39 }
  0x1a   : > { %295 = vst [vmem:[%s213_s27] sm:$0xff] %v287_v40  ;;  %296 = vst [vmem:[%s213_s27 + $0x8] sm:$0xff] %v288_v41  ;;  %v291_v48 = vmax.f32 %v283_v43, 0.0  ;;  %v292_v49 = vmax.f32 %v284_v45, 0.0 }
  0x1b   : > { %297 = vst [vmem:[%s213_s27 + $0x10] sm:$0xff] %v289_v42  ;;  %298 = vst [vmem:[%s213_s27 + $0x18] sm:$0xff] %v290_v44  ;;  %v293_v50 = vmax.f32 %v285_v46, 0.0  ;;  %v294_v51 = vmax.f32 %v286_v47, 0.0 }
  0x1c   : > { %299 = vst [vmem:[%s213_s27 + $0x20] sm:$0xff] %v291_v48  ;;  %300 = vst [vmem:[%s213_s27 + $0x28] sm:$0xff] %v292_v49 }
  0x1d   : > { %301 = vst [vmem:[%s213_s27 + $0x30] sm:$0xff] %v293_v50  ;;  %302 = vst [vmem:[%s213_s27 + $0x38] sm:$0xff] %v294_v51 }
  0x1e PF: > { %s13_s14 = sadd.s32 1, %s458_s14   ;;  %s527_s12 = smov %s454_s13 }
  0x1f   : > { %p10_p5 = scmp.ge.s32.totalorder %s13_s14, 4   ;;  %s528_s13 = smov %s530_s15 }
  0x21   :  { %12 = sbr.rel (!%p10_p5) target bundleno = 2 (0x2), region = 62 }

// kernel: up_convolution.2
= control target key start
LH: loop header
LB: loop body
LE: loop exit
PB: predicated region body
PF: predicated region fallthrough
CT: control target
= control target key end

     0   :  { %s3461_s12 = smov 0   ;;  %s5215_s0 = inlined_call_operand.vmem [shape: bf16[2,18,18,4], index: 0, kind: input, shape index: {}]   ;;  %s5216_s1 = inlined_call_operand.vmem [shape: bf16[36,32], index: 1, kind: input, shape index: {}]   ;;  %s5217_s2 = inlined_call_operand.vmem [shape: bf16[2,256,32], index: 2, kind: output, shape index: {0}]   ;;  %s5218_s3 = inlined_call_operand.vmem [shape: f32[2,2,8], index: 3, kind: output, shape index: {1}]  }
   0x1 LB: > { %s2934_s13 = sadd.s32 4294967295, %s3428_s12   ;;  %p2938_p0 = scmp.ge.s32.totalorder %s3428_s12, 1  ;;  %s3428_s12 = sphi %s3461_s12, %s14_s12  }
   0x2   : > { %p140_p1 = scmp.lt.s32.totalorder %s3428_s12, 3 }
   0x4   : > { %p141_p2 = pnand %p2938_p0, %p140_p1 }
   0x5   : > { %p168_p3 = scmp.lt.s32.totalorder (!%p141_p2), %s2934_s13, 1  ;;  %s3430_s18 = smov (!%p141_p2), 4  }
   0x6   : > { %144 = sbr.rel (%p141_p2) target bundleno = 1330 (0x532), region = 28  ;;  %s3431_s19 = smov (!%p141_p2), 8  }
   0x7   : > { %s3432_s20 = smov (!%p141_p2), 12   ;;  %s3433_s21 = smov (!%p141_p2), 16  }
   0x8   : > { %s3434_s22 = smov (!%p141_p2), 20   ;;  %s3435_s23 = smov (!%p141_p2), 24  }
   0x9   : > { %s3436_s26 = smov (!%p141_p2), 28   ;;  %s3437_s4 = smov (!%p141_p2), 32  }
   0xa   : > { %s3438_s9 = smov (!%p141_p2), 112   ;;  %s3439_s10 = smov (!%p141_p2), 120  }
   0xb   : > { %s5220_s13 = smov (!%p168_p3, %s2934_s13), 1  ;;  %vm500_vm0 = vcmask 1046528   ;;  %vm419_vm1 = vcmask 27648   ;;  %vm838_vm2 = vcmask 1045504   ;;  %vm2201_vm3 = vcmask 1041408   ;;  %s3440_s11 = smov 104  }
   0xc   : > { %s3344_s14 = smul.u32 216, %s5220_s13  ;;  %vm805_vm4 = vcmask 60448   ;;  %vm1143_vm5 = vcmask 93248   ;;  %vm1278_vm6 = vcmask 126048   ;;  %vm1423_vm7 = vcmask 158848   ;;  %s3138_s5 = sshll.u32 %s5220_s13, 7 }
   0xd   : > { %vm1565_vm8 = vcmask 191648   ;;  %vm1700_vm9 = vcmask 224448   ;;  %vm1845_vm10 = vcmask 257248   ;;  %vm1987_vm11 = vcmask 290048   ;;  %s4538_s8 = scalar_lea.vmem %s5217_s2, %s3138_s5 }
   0xe   : > { %s3475_s17 = scalar_lea.vmem %s5215_s0, %s3344_s14  ;;  %vm2152_vm12 = vcmask 293888   ;;  %vm2366_vm13 = vcmask 261120   ;;  %vm2559_vm14 = vcmask 257024   ;;  %vm2685_vm15 = vcmask 64512   ;;  %s2942_s14 = sshll.u32 %s5220_s13, 1 }
   0xf   : > { %v186_v0 = vld [vmem:[%s3475_s17 + $0xc] sm:$0xf]  ;;  %v187_v1 = vld [vmem:[%s3475_s17 + $0x10] sm:$0xf]  ;;  %v3480_v2 = vld [vmem:[%s3475_s17] sm:$0xf] }
  0x10   : > { %v240_v3 = vunpack.c.l.bf16 %v186_v0  ;;  %v241_v4 = vunpack.c.l.bf16 %v187_v1  ;;  %v3483_v5 = vld [vmem:[%s3475_s17 + $0x4] sm:$0xf]  ;;  %v237_v6 = vunpack.c.l.bf16 %v3480_v2  ;;  %v188_v7 = vld [vmem:[%s3475_s17 + $0x14] sm:$0x1]  ;;  %v185_v8 = vld [vmem:[%s3475_s17 + $0x8] sm:$0x1]  ;;  %v3488_v9 = vcombine.low %v187_v1, %v187_v1 }
  0x11   : > { %v238_v10 = vunpack.c.l.bf16 %v3483_v5  ;;  %v242_v11 = vunpack.c.l.bf16 %v188_v7  ;;  %v239_v12 = vunpack.c.l.bf16 %v185_v8  ;;  %v3491_v13 = vcombine.low %v186_v0, %v186_v0  ;;  %v3504_v28 = vld [vmem:[%s3475_s17 + $0x1c] sm:$0xf]  ;;  %v3507_v30 = vld [vmem:[%s3475_s17 + $0x18] sm:$0xf]  ;;  %v3525_v40 = vld [vmem:[%s3475_s17 + $0x28] sm:$0xf] }
  0x12   : > { %v506_v14 = vrot.slane %v240_v3, 1  ;;  %v507_v15 = vrot.slane %v241_v4, 1  ;;  %v501_v16 = vrot.slane %v237_v6, 1  ;;  %423 = vst.msk [vmem:[#allocation2 + $0xc] sm:$0xf] %vm419_vm1, %v3488_v9  ;;  %v839_v23 = vrot.slane %v237_v6, 2 }
  0x13   : > { %v502_v17 = vrot.slane %v238_v10, 1  ;;  %v509_v18 = vrot.slane %v242_v11, 1  ;;  %v504_v19 = vrot.slane %v239_v12, 1  ;;  %422 = vst.msk [vmem:[#allocation2 + $0x8] sm:$0xf] %vm419_vm1, %v3491_v13  ;;  %v840_v21 = vrot.slane %v238_v10, 2 }
  0x14   : > { %v508_v20 = vsel %vm500_vm0, %v506_v14, %v507_v15  ;;  %v842_v22 = vrot.slane %v239_v12, 2  ;;  %v845_v32 = vrot.slane %v241_v4, 2  ;;  %v847_v33 = vrot.slane %v242_v11, 2  ;;  %v3541_v46 = vld [vmem:[%s3475_s17 + $0x24] sm:$0xf] }
  0x15   : > { %v3498_v24 = vpack.c.bf16 %v508_v20, %v508_v20  ;;  %v503_v25 = vsel %vm500_vm0, %v501_v16, %v502_v17  ;;  %v510_v26 = vsel %vm500_vm0, %v507_v15, %v509_v18  ;;  %v505_v27 = vsel %vm500_vm0, %v502_v17, %v504_v19  ;;  %v196_v47 = vld [vmem:[%s3475_s17 + $0x34] sm:$0xf]  ;;  %v195_v48 = vld [vmem:[%s3475_s17 + $0x30] sm:$0xf]  ;;  %v191_v56 = vld [vmem:[%s3475_s17 + $0x20] sm:$0x1] }
  0x16   : > { %v3171_v29 = vpack.c.bf16 %v503_v25, %v503_v25  ;;  %v3511_v31 = vpack.c.bf16 %v510_v26, %v510_v26  ;;  %v3172_v34 = vpack.c.bf16 %v505_v27, %v505_v27  ;;  %v843_v35 = vsel %vm838_vm2, %v840_v21, %v842_v22  ;;  %v199_v59 = vld [vmem:[%s3475_s17 + $0x40] sm:$0xf]  ;;  %v202_v20 = vld [vmem:[%s3475_s17 + $0x4c] sm:$0xf]  ;;  %v201_v22 = vld [vmem:[%s3475_s17 + $0x48] sm:$0xf] }
  0x17   : > { %713 = vrot.lane.b32.xlu1 %v3498_v24, %s3430_s18  ;;  %v844_v36 = vrot.slane %v240_v3, 2  ;;  %v3517_v37 = vcombine.low %v3504_v28, %v3504_v28  ;;  %v841_v38 = vsel %vm838_vm2, %v839_v23, %v840_v21  ;;  %v3522_v39 = vcombine.low %v3507_v30, %v3507_v30  ;;  %v198_v3 = vld [vmem:[%s3475_s17 + $0x3c] sm:$0xf] }
  0x18   : > { %709 = vrot.lane.b32.xlu0 %v3171_v29, %s3430_s18  ;;  %v3204_v41 = vpack.c.bf16 %v843_v35, %v843_v35  ;;  %v3203_v42 = vpack.c.bf16 %v841_v38, %v841_v38  ;;  %v848_v43 = vsel %vm838_vm2, %v845_v32, %v847_v33  ;;  %v3538_v45 = vcombine.low %v3525_v40, %v3525_v40 }
  0x19   : > { %425 = vst.msk [vmem:[#allocation2 + $0x14] sm:$0xf] %vm419_vm1, %v3517_v37  ;;  %424 = vst.msk [vmem:[#allocation2 + $0x10] sm:$0xf] %vm419_vm1, %v3522_v39  ;;  %v846_v44 = vsel %vm838_vm2, %v844_v36, %v845_v32  ;;  %v3548_v49 = vpack.c.bf16 %v848_v43, %v848_v43  ;;  %v3554_v51 = vcombine.low %v3541_v46, %v3541_v46  ;;  %v250_v52 = vunpack.c.l.bf16 %v196_v47 }
  0x1a   : > { %427 = vst.msk [vmem:[#allocation2 + $0x1c] sm:$0xf] %vm419_vm1, %v3538_v45  ;;  %v3550_v50 = vpack.c.bf16 %v846_v44, %v846_v44  ;;  %v3557_v53 = vcombine.low %v196_v47, %v196_v47  ;;  %v249_v54 = vunpack.c.l.bf16 %v195_v48  ;;  %v3559_v55 = vcombine.low %v195_v48, %v195_v48  ;;  %v194_v44 = vld [vmem:[%s3475_s17 + $0x2c] sm:$0x1] }
  0x1b   : > { %715 = vrot.lane.b32.xlu1 %v3511_v31, %s3430_s18  ;;  %426 = vst.msk [vmem:[#allocation2 + $0x18] sm:$0xf] %vm419_vm1, %v3554_v51  ;;  %v3564_v57 = vrot.slane %v250_v52, 1  ;;  %v3566_v58 = vrot.slane %v250_v52, 2  ;;  %v244_v62 = vunpack.c.l.bf16 %v3504_v28  ;;  %v243_v63 = vunpack.c.l.bf16 %v3507_v30 }
  0x1c   : > { %711 = vrot.lane.b32.xlu0 %v3172_v34, %s3430_s18  ;;  %428 = vst.msk [vmem:[#allocation2 + $0x20] sm:$0xf] %vm419_vm1, %v3559_v55  ;;  %429 = vst.msk [vmem:[#allocation2 + $0x24] sm:$0xf] %vm419_vm1, %v3557_v53  ;;  %v521_v60 = vrot.slane %v249_v54, 1  ;;  %v859_v61 = vrot.slane %v249_v54, 2  ;;  %v245_v0 = vunpack.c.l.bf16 %v191_v56  ;;  %v253_v1 = vunpack.c.l.bf16 %v199_v59 }
  0x1d   : > { %v3588_v7 = vcombine.low %v199_v59, %v199_v59  ;;  %v252_v8 = vunpack.c.l.bf16 %v198_v3  ;;  %v3596_v12 = vcombine.low %v198_v3, %v198_v3  ;;  %v512_v15 = vrot.slane %v244_v62, 1  ;;  %v205_v59 = vld [vmem:[%s3475_s17 + $0x58] sm:$0xf] }
  0x1e   : > { %v3582_v4 = vsel %vm500_vm0, %v521_v60, %v3564_v57  ;;  %v3586_v6 = vsel %vm838_vm2, %v859_v61, %v3566_v58  ;;  %v3592_v10 = vrot.slane %v253_v1, 1  ;;  %v3594_v11 = vrot.slane %v253_v1, 2  ;;  %v204_v60 = vld [vmem:[%s3475_s17 + $0x54] sm:$0xf] }
  0x1f   : > { %1049 = vrot.lane.b32.xlu1 %v3204_v41, %s3431_s19  ;;  %v526_v14 = vrot.slane %v252_v8, 1  ;;  %431 = vst.msk [vmem:[#allocation2 + $0x2c] sm:$0xf] %vm419_vm1, %v3588_v7  ;;  %v514_v16 = vrot.slane %v245_v0, 1  ;;  %v864_v17 = vrot.slane %v252_v8, 2  ;;  %v511_v18 = vrot.slane %v243_v63, 1 }
  0x20   : > { %1047 = vrot.lane.b32.xlu0 %v3203_v42, %s3431_s19  ;;  %430 = vst.msk [vmem:[#allocation2 + $0x28] sm:$0xf] %vm419_vm1, %v3596_v12  ;;  %v256_v23 = vunpack.c.l.bf16 %v202_v20  ;;  %v3625_v25 = vcombine.low %v202_v20, %v202_v20  ;;  %v255_v26 = vunpack.c.l.bf16 %v201_v22  ;;  %v3628_v27 = vcombine.low %v201_v22, %v201_v22  ;;  %v3378_v1 = vld [vmem:[%s5216_s1 + $0x10] ss:$0 sps:$4 sm:$0x33]   ;;  %v3381_v20 = vld [vmem:[%s5216_s1] sm:$0xff]  }
  0x21   : > { %v3608_v19 = vsel %vm500_vm0, %v526_v14, %v3592_v10  ;;  %v3616_v21 = vsel %vm838_vm2, %v864_v17, %v3594_v11  ;;  %v850_v32 = vrot.slane %v244_v62, 2  ;;  %v852_v34 = vrot.slane %v245_v0, 2  ;;  %3342 = vmatprep.subr.msk.bf16.mxu0 %vm2201_vm3, %v3378_v1  ;;  %3343 = vmatprep.subr.msk.bf16.mxu1 %vm2201_vm3, %v3378_v1 }
  0x22   : > { %v3630_v28 = vrot.slane %v256_v23, 1  ;;  %433 = vst.msk [vmem:[#allocation2 + $0x34] sm:$0xf] %vm419_vm1, %v3625_v25  ;;  %v531_v30 = vrot.slane %v255_v26, 1  ;;  %432 = vst.msk [vmem:[#allocation2 + $0x30] sm:$0xf] %vm419_vm1, %v3628_v27  ;;  %v247_v48 = vunpack.c.l.bf16 %v3525_v40  ;;  %v246_v52 = vunpack.c.l.bf16 %v3541_v46 }
  0x23   : > { %1053 = vrot.lane.b32.xlu1 %v3548_v49, %s3431_s19  ;;  %v849_v35 = vrot.slane %v243_v63, 2  ;;  %v869_v41 = vrot.slane %v255_v26, 2  ;;  %v3681_v61 = vcombine.low %v205_v59, %v205_v59  ;;  %v3683_v62 = vcombine.low %v204_v60, %v204_v60 }
  0x24   : > { %1051 = vrot.lane.b32.xlu0 %v3550_v50, %s3431_s19  ;;  %v3646_v36 = vsel %vm500_vm0, %v531_v30, %v3630_v28  ;;  %v516_v56 = vrot.slane %v246_v52, 1  ;;  %v259_v40 = vunpack.c.l.bf16 %v205_v59  ;;  %v258_v46 = vunpack.c.l.bf16 %v204_v60  ;;  %v200_v59 = vld [vmem:[%s3475_s17 + $0x44] sm:$0x1] }
  0x25   : > { %v851_v38 = vsel %vm838_vm2, %v849_v35, %v850_v32  ;;  %435 = vst.msk [vmem:[#allocation2 + $0x3c] sm:$0xf] %vm419_vm1, %v3681_v61  ;;  %434 = vst.msk [vmem:[#allocation2 + $0x38] sm:$0xf] %vm419_vm1, %v3683_v62  ;;  %v2203_v14 = vsel %vm2201_vm3, %v3378_v1, 0  ;;  %v855_v17 = vrot.slane %v247_v48, 2 }
  0x26   : > { %v3662_v43 = vpack.c.bf16 %v851_v38, %v851_v38  ;;  %v3695_v63 = vrot.slane %v259_v40, 1  ;;  %v536_v0 = vrot.slane %v258_v46, 1  ;;  %3299 = vmatpush3.bf16.msra.mxu0 %v2203_v14  ;;  %3339 = vmatpush3.bf16.msra.mxu1 %v2203_v14  ;;  %v207_v35 = vld [vmem:[%s3475_s17 + $0x60] sm:$0xf]  ;;  %v3824_v14 = vpack.c.bf16 %v3608_v19, %v3608_v19 }
  0x27   : > { %1184 = vrot.lane.b32.xlu1 %v3488_v9, %s3432_s20  ;;  %v3139_v9 = vcombine.low %v3480_v2, %v3480_v2  ;;  %v515_v2 = vsel %vm500_vm0, %v512_v15, %v514_v16  ;;  %v3379_v16 = vld [vmem:[%s5216_s1 + $0x8] sm:$0xff]   ;;  %v3751_v38 = vcombine.low %v207_v35, %v207_v35  ;;  %vm2846_vm3 = vcmask 58368  }
  0x28   : > { %1182 = vrot.lane.b32.xlu0 %v3491_v13, %s3432_s20  ;;  %v3140_v13 = vcombine.low %v3483_v5, %v3483_v5  ;;  %v513_v5 = vsel %vm500_vm0, %v511_v18, %v512_v15  ;;  %v3636_v29 = vpack.c.bf16 %v515_v2, %v515_v2  ;;  %v3706_v15 = vsel %vm500_vm0, %v536_v0, %v3695_v63 }
  0x29   : > { %420 = vst.msk [vmem:[#allocation2] sm:$0xf] %vm419_vm1, %v3139_v9  ;;  %v3642_v33 = vpack.c.bf16 %v513_v5, %v513_v5  ;;  %3300 = vmatprep.subr.bf16.mxu0 %v3379_v16  ;;  %v854_v18 = vrot.slane %v246_v52, 2  ;;  %3337 = vmatprep.subr.bf16.mxu1 %v3379_v16  ;;  %v3722_v2 = vrot.slane %v259_v40, 2  ;;  %436 = vst.msk [vmem:[#allocation2 + $0x40] sm:$0xf] %vm419_vm1, %v3751_v38 }
  0x2a   : > { %421 = vst.msk [vmem:[#allocation2 + $0x4] sm:$0xf] %vm419_vm1, %v3140_v13  ;;  %3301 = vmatpush3.bf16.msra.mxu0 %v3379_v16  ;;  %3340 = vmatpush3.bf16.msra.mxu1 %v3379_v16  ;;  %v211_v40 = vld [vmem:[%s3475_s17 + $0x70] sm:$0xf] }
  0x2b   : > { %1188 = vrot.lane.b32.xlu1 %v3517_v37, %s3432_s20  ;;  %3302 = vmatprep.subr.bf16.mxu0 %v3381_v20  ;;  %v856_v22 = vsel %vm838_vm2, %v854_v18, %v855_v17  ;;  %v265_v0 = vunpack.c.l.bf16 %v211_v40 }
  0x2c   : > { %1186 = vrot.lane.b32.xlu0 %v3522_v39, %s3432_s20  ;;  %3338 = vmatprep.subr.bf16.mxu1 %v3381_v20  ;;  %v3209_v26 = vpack.c.bf16 %v856_v22, %v856_v22 }
  0x2d   : > { %v3844_v22 = vrot.slane %v265_v0, 2 }
  0x2e   : > { %3303 = vmatpush3.bf16.msra.mxu0 %v3381_v20  ;;  %3341 = vmatpush3.bf16.msra.mxu1 %v3381_v20 }
  0x2f   : > { %1329 = vrot.lane.b32.xlu1 %v3511_v31, %s3433_s21  ;;  %v853_v31 = vsel %vm838_vm2, %v850_v32, %v852_v34  ;;  %v208_v34 = vld [vmem:[%s3475_s17 + $0x64] sm:$0xf] }
  0x30   : > { %1327 = vrot.lane.b32.xlu0 %v3498_v24, %s3433_s21  ;;  %v3654_v24 = vrot.slane %v256_v23, 2  ;;  %v3658_v42 = vpack.c.bf16 %v853_v31, %v853_v31  ;;  %v874_v23 = vrot.slane %v258_v46, 2  ;;  %v3749_v31 = vcombine.low %v208_v34, %v208_v34  ;;  %v210_v46 = vld [vmem:[%s3475_s17 + $0x6c] sm:$0xf] }
  0x31   : > { %v264_v1 = vunpack.c.l.bf16 %v210_v46 }
  0x32   : > { %v3667_v47 = vsel %vm838_vm2, %v869_v41, %v3654_v24  ;;  %v3730_v30 = vsel %vm838_vm2, %v874_v23, %v3722_v2  ;;  %v262_v41 = vunpack.c.l.bf16 %v208_v34  ;;  %437 = vst.msk [vmem:[#allocation2 + $0x44] sm:$0xf] %vm419_vm1, %v3749_v31 }
  0x33   : > { %1333 = vrot.lane.b32.xlu1 %v3636_v29, %s3433_s21  ;;  %v884_v23 = vrot.slane %v264_v1, 2 }
  0x34   : > { %1331 = vrot.lane.b32.xlu0 %v3642_v33, %s3433_s21 }
  0x37   : > { %1471 = vrot.lane.b32.xlu1 %v3548_v49, %s3434_s22  ;;  %v248_v49 = vunpack.c.l.bf16 %v194_v44 }
  0x38   : > { %1469 = vrot.lane.b32.xlu0 %v3550_v50, %s3434_s22  ;;  %v517_v50 = vrot.slane %v247_v48, 1  ;;  %v3179_v48 = vpack.c.bf16 %v3582_v4, %v3582_v4 }
  0x39   : > { %v519_v54 = vrot.slane %v248_v49, 1  ;;  %v857_v9 = vrot.slane %v248_v49, 2 }
  0x3b   : > { %1475 = vrot.lane.b32.xlu1 %v3658_v42, %s3434_s22  ;;  %v858_v13 = vsel %vm838_vm2, %v855_v17, %v857_v9 }
  0x3c   : > { %1473 = vrot.lane.b32.xlu0 %v3662_v43, %s3434_s22  ;;  %v3210_v5 = vpack.c.bf16 %v858_v13, %v858_v13 }
  0x3f   : > { %1606 = vrot.lane.b32.xlu1 %v3517_v37, %s3435_s23  ;;  %v520_v37 = vsel %vm500_vm0, %v517_v50, %v519_v54 }
  0x40   : > { %1604 = vrot.lane.b32.xlu0 %v3522_v39, %s3435_s23  ;;  %v518_v39 = vsel %vm500_vm0, %v516_v56, %v517_v50  ;;  %v3178_v3 = vpack.c.bf16 %v520_v37, %v520_v37  ;;  %v3777_v50 = vrot.slane %v262_v41, 2  ;;  %v3785_v56 = vpack.c.bf16 %v3586_v6, %v3586_v6 }
  0x41   : > { %v3177_v8 = vpack.c.bf16 %v518_v39, %v518_v39  ;;  %v3802_v37 = vcombine.low %v211_v40, %v211_v40  ;;  %v3804_v39 = vcombine.low %v210_v46, %v210_v46 }
  0x43   : > { %1610 = vrot.lane.b32.xlu1 %v3538_v45, %s3435_s23  ;;  %439 = vst.msk [vmem:[#allocation2 + $0x4c] sm:$0xf] %vm419_vm1, %v3802_v37  ;;  %438 = vst.msk [vmem:[#allocation2 + $0x48] sm:$0xf] %vm419_vm1, %v3804_v39 }
  0x44   : > { %1608 = vrot.lane.b32.xlu0 %v3554_v51, %s3435_s23 }
  0x47   : > { %1751 = vrot.lane.b32.xlu1 %v3636_v29, %s3436_s26 }
  0x48   : > { %1749 = vrot.lane.b32.xlu0 %v3642_v33, %s3436_s26 }
  0x4b   : > { %1755 = vrot.lane.b32.xlu1 %v3178_v3, %s3436_s26 }
  0x4c   : > { %1753 = vrot.lane.b32.xlu0 %v3177_v8, %s3436_s26 }
  0x4f   : > { %1893 = vrot.lane.b32.xlu1 %v3658_v42, %s3437_s4 }
  0x50   : > { %1891 = vrot.lane.b32.xlu0 %v3662_v43, %s3437_s4 }
  0x53   : > { %719 = vrot.lane.b32.xlu1 %v3636_v29, %s3430_s18  ;;  %v197_v29 = vld [vmem:[%s3475_s17 + $0x38] sm:$0x1] }
  0x54   : > { %717 = vrot.lane.b32.xlu0 %v3642_v33, %s3430_s18  ;;  %v251_v32 = vunpack.c.l.bf16 %v197_v29  ;;  %v3854_v29 = vpack.c.bf16 %v3616_v21, %v3616_v21 }
  0x56   : > { %v524_v33 = vrot.slane %v251_v32, 1  ;;  %v862_v49 = vrot.slane %v251_v32, 2  ;;  %v3858_v32 = vsel %vm838_vm2, %v884_v23, %v3844_v22 }
  0x57   : > { %1897 = vrot.lane.b32.xlu1 %v3210_v5, %s3437_s4 }
  0x58   : > { %1895 = vrot.lane.b32.xlu0 %v3209_v26, %s3437_s4  ;;  %v863_v52 = vsel %vm838_vm2, %v3566_v58, %v862_v49  ;;  %v254_v58 = vunpack.c.l.bf16 %v200_v59 }
  0x59   : > { %v3780_v4 = vpack.c.bf16 %v863_v52, %v863_v52 }
  0x5a   : > { %v529_v6 = vrot.slane %v254_v58, 1  ;;  %v867_v9 = vrot.slane %v254_v58, 2 }
  0x5b   : > { %723 = vrot.lane.b32.xlu1 %v3178_v3, %s3430_s18 }
  0x5c   : > { %721 = vrot.lane.b32.xlu0 %v3177_v8, %s3430_s18  ;;  %v868_v20 = vsel %vm838_vm2, %v3594_v11, %v867_v9 }
  0x5f   : > { %1057 = vrot.lane.b32.xlu1 %v3658_v42, %s3431_s19  ;;  %v261_v42 = vunpack.c.l.bf16 %v207_v35 }
  0x60   : > { %1055 = vrot.lane.b32.xlu0 %v3662_v43, %s3431_s19 }
  0x61   : > { %v541_v43 = vrot.slane %v261_v42, 1  ;;  %v879_v54 = vrot.slane %v261_v42, 2 }
  0x63   : > { %1061 = vrot.lane.b32.xlu1 %v3210_v5, %s3431_s19  ;;  %v3790_v60 = vsel %vm838_vm2, %v879_v54, %v3777_v50 }
  0x64   : > { %1059 = vrot.lane.b32.xlu0 %v3209_v26, %s3431_s19 }
  0x67   : > { %1192 = vrot.lane.b32.xlu1 %v3538_v45, %s3432_s20  ;;  %v525_v45 = vsel %vm500_vm0, %v3564_v57, %v524_v33 }
  0x68   : > { %1190 = vrot.lane.b32.xlu0 %v3554_v51, %s3432_s20  ;;  %v3763_v51 = vrot.slane %v262_v41, 1  ;;  %v3180_v44 = vpack.c.bf16 %v525_v45, %v525_v45  ;;  %v203_v45 = vld [vmem:[%s3475_s17 + $0x50] sm:$0x1] }
  0x6a   : > { %v3771_v57 = vsel %vm500_vm0, %v541_v43, %v3763_v51 }
  0x6b   : > { %1196 = vrot.lane.b32.xlu1 %v3557_v53, %s3432_s20 }
  0x6c   : > { %1194 = vrot.lane.b32.xlu0 %v3559_v55, %s3432_s20 }
  0x6f   : > { %1337 = vrot.lane.b32.xlu1 %v3178_v3, %s3433_s21  ;;  %v546_v3 = vrot.slane %v264_v1, 1 }
  0x70   : > { %1335 = vrot.lane.b32.xlu0 %v3177_v8, %s3433_s21 }
  0x73   : > { %1341 = vrot.lane.b32.xlu1 %v3180_v44, %s3433_s21 }
  0x74   : > { %1339 = vrot.lane.b32.xlu0 %v3179_v48, %s3433_s21 }
  0x77   : > { %1479 = vrot.lane.b32.xlu1 %v3210_v5, %s3434_s22 }
  0x78   : > { %1477 = vrot.lane.b32.xlu0 %v3209_v26, %s3434_s22  ;;  %v3849_v26 = vpack.c.bf16 %v868_v20, %v868_v20 }
  0x7b   : > { %1483 = vrot.lane.b32.xlu1 %v3780_v4, %s3434_s22 }
  0x7c   : > { %1481 = vrot.lane.b32.xlu0 %v3785_v56, %s3434_s22 }
  0x7f   : > { %1614 = vrot.lane.b32.xlu1 %v3557_v53, %s3435_s23  ;;  %v530_v53 = vsel %vm500_vm0, %v3592_v10, %v529_v6 }
  0x80   : > { %1612 = vrot.lane.b32.xlu0 %v3559_v55, %s3435_s23  ;;  %v3816_v55 = vrot.slane %v265_v0, 1  ;;  %v3819_v8 = vpack.c.bf16 %v530_v53, %v530_v53 }
  0x82   : > { %v3828_v16 = vsel %vm500_vm0, %v546_v3, %v3816_v55  ;;  %v3921_v3 = vpack.c.bf16 %v3646_v36, %v3646_v36 }
  0x83   : > { %1618 = vrot.lane.b32.xlu1 %v3588_v7, %s3435_s23 }
  0x84   : > { %1616 = vrot.lane.b32.xlu0 %v3596_v12, %s3435_s23 }
  0x87   : > { %1759 = vrot.lane.b32.xlu1 %v3180_v44, %s3436_s26 }
  0x88   : > { %1757 = vrot.lane.b32.xlu0 %v3179_v48, %s3436_s26 }
  0x89   : > { %v714_v10 = vpop.permute.xlu1 %713 }
  0x8a   : > { %808 = vst.msk [vmem:[#allocation2 + $0x8] sm:$0xf] %vm805_vm4, %v714_v10  ;;  %v710_v17 = vpop.permute.xlu0 %709 }
  0x8b   : > { %806 = vst.msk [vmem:[#allocation2] sm:$0xf] %vm805_vm4, %v710_v17  ;;  %1763 = vrot.lane.b32.xlu1 %v3819_v8, %s3436_s26 }
  0x8c   : > { %1761 = vrot.lane.b32.xlu0 %v3824_v14, %s3436_s26 }
  0x8d   : > { %v716_v18 = vpop.permute.xlu1 %715 }
  0x8e   : > { %809 = vst.msk [vmem:[#allocation2 + $0xc] sm:$0xf] %vm805_vm4, %v716_v18  ;;  %v712_v19 = vpop.permute.xlu0 %711 }
  0x8f   : > { %807 = vst.msk [vmem:[#allocation2 + $0x4] sm:$0xf] %vm805_vm4, %v712_v19  ;;  %1901 = vrot.lane.b32.xlu1 %v3780_v4, %s3437_s4 }
  0x90   : > { %1899 = vrot.lane.b32.xlu0 %v3785_v56, %s3437_s4 }
  0x91   : > { %v1050_v13 = vpop.permute.xlu1 %1049 }
  0x92   : > { %1145 = vst.msk [vmem:[#allocation2 + $0x4] sm:$0xf] %vm1143_vm5, %v1050_v13  ;;  %v1048_v5 = vpop.permute.xlu0 %1047 }
  0x93   : > { %1144 = vst.msk [vmem:[#allocation2] sm:$0xf] %vm1143_vm5, %v1048_v5  ;;  %727 = vrot.lane.b32.xlu1 %v3180_v44, %s3430_s18  ;;  %v257_v44 = vunpack.c.l.bf16 %v203_v45  ;;  %v206_v5 = vld [vmem:[%s3475_s17 + $0x5c] sm:$0x1] }
  0x94   : > { %725 = vrot.lane.b32.xlu0 %v3179_v48, %s3430_s18 }
  0x95   : > { %v1054_v11 = vpop.permute.xlu1 %1053  ;;  %v534_v52 = vrot.slane %v257_v44, 1  ;;  %v872_v10 = vrot.slane %v257_v44, 2 }
  0x96   : > { %1147 = vst.msk [vmem:[#allocation2 + $0xc] sm:$0xf] %vm1143_vm5, %v1054_v11  ;;  %v1052_v33 = vpop.permute.xlu0 %1051 }
  0x97   : > { %1146 = vst.msk [vmem:[#allocation2 + $0x8] sm:$0xf] %vm1143_vm5, %v1052_v33  ;;  %1905 = vrot.lane.b32.xlu1 %v3849_v26, %s3437_s4  ;;  %v873_v36 = vsel %vm838_vm2, %v3654_v24, %v872_v10  ;;  %v3947_v24 = vpack.c.bf16 %v3667_v47, %v3667_v47  ;;  %v260_v47 = vunpack.c.l.bf16 %v206_v5 }
  0x98   : > { %1903 = vrot.lane.b32.xlu0 %v3854_v29, %s3437_s4  ;;  %v3941_v13 = vpack.c.bf16 %v873_v36, %v873_v36 }
  0x99   : > { %v1185_v21 = vpop.permute.xlu1 %1184 }
  0x9a   : > { %1280 = vst.msk [vmem:[#allocation2 + $0x4] sm:$0xf] %vm1278_vm6, %v1185_v21  ;;  %v1183_v34 = vpop.permute.xlu0 %1182  ;;  %v539_v21 = vrot.slane %v260_v47, 1 }
  0x9b   : > { %1279 = vst.msk [vmem:[#allocation2] sm:$0xf] %vm1278_vm6, %v1183_v34  ;;  %731 = vrot.lane.b32.xlu1 %v3819_v8, %s3430_s18 }
  0x9c   : > { %729 = vrot.lane.b32.xlu0 %v3824_v14, %s3430_s18 }
  0x9d   : > { %v1189_v35 = vpop.permute.xlu1 %1188 }
  0x9e   : > { %1282 = vst.msk [vmem:[#allocation2 + $0xc] sm:$0xf] %vm1278_vm6, %v1189_v35  ;;  %v1187_v41 = vpop.permute.xlu0 %1186  ;;  %v217_v35 = vld [vmem:[%s3475_s17 + $0x88] sm:$0xf] }
  0x9f   : > { %1281 = vst.msk [vmem:[#allocation2 + $0x8] sm:$0xf] %vm1278_vm6, %v1187_v41  ;;  %1065 = vrot.lane.b32.xlu1 %v3780_v4, %s3431_s19  ;;  %v214_v4 = vld [vmem:[%s3475_s17 + $0x7c] sm:$0xf]  ;;  %v216_v41 = vld [vmem:[%s3475_s17 + $0x84] sm:$0xf]  ;;  %v3969_v45 = vcombine.low %v217_v35, %v217_v35 }
  0xa0   : > { %1063 = vrot.lane.b32.xlu0 %v3785_v56, %s3431_s19  ;;  %v213_v56 = vld [vmem:[%s3475_s17 + $0x78] sm:$0xf]  ;;  %v3894_v58 = vcombine.low %v214_v4, %v214_v4  ;;  %v270_v44 = vunpack.c.l.bf16 %v216_v41 }
  0xa1   : > { %v1330_v42 = vpop.permute.xlu1 %1329  ;;  %v3896_v6 = vcombine.low %v213_v56, %v213_v56  ;;  %v267_v40 = vunpack.c.l.bf16 %v213_v56  ;;  %443 = vst.msk [vmem:[#allocation2 + $0x5c] sm:$0xf] %vm419_vm1, %v3969_v45 }
  0xa2   : > { %1425 = vst.msk [vmem:[#allocation2 + $0x4] sm:$0xf] %vm1423_vm7, %v1330_v42  ;;  %v1328_v43 = vpop.permute.xlu0 %1327 }
  0xa3   : > { %1424 = vst.msk [vmem:[#allocation2] sm:$0xf] %vm1423_vm7, %v1328_v43  ;;  %1069 = vrot.lane.b32.xlu1 %v3849_v26, %s3431_s19  ;;  %v551_v1 = vrot.slane %v267_v40, 1  ;;  %v889_v19 = vrot.slane %v267_v40, 2  ;;  %v3971_v43 = vcombine.low %v216_v41, %v216_v41  ;;  %v219_v41 = vld [vmem:[%s3475_s17 + $0x90] sm:$0xf] }
  0xa4   : > { %1067 = vrot.lane.b32.xlu0 %v3854_v29, %s3431_s19  ;;  %441 = vst.msk [vmem:[#allocation2 + $0x54] sm:$0xf] %vm419_vm1, %v3894_v58  ;;  %440 = vst.msk [vmem:[#allocation2 + $0x50] sm:$0xf] %vm419_vm1, %v3896_v6 }
  0xa5   : > { %v1334_v48 = vpop.permute.xlu1 %1333  ;;  %442 = vst.msk [vmem:[#allocation2 + $0x58] sm:$0xf] %vm419_vm1, %v3971_v43 }
  0xa6   : > { %1427 = vst.msk [vmem:[#allocation2 + $0xc] sm:$0xf] %vm1423_vm7, %v1334_v48  ;;  %v1332_v49 = vpop.permute.xlu0 %1331 }
  0xa7   : > { %1426 = vst.msk [vmem:[#allocation2 + $0x8] sm:$0xf] %vm1423_vm7, %v1332_v49  ;;  %1200 = vrot.lane.b32.xlu1 %v3588_v7, %s3432_s20  ;;  %v268_v7 = vunpack.c.l.bf16 %v214_v4 }
  0xa8   : > { %1198 = vrot.lane.b32.xlu0 %v3596_v12, %s3432_s20  ;;  %v535_v12 = vsel %vm500_vm0, %v3630_v28, %v534_v52  ;;  %v556_v52 = vrot.slane %v270_v44, 1 }
  0xa9   : > { %v1472_v54 = vpop.permute.xlu1 %1471  ;;  %v3909_v0 = vrot.slane %v268_v7, 1  ;;  %v3915_v28 = vpack.c.bf16 %v535_v12, %v535_v12 }
  0xaa   : > { %1567 = vst.msk [vmem:[#allocation2 + $0x4] sm:$0xf] %vm1565_vm8, %v1472_v54  ;;  %v1470_v59 = vpop.permute.xlu0 %1469 }
  0xab   : > { %1566 = vst.msk [vmem:[#allocation2] sm:$0xf] %vm1565_vm8, %v1470_v59  ;;  %1204 = vrot.lane.b32.xlu1 %v3625_v25, %s3432_s20  ;;  %v3925_v9 = vsel %vm500_vm0, %v551_v1, %v3909_v0 }
  0xac   : > { %1202 = vrot.lane.b32.xlu0 %v3628_v27, %s3432_s20 }
  0xad   : > { %v1476_v46 = vpop.permute.xlu1 %1475 }
  0xae   : > { %1569 = vst.msk [vmem:[#allocation2 + $0xc] sm:$0xf] %vm1565_vm8, %v1476_v46  ;;  %v1474_v53 = vpop.permute.xlu0 %1473 }
  0xaf   : > { %1568 = vst.msk [vmem:[#allocation2 + $0x8] sm:$0xf] %vm1565_vm8, %v1474_v53  ;;  %1345 = vrot.lane.b32.xlu1 %v3819_v8, %s3433_s21 }
  0xb0   : > { %1343 = vrot.lane.b32.xlu0 %v3824_v14, %s3433_s21  ;;  %v3935_v14 = vrot.slane %v268_v7, 2 }
  0xb1   : > { %v1607_v17 = vpop.permute.xlu1 %1606 }
  0xb2   : > { %1702 = vst.msk [vmem:[#allocation2 + $0x4] sm:$0xf] %vm1700_vm9, %v1607_v17  ;;  %v1605_v18 = vpop.permute.xlu0 %1604  ;;  %v3952_v11 = vsel %vm838_vm2, %v889_v19, %v3935_v14  ;;  %v894_v17 = vrot.slane %v270_v44, 2  ;;  %v4072_v44 = vcombine.low %v219_v41, %v219_v41 }
  0xb3   : > { %1701 = vst.msk [vmem:[#allocation2] sm:$0xf] %vm1700_vm9, %v1605_v18  ;;  %1349 = vrot.lane.b32.xlu1 %v3915_v28, %s3433_s21 }
  0xb4   : > { %1347 = vrot.lane.b32.xlu0 %v3921_v3, %s3433_s21  ;;  %444 = vst.msk [vmem:[#allocation2 + $0x60] sm:$0xf] %vm419_vm1, %v4072_v44 }
  0xb5   : > { %v1611_v8 = vpop.permute.xlu1 %1610 }
  0xb6   : > { %1704 = vst.msk [vmem:[#allocation2 + $0xc] sm:$0xf] %vm1700_vm9, %v1611_v8  ;;  %v1609_v20 = vpop.permute.xlu0 %1608 }
  0xb7   : > { %1703 = vst.msk [vmem:[#allocation2 + $0x8] sm:$0xf] %vm1700_vm9, %v1609_v20  ;;  %1487 = vrot.lane.b32.xlu1 %v3849_v26, %s3434_s22 }
  0xb8   : > { %1485 = vrot.lane.b32.xlu0 %v3854_v29, %s3434_s22 }
  0xb9   : > { %v1752_v23 = vpop.permute.xlu1 %1751 }
  0xba   : > { %1847 = vst.msk [vmem:[#allocation2 + $0x4] sm:$0xf] %vm1845_vm10, %v1752_v23  ;;  %v1750_v26 = vpop.permute.xlu0 %1749 }
  0xbb   : > { %1846 = vst.msk [vmem:[#allocation2] sm:$0xf] %vm1845_vm10, %v1750_v26  ;;  %1491 = vrot.lane.b32.xlu1 %v3941_v13, %s3434_s22 }
  0xbc   : > { %1489 = vrot.lane.b32.xlu0 %v3947_v24, %s3434_s22 }
  0xbd   : > { %v1756_v29 = vpop.permute.xlu1 %1755 }
  0xbe   : > { %1849 = vst.msk [vmem:[#allocation2 + $0xc] sm:$0xf] %vm1845_vm10, %v1756_v29  ;;  %v1754_v33 = vpop.permute.xlu0 %1753 }
  0xbf   : > { %1848 = vst.msk [vmem:[#allocation2 + $0x8] sm:$0xf] %vm1845_vm10, %v1754_v33  ;;  %1622 = vrot.lane.b32.xlu1 %v3625_v25, %s3435_s23  ;;  %v271_v25 = vunpack.c.l.bf16 %v217_v35  ;;  %v220_v35 = vld [vmem:[%s3475_s17 + $0x94] sm:$0xf] }
  0xc0   : > { %1620 = vrot.lane.b32.xlu0 %v3628_v27, %s3435_s23  ;;  %v540_v27 = vsel %vm500_vm0, %v3695_v63, %v539_v21  ;;  %v3996_v63 = vpack.c.bf16 %v3706_v15, %v3706_v15  ;;  %v877_v15 = vrot.slane %v260_v47, 2  ;;  %v209_v47 = vld [vmem:[%s3475_s17 + $0x68] sm:$0x1] }
  0xc1   : > { %v1894_v34 = vpop.permute.xlu1 %1893  ;;  %v3984_v49 = vrot.slane %v271_v25, 1  ;;  %v3990_v4 = vpack.c.bf16 %v540_v27, %v540_v27  ;;  %v4017_v10 = vrot.slane %v271_v25, 2  ;;  %v263_v33 = vunpack.c.l.bf16 %v209_v47 }
  0xc2   : > { %1989 = vst.msk [vmem:[#allocation2 + $0x4] sm:$0xf] %vm1987_vm11, %v1894_v34  ;;  %v1892_v42 = vpop.permute.xlu0 %1891  ;;  %v878_v1 = vsel %vm838_vm2, %v3722_v2, %v877_v15  ;;  %v4030_v2 = vpack.c.bf16 %v3730_v30, %v3730_v30  ;;  %v4070_v25 = vcombine.low %v220_v35, %v220_v35  ;;  %v273_v27 = vunpack.c.l.bf16 %v219_v41 }
  0xc3   : > { %1988 = vst.msk [vmem:[#allocation2] sm:$0xf] %vm1987_vm11, %v1892_v42  ;;  %1626 = vrot.lane.b32.xlu1 %v3681_v61, %s3435_s23  ;;  %v4000_v59 = vsel %vm500_vm0, %v556_v52, %v3984_v49  ;;  %v4023_v8 = vpack.c.bf16 %v878_v1, %v878_v1  ;;  %v4034_v20 = vsel %vm838_vm2, %v894_v17, %v4017_v10  ;;  %v544_v21 = vrot.slane %v263_v33, 1 }
  0xc4   : > { %1624 = vrot.lane.b32.xlu0 %v3683_v62, %s3435_s23  ;;  %445 = vst.msk [vmem:[#allocation2 + $0x64] sm:$0xf] %vm419_vm1, %v4070_v25  ;;  %v899_v1 = vrot.slane %v273_v27, 2 }
  0xc5   : > { %v720_v48 = vpop.permute.xlu1 %719 }
  0xc6   : > { %811 = vst.msk [vmem:[#allocation2 + $0x14] sm:$0xf] %vm805_vm4, %v720_v48  ;;  %v718_v54 = vpop.permute.xlu0 %717 }
  0xc7   : > { %810 = vst.msk [vmem:[#allocation2 + $0x10] sm:$0xf] %vm805_vm4, %v718_v54  ;;  %1767 = vrot.lane.b32.xlu1 %v3915_v28, %s3436_s26  ;;  %v561_v54 = vrot.slane %v273_v27, 1 }
  0xc8   : > { %1765 = vrot.lane.b32.xlu0 %v3921_v3, %s3436_s26 }
  0xc9   : > { %v1898_v56 = vpop.permute.xlu1 %1897 }
  0xca   : > { %1991 = vst.msk [vmem:[#allocation2 + $0xc] sm:$0xf] %vm1987_vm11, %v1898_v56  ;;  %v1896_v7 = vpop.permute.xlu0 %1895  ;;  %v3380_v40 = vld [vmem:[#allocation2] sm:$0xff]  }
  0xcb   : > { %1990 = vst.msk [vmem:[#allocation2 + $0x8] sm:$0xf] %vm1987_vm11, %v1896_v7  ;;  %1771 = vrot.lane.b32.xlu1 %v3990_v4, %s3436_s26  ;;  %3304 = vmatprep.mubr.msk.bf16.mxu0 %vm2152_vm12, %v3380_v40  ;;  %v882_v40 = vrot.slane %v263_v33, 2 }
  0xcc   : > { %1769 = vrot.lane.b32.xlu0 %v3996_v63, %s3436_s26 }
  0xcd   : > { %v724_v12 = vpop.permute.xlu1 %723 }
  0xce   : > { %813 = vst.msk [vmem:[#allocation2 + $0x1c] sm:$0xf] %vm805_vm4, %v724_v12  ;;  %v722_v46 = vpop.permute.xlu0 %721 }
  0xcf   : > { %812 = vst.msk [vmem:[#allocation2 + $0x18] sm:$0xf] %vm805_vm4, %v722_v46  ;;  %1909 = vrot.lane.b32.xlu1 %v3941_v13, %s3437_s4 }
  0xd0   : > { %1907 = vrot.lane.b32.xlu0 %v3947_v24, %s3437_s4 }
  0xd1   : > { %v1058_v53 = vpop.permute.xlu1 %1057 }
  0xd2   : > { %1149 = vst.msk [vmem:[#allocation2 + $0x14] sm:$0xf] %vm1143_vm5, %v1058_v53  ;;  %v1056_v18 = vpop.permute.xlu0 %1055  ;;  %v3382_v36 = vld [vmem:[#allocation2 + $0x8] sm:$0xff]  }
  0xd3   : > { %1148 = vst.msk [vmem:[#allocation2 + $0x10] sm:$0xf] %vm1143_vm5, %v1056_v18  ;;  %735 = vrot.lane.b32.xlu1 %v3915_v28, %s3430_s18  ;;  %3305 = vmatmul.mubr.msk.bf16.vlgmr.msra.gmra.mxu0 %vm2152_vm12, %v3382_v36  ;;  %v212_v36 = vld [vmem:[%s3475_s17 + $0x74] sm:$0x1] }
  0xd4   : > { %733 = vrot.lane.b32.xlu0 %v3921_v3, %s3430_s18 }
  0xd5   : > { %v1062_v19 = vpop.permute.xlu1 %1061 }
  0xd6   : > { %1151 = vst.msk [vmem:[#allocation2 + $0x1c] sm:$0xf] %vm1143_vm5, %v1062_v19  ;;  %v1060_v23 = vpop.permute.xlu0 %1059 }
  0xd7   : > { %1150 = vst.msk [vmem:[#allocation2 + $0x18] sm:$0xf] %vm1143_vm5, %v1060_v23  ;;  %1913 = vrot.lane.b32.xlu1 %v4023_v8, %s3437_s4 }
  0xd8   : > { %1911 = vrot.lane.b32.xlu0 %v4030_v2, %s3437_s4 }
  0xd9   : > { %v1193_v28 = vpop.permute.xlu1 %1192 }
  0xda   : > { %1284 = vst.msk [vmem:[#allocation2 + $0x14] sm:$0xf] %vm1278_vm6, %v1193_v28  ;;  %v1191_v30 = vpop.permute.xlu0 %1190 }
  0xdb   : > { %1283 = vst.msk [vmem:[#allocation2 + $0x10] sm:$0xf] %vm1278_vm6, %v1191_v30  ;;  %739 = vrot.lane.b32.xlu1 %v3990_v4, %s3430_s18 }
  0xdc   : > { %737 = vrot.lane.b32.xlu0 %v3996_v63, %s3430_s18 }
  0xdd   : > { %v1197_v3 = vpop.permute.xlu1 %1196 }
  0xde   : > { %1286 = vst.msk [vmem:[#allocation2 + $0x1c] sm:$0xf] %vm1278_vm6, %v1197_v3  ;;  %v1195_v5 = vpop.permute.xlu0 %1194  ;;  %v223_v3 = vld [vmem:[%s3475_s17 + $0xa0] sm:$0xf] }
  0xdf   : > { %1285 = vst.msk [vmem:[#allocation2 + $0x18] sm:$0xf] %vm1278_vm6, %v1195_v5  ;;  %1073 = vrot.lane.b32.xlu1 %v3941_v13, %s3431_s19  ;;  %v222_v5 = vld [vmem:[%s3475_s17 + $0x9c] sm:$0xf]  ;;  %v4145_v47 = vcombine.low %v223_v3, %v223_v3 }
  0xe0   : > { %1071 = vrot.lane.b32.xlu0 %v3947_v24, %s3431_s19  ;;  %v276_v33 = vunpack.c.l.bf16 %v222_v5 }
  0xe1   : > { %v1338_v26 = vpop.permute.xlu1 %1337  ;;  %447 = vst.msk [vmem:[#allocation2 + $0x6c] sm:$0xf] %vm419_vm1, %v4145_v47 }
  0xe2   : > { %1429 = vst.msk [vmem:[#allocation2 + $0x14] sm:$0xf] %vm1423_vm7, %v1338_v26  ;;  %v1336_v29 = vpop.permute.xlu0 %1335 }
  0xe3   : > { %1428 = vst.msk [vmem:[#allocation2 + $0x10] sm:$0xf] %vm1423_vm7, %v1336_v29  ;;  %1077 = vrot.lane.b32.xlu1 %v4023_v8, %s3431_s19  ;;  %v4147_v29 = vcombine.low %v222_v5, %v222_v5  ;;  %v225_v5 = vld [vmem:[%s3475_s17 + $0xa8] sm:$0xf] }
  0xe4   : > { %1075 = vrot.lane.b32.xlu0 %v4030_v2, %s3431_s19 }
  0xe5   : > { %v1342_v13 = vpop.permute.xlu1 %1341  ;;  %446 = vst.msk [vmem:[#allocation2 + $0x68] sm:$0xf] %vm419_vm1, %v4147_v29 }
  0xe6   : > { %1431 = vst.msk [vmem:[#allocation2 + $0x1c] sm:$0xf] %vm1423_vm7, %v1342_v13  ;;  %v1340_v24 = vpop.permute.xlu0 %1339 }
  0xe7   : > { %1430 = vst.msk [vmem:[#allocation2 + $0x18] sm:$0xf] %vm1423_vm7, %v1340_v24  ;;  %1208 = vrot.lane.b32.xlu1 %v3681_v61, %s3432_s20  ;;  %v274_v61 = vunpack.c.l.bf16 %v220_v35 }
  0xe8   : > { %1206 = vrot.lane.b32.xlu0 %v3683_v62, %s3432_s20  ;;  %v545_v62 = vsel %vm500_vm0, %v3763_v51, %v544_v21  ;;  %v4097_v51 = vpack.c.bf16 %v3771_v57, %v3771_v57  ;;  %v883_v57 = vsel %vm838_vm2, %v3777_v50, %v882_v40  ;;  %v4123_v50 = vpack.c.bf16 %v3790_v60, %v3790_v60 }
  0xe9   : > { %v1480_v34 = vpop.permute.xlu1 %1479  ;;  %v4085_v52 = vrot.slane %v274_v61, 1  ;;  %v4091_v7 = vpack.c.bf16 %v545_v62, %v545_v62  ;;  %v4117_v17 = vpack.c.bf16 %v883_v57, %v883_v57  ;;  %v266_v60 = vunpack.c.l.bf16 %v212_v36 }
  0xea   : > { %1571 = vst.msk [vmem:[#allocation2 + $0x14] sm:$0xf] %vm1565_vm8, %v1480_v34  ;;  %v1478_v42 = vpop.permute.xlu0 %1477  ;;  %v566_v21 = vrot.slane %v276_v33, 1 }
  0xeb   : > { %1570 = vst.msk [vmem:[#allocation2 + $0x10] sm:$0xf] %vm1565_vm8, %v1478_v42  ;;  %1212 = vrot.lane.b32.xlu1 %v3749_v31, %s3432_s20  ;;  %v4101_v12 = vsel %vm500_vm0, %v561_v54, %v4085_v52  ;;  %v549_v28 = vrot.slane %v266_v60, 1 }
  0xec   : > { %1210 = vrot.lane.b32.xlu0 %v3751_v38, %s3432_s20 }
  0xed   : > { %v1484_v48 = vpop.permute.xlu1 %1483 }
  0xee   : > { %1573 = vst.msk [vmem:[#allocation2 + $0x1c] sm:$0xf] %vm1565_vm8, %v1484_v48  ;;  %v1482_v56 = vpop.permute.xlu0 %1481 }
  0xef   : > { %1572 = vst.msk [vmem:[#allocation2 + $0x18] sm:$0xf] %vm1565_vm8, %v1482_v56  ;;  %1353 = vrot.lane.b32.xlu1 %v3990_v4, %s3433_s21 }
  0xf0   : > { %1351 = vrot.lane.b32.xlu0 %v3996_v63, %s3433_s21  ;;  %v4111_v63 = vrot.slane %v274_v61, 2 }
  0xf1   : > { %v1615_v15 = vpop.permute.xlu1 %1614 }
  0xf2   : > { %1706 = vst.msk [vmem:[#allocation2 + $0x14] sm:$0xf] %vm1700_vm9, %v1615_v15  ;;  %v1613_v46 = vpop.permute.xlu0 %1612  ;;  %v4128_v19 = vsel %vm838_vm2, %v899_v1, %v4111_v63  ;;  %v904_v15 = vrot.slane %v276_v33, 2  ;;  %v4248_v33 = vcombine.low %v225_v5, %v225_v5 }
  0xf3   : > { %1705 = vst.msk [vmem:[#allocation2 + $0x10] sm:$0xf] %vm1700_vm9, %v1613_v46  ;;  %1357 = vrot.lane.b32.xlu1 %v4091_v7, %s3433_s21 }
  0xf4   : > { %1355 = vrot.lane.b32.xlu0 %v4097_v51, %s3433_s21  ;;  %448 = vst.msk [vmem:[#allocation2 + $0x70] sm:$0xf] %vm419_vm1, %v4248_v33 }
  0xf5   : > { %v1619_v4 = vpop.permute.xlu1 %1618 }
  0xf6   : > { %1708 = vst.msk [vmem:[#allocation2 + $0x1c] sm:$0xf] %vm1700_vm9, %v1619_v4  ;;  %v1617_v53 = vpop.permute.xlu0 %1616 }
  0xf7   : > { %1707 = vst.msk [vmem:[#allocation2 + $0x18] sm:$0xf] %vm1700_vm9, %v1617_v53  ;;  %1495 = vrot.lane.b32.xlu1 %v4023_v8, %s3434_s22 }
  0xf8   : > { %1493 = vrot.lane.b32.xlu0 %v4030_v2, %s3434_s22 }
  0xf9   : > { %v1760_v18 = vpop.permute.xlu1 %1759 }
  0xfa   : > { %1851 = vst.msk [vmem:[#allocation2 + $0x14] sm:$0xf] %vm1845_vm10, %v1760_v18  ;;  %v1758_v8 = vpop.permute.xlu0 %1757 }
  0xfb   : > { %1850 = vst.msk [vmem:[#allocation2 + $0x10] sm:$0xf] %vm1845_vm10, %v1758_v8  ;;  %1499 = vrot.lane.b32.xlu1 %v4117_v17, %s3434_s22 }
  0xfc   : > { %1497 = vrot.lane.b32.xlu0 %v4123_v50, %s3434_s22 }
  0xfd   : > { %v1764_v2 = vpop.permute.xlu1 %1763 }
  0xfe   : > { %1853 = vst.msk [vmem:[#allocation2 + $0x1c] sm:$0xf] %vm1845_vm10, %v1764_v2  ;;  %v1762_v23 = vpop.permute.xlu0 %1761 }
  0xff   : > { %1852 = vst.msk [vmem:[#allocation2 + $0x18] sm:$0xf] %vm1845_vm10, %v1762_v23  ;;  %1630 = vrot.lane.b32.xlu1 %v3749_v31, %s3435_s23  ;;  %v277_v31 = vunpack.c.l.bf16 %v223_v3  ;;  %v226_v3 = vld [vmem:[%s3475_s17 + $0xac] sm:$0xf] }
 0x100   : > { %1628 = vrot.lane.b32.xlu0 %v3751_v38, %s3435_s23  ;;  %v550_v38 = vsel %vm500_vm0, %v3816_v55, %v549_v28  ;;  %v4172_v55 = vpack.c.bf16 %v3828_v16, %v3828_v16  ;;  %v887_v16 = vrot.slane %v266_v60, 2  ;;  %v215_v60 = vld [vmem:[%s3475_s17 + $0x80] sm:$0x1] }
 0x101   : > { %v1902_v30 = vpop.permute.xlu1 %1901  ;;  %v4160_v24 = vrot.slane %v277_v31, 1  ;;  %v4166_v35 = vpack.c.bf16 %v550_v38, %v550_v38  ;;  %v4193_v40 = vrot.slane %v277_v31, 2  ;;  %v269_v23 = vunpack.c.l.bf16 %v215_v60 }
 0x102   : > { %1993 = vst.msk [vmem:[#allocation2 + $0x14] sm:$0xf] %vm1987_vm11, %v1902_v30  ;;  %v1900_v26 = vpop.permute.xlu0 %1899  ;;  %v888_v54 = vsel %vm838_vm2, %v3844_v22, %v887_v16  ;;  %v4206_v22 = vpack.c.bf16 %v3858_v32, %v3858_v32  ;;  %v4246_v31 = vcombine.low %v226_v3, %v226_v3  ;;  %v279_v38 = vunpack.c.l.bf16 %v225_v5 }
 0x103   : > { %1992 = vst.msk [vmem:[#allocation2 + $0x10] sm:$0xf] %vm1987_vm11, %v1900_v26  ;;  %1634 = vrot.lane.b32.xlu1 %v3802_v37, %s3435_s23  ;;  %v4176_v42 = vsel %vm500_vm0, %v566_v21, %v4160_v24  ;;  %v4199_v4 = vpack.c.bf16 %v888_v54, %v888_v54  ;;  %v4210_v53 = vsel %vm838_vm2, %v904_v15, %v4193_v40  ;;  %v554_v28 = vrot.slane %v269_v23, 1 }
 0x104   : > { %1632 = vrot.lane.b32.xlu0 %v3804_v39, %s3435_s23  ;;  %449 = vst.msk [vmem:[#allocation2 + $0x74] sm:$0xf] %vm419_vm1, %v4246_v31  ;;  %v909_v54 = vrot.slane %v279_v38, 2 }
 0x105   : > { %v728_v13 = vpop.permute.xlu1 %727 }
 0x106   : > { %815 = vst.msk [vmem:[#allocation2 + $0x24] sm:$0xf] %vm805_vm4, %v728_v13  ;;  %v726_v34 = vpop.permute.xlu0 %725 }
 0x107   : > { %814 = vst.msk [vmem:[#allocation2 + $0x20] sm:$0xf] %vm805_vm4, %v726_v34  ;;  %1775 = vrot.lane.b32.xlu1 %v4091_v7, %s3436_s26  ;;  %v571_v34 = vrot.slane %v279_v38, 1 }
 0x108   : > { %1773 = vrot.lane.b32.xlu0 %v4097_v51, %s3436_s26 }
 0x109   : > { %v1906_v41 = vpop.permute.xlu1 %1905 }
 0x10a   : > { %1995 = vst.msk [vmem:[#allocation2 + $0x1c] sm:$0xf] %vm1987_vm11, %v1906_v41  ;;  %v1904_v61 = vpop.permute.xlu0 %1903  ;;  %v3387_v27 = vld [vmem:[#allocation2 + $0x10] sm:$0xff]  }
 0x10b   : > { %1994 = vst.msk [vmem:[#allocation2 + $0x18] sm:$0xf] %vm1987_vm11, %v1904_v61  ;;  %1779 = vrot.lane.b32.xlu1 %v4166_v35, %s3436_s26  ;;  %3308 = vmatprep.mubr.msk.bf16.mxu0 %vm2152_vm12, %v3387_v27  ;;  %v892_v27 = vrot.slane %v269_v23, 2 }
 0x10c   : > { %1777 = vrot.lane.b32.xlu0 %v4172_v55, %s3436_s26 }
 0x10d   : > { %v732_v62 = vpop.permute.xlu1 %731 }
 0x10e   : > { %817 = vst.msk [vmem:[#allocation2 + $0x2c] sm:$0xf] %vm805_vm4, %v732_v62  ;;  %v730_v48 = vpop.permute.xlu0 %729 }
 0x10f   : > { %816 = vst.msk [vmem:[#allocation2 + $0x28] sm:$0xf] %vm805_vm4, %v730_v48  ;;  %1917 = vrot.lane.b32.xlu1 %v4117_v17, %s3437_s4 }
 0x110   : > { %1915 = vrot.lane.b32.xlu0 %v4123_v50, %s3437_s4 }
 0x111   : > { %v1066_v56 = vpop.permute.xlu1 %1065 }
 0x112   : > { %1153 = vst.msk [vmem:[#allocation2 + $0x24] sm:$0xf] %vm1143_vm5, %v1066_v56  ;;  %v1064_v46 = vpop.permute.xlu0 %1063  ;;  %v3388_v57 = vld [vmem:[#allocation2 + $0x18] sm:$0xff]  }
 0x113   : > { %1152 = vst.msk [vmem:[#allocation2 + $0x20] sm:$0xf] %vm1143_vm5, %v1064_v46  ;;  %743 = vrot.lane.b32.xlu1 %v4091_v7, %s3430_s18  ;;  %3309 = vmatmul.mubr.msk.bf16.gmra.mxu0 %vm2152_vm12, %v3388_v57  ;;  %v218_v57 = vld [vmem:[%s3475_s17 + $0x8c] sm:$0x1] }
 0x114   : > { %741 = vrot.lane.b32.xlu0 %v4097_v51, %s3430_s18 }
 0x115   : > { %v1070_v1 = vpop.permute.xlu1 %1069 }
 0x116   : > { %1155 = vst.msk [vmem:[#allocation2 + $0x2c] sm:$0xf] %vm1143_vm5, %v1070_v1  ;;  %v1068_v18 = vpop.permute.xlu0 %1067 }
 0x117   : > { %1154 = vst.msk [vmem:[#allocation2 + $0x28] sm:$0xf] %vm1143_vm5, %v1068_v18  ;;  %1921 = vrot.lane.b32.xlu1 %v4199_v4, %s3437_s4 }
 0x118   : > { %1919 = vrot.lane.b32.xlu0 %v4206_v22, %s3437_s4 }
 0x119   : > { %v1201_v7 = vpop.permute.xlu1 %1200 }
 0x11a   : > { %1288 = vst.msk [vmem:[#allocation2 + $0x24] sm:$0xf] %vm1278_vm6, %v1201_v7  ;;  %v1199_v32 = vpop.permute.xlu0 %1198 }
 0x11b   : > { %1287 = vst.msk [vmem:[#allocation2 + $0x20] sm:$0xf] %vm1278_vm6, %v1199_v32  ;;  %747 = vrot.lane.b32.xlu1 %v4166_v35, %s3430_s18 }
 0x11c   : > { %745 = vrot.lane.b32.xlu0 %v4172_v55, %s3430_s18 }
 0x11d   : > { %v1205_v51 = vpop.permute.xlu1 %1204 }
 0x11e   : > { %1290 = vst.msk [vmem:[#allocation2 + $0x2c] sm:$0xf] %vm1278_vm6, %v1205_v51  ;;  %v1203_v36 = vpop.permute.xlu0 %1202  ;;  %v229_v51 = vld [vmem:[%s3475_s17 + $0xb8] sm:$0xf] }
 0x11f   : > { %1289 = vst.msk [vmem:[#allocation2 + $0x28] sm:$0xf] %vm1278_vm6, %v1203_v36  ;;  %1081 = vrot.lane.b32.xlu1 %v4117_v17, %s3431_s19  ;;  %v228_v36 = vld [vmem:[%s3475_s17 + $0xb4] sm:$0xf]  ;;  %v4321_v60 = vcombine.low %v229_v51, %v229_v51 }
 0x120   : > { %1079 = vrot.lane.b32.xlu0 %v4123_v50, %s3431_s19  ;;  %v282_v23 = vunpack.c.l.bf16 %v228_v36 }
 0x121   : > { %v1346_v8 = vpop.permute.xlu1 %1345  ;;  %451 = vst.msk [vmem:[#allocation2 + $0x7c] sm:$0xf] %vm419_vm1, %v4321_v60 }
 0x122   : > { %1433 = vst.msk [vmem:[#allocation2 + $0x24] sm:$0xf] %vm1423_vm7, %v1346_v8  ;;  %v1344_v2 = vpop.permute.xlu0 %1343 }
 0x123   : > { %1432 = vst.msk [vmem:[#allocation2 + $0x20] sm:$0xf] %vm1423_vm7, %v1344_v2  ;;  %1085 = vrot.lane.b32.xlu1 %v4199_v4, %s3431_s19  ;;  %v4323_v2 = vcombine.low %v228_v36, %v228_v36 }
 0x124   : > { %1083 = vrot.lane.b32.xlu0 %v4206_v22, %s3431_s19 }
 0x125   : > { %v1350_v17 = vpop.permute.xlu1 %1349  ;;  %450 = vst.msk [vmem:[#allocation2 + $0x78] sm:$0xf] %vm419_vm1, %v4323_v2  ;;  %vm2689_vm1 = vcmask 195584  }
 0x126   : > { %1435 = vst.msk [vmem:[#allocation2 + $0x2c] sm:$0xf] %vm1423_vm7, %v1350_v17  ;;  %v1348_v50 = vpop.permute.xlu0 %1347 }
 0x127   : > { %1434 = vst.msk [vmem:[#allocation2 + $0x28] sm:$0xf] %vm1423_vm7, %v1348_v50  ;;  %1216 = vrot.lane.b32.xlu1 %v3802_v37, %s3432_s20  ;;  %v280_v37 = vunpack.c.l.bf16 %v226_v3 }
 0x128   : > { %1214 = vrot.lane.b32.xlu0 %v3804_v39, %s3432_s20  ;;  %v555_v39 = vsel %vm500_vm0, %v3909_v0, %v554_v28  ;;  %v4273_v0 = vpack.c.bf16 %v3925_v9, %v3925_v9  ;;  %v893_v9 = vsel %vm838_vm2, %v3935_v14, %v892_v27  ;;  %v4299_v14 = vpack.c.bf16 %v3952_v11, %v3952_v11 }
 0x129   : > { %v1488_v30 = vpop.permute.xlu1 %1487  ;;  %v4261_v21 = vrot.slane %v280_v37, 1  ;;  %v4267_v61 = vpack.c.bf16 %v555_v39, %v555_v39  ;;  %v4293_v15 = vpack.c.bf16 %v893_v9, %v893_v9  ;;  %v272_v11 = vunpack.c.l.bf16 %v218_v57 }
 0x12a   : > { %1575 = vst.msk [vmem:[#allocation2 + $0x24] sm:$0xf] %vm1565_vm8, %v1488_v30  ;;  %v1486_v26 = vpop.permute.xlu0 %1485  ;;  %v576_v28 = vrot.slane %v282_v23, 1 }
 0x12b   : > { %1574 = vst.msk [vmem:[#allocation2 + $0x20] sm:$0xf] %vm1565_vm8, %v1486_v26  ;;  %1220 = vrot.lane.b32.xlu1 %v3894_v58, %s3432_s20  ;;  %v4277_v62 = vsel %vm500_vm0, %v571_v34, %v4261_v21  ;;  %v559_v7 = vrot.slane %v272_v11, 1 }
 0x12c   : > { %1218 = vrot.lane.b32.xlu0 %v3896_v6, %s3432_s20 }
 0x12d   : > { %v1492_v13 = vpop.permute.xlu1 %1491 }
 0x12e   : > { %1577 = vst.msk [vmem:[#allocation2 + $0x2c] sm:$0xf] %vm1565_vm8, %v1492_v13  ;;  %v1490_v41 = vpop.permute.xlu0 %1489 }
 0x12f   : > { %1576 = vst.msk [vmem:[#allocation2 + $0x28] sm:$0xf] %vm1565_vm8, %v1490_v41  ;;  %1361 = vrot.lane.b32.xlu1 %v4166_v35, %s3433_s21 }
 0x130   : > { %1359 = vrot.lane.b32.xlu0 %v4172_v55, %s3433_s21  ;;  %v4287_v55 = vrot.slane %v280_v37, 2 }
 0x131   : > { %v1623_v16 = vpop.permute.xlu1 %1622 }
 0x132   : > { %1710 = vst.msk [vmem:[#allocation2 + $0x24] sm:$0xf] %vm1700_vm9, %v1623_v16  ;;  %v1621_v48 = vpop.permute.xlu0 %1620  ;;  %v4304_v1 = vsel %vm838_vm2, %v909_v54, %v4287_v55  ;;  %v914_v16 = vrot.slane %v282_v23, 2 }
 0x133   : > { %1709 = vst.msk [vmem:[#allocation2 + $0x20] sm:$0xf] %vm1700_vm9, %v1621_v48  ;;  %1365 = vrot.lane.b32.xlu1 %v4267_v61, %s3433_s21 }
 0x134   : > { %1363 = vrot.lane.b32.xlu0 %v4273_v0, %s3433_s21 }
 0x135   : > { %v1627_v35 = vpop.permute.xlu1 %1626 }
 0x136   : > { %1712 = vst.msk [vmem:[#allocation2 + $0x2c] sm:$0xf] %vm1700_vm9, %v1627_v35  ;;  %v1625_v56 = vpop.permute.xlu0 %1624 }
 0x137   : > { %1711 = vst.msk [vmem:[#allocation2 + $0x28] sm:$0xf] %vm1700_vm9, %v1625_v56  ;;  %1503 = vrot.lane.b32.xlu1 %v4199_v4, %s3434_s22 }
 0x138   : > { %1501 = vrot.lane.b32.xlu0 %v4206_v22, %s3434_s22 }
 0x139   : > { %v1768_v46 = vpop.permute.xlu1 %1767 }
 0x13a   : > { %1855 = vst.msk [vmem:[#allocation2 + $0x24] sm:$0xf] %vm1845_vm10, %v1768_v46  ;;  %v1766_v4 = vpop.permute.xlu0 %1765 }
 0x13b   : > { %1854 = vst.msk [vmem:[#allocation2 + $0x20] sm:$0xf] %vm1845_vm10, %v1766_v4  ;;  %1507 = vrot.lane.b32.xlu1 %v4293_v15, %s3434_s22 }
 0x13c   : > { %1505 = vrot.lane.b32.xlu0 %v4299_v14, %s3434_s22 }
 0x13d   : > { %v1772_v22 = vpop.permute.xlu1 %1771 }
 0x13e   : > { %1857 = vst.msk [vmem:[#allocation2 + $0x2c] sm:$0xf] %vm1845_vm10, %v1772_v22  ;;  %v1770_v18 = vpop.permute.xlu0 %1769 }
 0x13f   : > { %1856 = vst.msk [vmem:[#allocation2 + $0x28] sm:$0xf] %vm1845_vm10, %v1770_v18  ;;  %1638 = vrot.lane.b32.xlu1 %v3894_v58, %s3435_s23  ;;  %v283_v58 = vunpack.c.l.bf16 %v229_v51 }
 0x140   : > { %1636 = vrot.lane.b32.xlu0 %v3896_v6, %s3435_s23  ;;  %v560_v6 = vsel %vm500_vm0, %v3984_v49, %v559_v7  ;;  %v4348_v49 = vpack.c.bf16 %v4000_v59, %v4000_v59  ;;  %v897_v59 = vrot.slane %v272_v11, 2  ;;  %v221_v11 = vld [vmem:[%s3475_s17 + $0x98] sm:$0x1] }
 0x141   : > { %v1910_v32 = vpop.permute.xlu1 %1909  ;;  %v4336_v50 = vrot.slane %v283_v58, 1  ;;  %v4342_v3 = vpack.c.bf16 %v560_v6, %v560_v6  ;;  %v4369_v27 = vrot.slane %v283_v58, 2  ;;  %v275_v18 = vunpack.c.l.bf16 %v221_v11 }
 0x142   : > { %1997 = vst.msk [vmem:[#allocation2 + $0x24] sm:$0xf] %vm1987_vm11, %v1910_v32  ;;  %v1908_v8 = vpop.permute.xlu0 %1907  ;;  %v898_v34 = vsel %vm838_vm2, %v4017_v10, %v897_v59  ;;  %v4382_v10 = vpack.c.bf16 %v4034_v20, %v4034_v20  ;;  %v4437_v58 = vpack.c.bf16 %v4101_v12, %v4101_v12 }
 0x143   : > { %1996 = vst.msk [vmem:[#allocation2 + $0x20] sm:$0xf] %vm1987_vm11, %v1908_v8  ;;  %1642 = vrot.lane.b32.xlu1 %v3969_v45, %s3435_s23  ;;  %v4352_v26 = vsel %vm500_vm0, %v576_v28, %v4336_v50  ;;  %v4375_v35 = vpack.c.bf16 %v898_v34, %v898_v34  ;;  %v4386_v56 = vsel %vm838_vm2, %v914_v16, %v4369_v27  ;;  %v902_v23 = vrot.slane %v275_v18, 2 }
 0x144   : > { %1640 = vrot.lane.b32.xlu0 %v3971_v43, %s3435_s23  ;;  %v4490_v16 = vpack.c.bf16 %v4176_v42, %v4176_v42 }
 0x145   : > { %v736_v17 = vpop.permute.xlu1 %735 }
 0x146   : > { %819 = vst.msk [vmem:[#allocation2 + $0x34] sm:$0xf] %vm805_vm4, %v736_v17  ;;  %v734_v30 = vpop.permute.xlu0 %733  ;;  %v903_v17 = vsel %vm838_vm2, %v4111_v63, %v902_v23  ;;  %v224_v63 = vld [vmem:[%s3475_s17 + $0xa4] sm:$0x1] }
 0x147   : > { %818 = vst.msk [vmem:[#allocation2 + $0x30] sm:$0xf] %vm805_vm4, %v734_v30  ;;  %1783 = vrot.lane.b32.xlu1 %v4267_v61, %s3436_s26  ;;  %v4451_v30 = vpack.c.bf16 %v903_v17, %v903_v17 }
 0x148   : > { %1781 = vrot.lane.b32.xlu0 %v4273_v0, %s3436_s26 }
 0x149   : > { %v1914_v5 = vpop.permute.xlu1 %1913 }
 0x14a   : > { %1999 = vst.msk [vmem:[#allocation2 + $0x2c] sm:$0xf] %vm1987_vm11, %v1914_v5  ;;  %v1912_v37 = vpop.permute.xlu0 %1911  ;;  %v3393_v38 = vld [vmem:[#allocation2 + $0x20] sm:$0xff]  }
 0x14b   : > { %1998 = vst.msk [vmem:[#allocation2 + $0x28] sm:$0xf] %vm1987_vm11, %v1912_v37  ;;  %1787 = vrot.lane.b32.xlu1 %v4342_v3, %s3436_s26  ;;  %3312 = vmatprep.mubr.msk.bf16.mxu0 %vm2152_vm12, %v3393_v38  ;;  %v278_v37 = vunpack.c.l.bf16 %v224_v63 }
 0x14c   : > { %1785 = vrot.lane.b32.xlu0 %v4348_v49, %s3436_s26 }
 0x14d   : > { %v740_v39 = vpop.permute.xlu1 %739 }
 0x14e   : > { %821 = vst.msk [vmem:[#allocation2 + $0x3c] sm:$0xf] %vm805_vm4, %v740_v39  ;;  %v738_v13 = vpop.permute.xlu0 %737 }
 0x14f   : > { %820 = vst.msk [vmem:[#allocation2 + $0x38] sm:$0xf] %vm805_vm4, %v738_v13  ;;  %1925 = vrot.lane.b32.xlu1 %v4293_v15, %s3437_s4 }
 0x150   : > { %1923 = vrot.lane.b32.xlu0 %v4299_v14, %s3437_s4 }
 0x151   : > { %v1074_v41 = vpop.permute.xlu1 %1073 }
 0x152   : > { %1157 = vst.msk [vmem:[#allocation2 + $0x34] sm:$0xf] %vm1143_vm5, %v1074_v41  ;;  %v1072_v48 = vpop.permute.xlu0 %1071  ;;  %v3394_v9 = vld [vmem:[#allocation2 + $0x28] sm:$0xff]  }
 0x153   : > { %1156 = vst.msk [vmem:[#allocation2 + $0x30] sm:$0xf] %vm1143_vm5, %v1072_v48  ;;  %751 = vrot.lane.b32.xlu1 %v4267_v61, %s3430_s18  ;;  %3313 = vmatmul.mubr.msk.bf16.gmra.mxu0 %vm2152_vm12, %v3394_v9 }
 0x154   : > { %749 = vrot.lane.b32.xlu0 %v4273_v0, %s3430_s18 }
 0x155   : > { %v1078_v54 = vpop.permute.xlu1 %1077 }
 0x156   : > { %1159 = vst.msk [vmem:[#allocation2 + $0x3c] sm:$0xf] %vm1143_vm5, %v1078_v54  ;;  %v1076_v46 = vpop.permute.xlu0 %1075 }
 0x157   : > { %1158 = vst.msk [vmem:[#allocation2 + $0x38] sm:$0xf] %vm1143_vm5, %v1076_v46  ;;  %1929 = vrot.lane.b32.xlu1 %v4375_v35, %s3437_s4 }
 0x158   : > { %1927 = vrot.lane.b32.xlu0 %v4382_v10, %s3437_s4 }
 0x159   : > { %v1209_v61 = vpop.permute.xlu1 %1208 }
 0x15a   : > { %1292 = vst.msk [vmem:[#allocation2 + $0x34] sm:$0xf] %vm1278_vm6, %v1209_v61  ;;  %v1207_v20 = vpop.permute.xlu0 %1206 }
 0x15b   : > { %1291 = vst.msk [vmem:[#allocation2 + $0x30] sm:$0xf] %vm1278_vm6, %v1207_v20  ;;  %755 = vrot.lane.b32.xlu1 %v4342_v3, %s3430_s18 }
 0x15c   : > { %753 = vrot.lane.b32.xlu0 %v4348_v49, %s3430_s18 }
 0x15d   : > { %v1213_v0 = vpop.permute.xlu1 %1212 }
 0x15e   : > { %1294 = vst.msk [vmem:[#allocation2 + $0x3c] sm:$0xf] %vm1278_vm6, %v1213_v0  ;;  %v1211_v57 = vpop.permute.xlu0 %1210 }
 0x15f   : > { %1293 = vst.msk [vmem:[#allocation2 + $0x38] sm:$0xf] %vm1278_vm6, %v1211_v57  ;;  %1089 = vrot.lane.b32.xlu1 %v4293_v15, %s3431_s19 }
 0x160   : > { %1087 = vrot.lane.b32.xlu0 %v4299_v14, %s3431_s19  ;;  %v564_v14 = vrot.slane %v275_v18, 1 }
 0x161   : > { %v1354_v4 = vpop.permute.xlu1 %1353 }
 0x162   : > { %1437 = vst.msk [vmem:[#allocation2 + $0x34] sm:$0xf] %vm1423_vm7, %v1354_v4  ;;  %v1352_v22 = vpop.permute.xlu0 %1351  ;;  %v565_v36 = vsel %vm500_vm0, %v4085_v52, %v564_v14 }
 0x163   : > { %1436 = vst.msk [vmem:[#allocation2 + $0x30] sm:$0xf] %vm1423_vm7, %v1352_v22  ;;  %1093 = vrot.lane.b32.xlu1 %v4375_v35, %s3431_s19  ;;  %v4431_v8 = vpack.c.bf16 %v565_v36, %v565_v36 }
 0x164   : > { %1091 = vrot.lane.b32.xlu0 %v4382_v10, %s3431_s19 }
 0x165   : > { %v1358_v7 = vpop.permute.xlu1 %1357 }
 0x166   : > { %1439 = vst.msk [vmem:[#allocation2 + $0x3c] sm:$0xf] %vm1423_vm7, %v1358_v7  ;;  %v1356_v15 = vpop.permute.xlu0 %1355 }
 0x167   : > { %1438 = vst.msk [vmem:[#allocation2 + $0x38] sm:$0xf] %vm1423_vm7, %v1356_v15  ;;  %1224 = vrot.lane.b32.xlu1 %v3969_v45, %s3432_s20 }
 0x168   : > { %1222 = vrot.lane.b32.xlu0 %v3971_v43, %s3432_s20 }
 0x169   : > { %v1496_v32 = vpop.permute.xlu1 %1495 }
 0x16a   : > { %1579 = vst.msk [vmem:[#allocation2 + $0x34] sm:$0xf] %vm1565_vm8, %v1496_v32  ;;  %v1494_v51 = vpop.permute.xlu0 %1493 }
 0x16b   : > { %1578 = vst.msk [vmem:[#allocation2 + $0x30] sm:$0xf] %vm1565_vm8, %v1494_v51  ;;  %1228 = vrot.lane.b32.xlu1 %v4070_v25, %s3432_s20 }
 0x16c   : > { %1226 = vrot.lane.b32.xlu0 %v4072_v44, %s3432_s20 }
 0x16d   : > { %v1500_v45 = vpop.permute.xlu1 %1499 }
 0x16e   : > { %1581 = vst.msk [vmem:[#allocation2 + $0x3c] sm:$0xf] %vm1565_vm8, %v1500_v45  ;;  %v1498_v43 = vpop.permute.xlu0 %1497 }
 0x16f   : > { %1580 = vst.msk [vmem:[#allocation2 + $0x38] sm:$0xf] %vm1565_vm8, %v1498_v43  ;;  %1369 = vrot.lane.b32.xlu1 %v4342_v3, %s3433_s21  ;;  %v4457_v3 = vpack.c.bf16 %v4128_v19, %v4128_v19  ;;  %v569_v19 = vrot.slane %v278_v37, 1 }
 0x170   : > { %1367 = vrot.lane.b32.xlu0 %v4348_v49, %s3433_s21 }
 0x171   : > { %v1631_v52 = vpop.permute.xlu1 %1630  ;;  %v570_v34 = vsel %vm500_vm0, %v4160_v24, %v569_v19 }
 0x172   : > { %1714 = vst.msk [vmem:[#allocation2 + $0x34] sm:$0xf] %vm1700_vm9, %v1631_v52  ;;  %v1629_v6 = vpop.permute.xlu0 %1628  ;;  %v4484_v41 = vpack.c.bf16 %v570_v34, %v570_v34  ;;  %v227_v52 = vld [vmem:[%s3475_s17 + $0xb0] sm:$0x1] }
 0x173   : > { %1713 = vst.msk [vmem:[#allocation2 + $0x30] sm:$0xf] %vm1700_vm9, %v1629_v6  ;;  %1373 = vrot.lane.b32.xlu1 %v4431_v8, %s3433_s21 }
 0x174   : > { %1371 = vrot.lane.b32.xlu0 %v4437_v58, %s3433_s21 }
 0x175   : > { %v1635_v28 = vpop.permute.xlu1 %1634 }
 0x176   : > { %1716 = vst.msk [vmem:[#allocation2 + $0x3c] sm:$0xf] %vm1700_vm9, %v1635_v28  ;;  %v1633_v12 = vpop.permute.xlu0 %1632 }
 0x177   : > { %1715 = vst.msk [vmem:[#allocation2 + $0x38] sm:$0xf] %vm1700_vm9, %v1633_v12  ;;  %1511 = vrot.lane.b32.xlu1 %v4375_v35, %s3434_s22  ;;  %v907_v35 = vrot.slane %v278_v37, 2  ;;  %v281_v12 = vunpack.c.l.bf16 %v227_v52 }
 0x178   : > { %1509 = vrot.lane.b32.xlu0 %v4382_v10, %s3434_s22 }
 0x179   : > { %v1776_v49 = vpop.permute.xlu1 %1775  ;;  %v908_v54 = vsel %vm838_vm2, %v4193_v40, %v907_v35  ;;  %v4518_v40 = vpack.c.bf16 %v4210_v53, %v4210_v53  ;;  %v912_v19 = vrot.slane %v281_v12, 2 }
 0x17a   : > { %1859 = vst.msk [vmem:[#allocation2 + $0x34] sm:$0xf] %vm1845_vm10, %v1776_v49  ;;  %v1774_v5 = vpop.permute.xlu0 %1773  ;;  %v4511_v0 = vpack.c.bf16 %v908_v54, %v908_v54  ;;  %v574_v49 = vrot.slane %v281_v12, 1 }
 0x17b   : > { %1858 = vst.msk [vmem:[#allocation2 + $0x30] sm:$0xf] %vm1845_vm10, %v1774_v5  ;;  %1515 = vrot.lane.b32.xlu1 %v4451_v30, %s3434_s22 }
 0x17c   : > { %1513 = vrot.lane.b32.xlu0 %v4457_v3, %s3434_s22  ;;  %v575_v37 = vsel %vm500_vm0, %v4261_v21, %v574_v49 }
 0x17d   : > { %v1780_v38 = vpop.permute.xlu1 %1779 }
 0x17e   : > { %1861 = vst.msk [vmem:[#allocation2 + $0x3c] sm:$0xf] %vm1845_vm10, %v1780_v38  ;;  %v1778_v59 = vpop.permute.xlu0 %1777  ;;  %v4597_v38 = vpack.c.bf16 %v575_v37, %v575_v37 }
 0x17f   : > { %1860 = vst.msk [vmem:[#allocation2 + $0x38] sm:$0xf] %vm1845_vm10, %v1778_v59  ;;  %1646 = vrot.lane.b32.xlu1 %v4070_v25, %s3435_s23  ;;  %v4603_v59 = vpack.c.bf16 %v4277_v62, %v4277_v62 }
 0x180   : > { %1644 = vrot.lane.b32.xlu0 %v4072_v44, %s3435_s23 }
 0x181   : > { %v1918_v39 = vpop.permute.xlu1 %1917 }
 0x182   : > { %2001 = vst.msk [vmem:[#allocation2 + $0x34] sm:$0xf] %vm1987_vm11, %v1918_v39  ;;  %v1916_v13 = vpop.permute.xlu0 %1915 }
 0x183   : > { %2000 = vst.msk [vmem:[#allocation2 + $0x30] sm:$0xf] %vm1987_vm11, %v1916_v13  ;;  %1650 = vrot.lane.b32.xlu1 %v4145_v47, %s3435_s23  ;;  %v913_v13 = vsel %vm838_vm2, %v4287_v55, %v912_v19  ;;  %v230_v55 = vld [vmem:[%s3475_s17 + $0xbc] sm:$0x1] }
 0x184   : > { %1648 = vrot.lane.b32.xlu0 %v4147_v29, %s3435_s23 }
 0x185   : > { %v744_v25 = vpop.permute.xlu1 %743 }
 0x186   : > { %823 = vst.msk [vmem:[#allocation2 + $0x44] sm:$0xf] %vm805_vm4, %v744_v25  ;;  %v742_v44 = vpop.permute.xlu0 %741  ;;  %v4617_v25 = vpack.c.bf16 %v913_v13, %v913_v13 }
 0x187   : > { %822 = vst.msk [vmem:[#allocation2 + $0x40] sm:$0xf] %vm805_vm4, %v742_v44  ;;  %1791 = vrot.lane.b32.xlu1 %v4431_v8, %s3436_s26  ;;  %v4623_v44 = vpack.c.bf16 %v4304_v1, %v4304_v1 }
 0x188   : > { %1789 = vrot.lane.b32.xlu0 %v4437_v58, %s3436_s26 }
 0x189   : > { %v1922_v48 = vpop.permute.xlu1 %1921 }
 0x18a   : > { %2003 = vst.msk [vmem:[#allocation2 + $0x3c] sm:$0xf] %vm1987_vm11, %v1922_v48  ;;  %v1920_v24 = vpop.permute.xlu0 %1919  ;;  %v3399_v9 = vld [vmem:[#allocation2 + $0x30] sm:$0xff]   ;;  %v284_v48 = vunpack.c.l.bf16 %v230_v55 }
 0x18b   : > { %2002 = vst.msk [vmem:[#allocation2 + $0x38] sm:$0xf] %vm1987_vm11, %v1920_v24  ;;  %1795 = vrot.lane.b32.xlu1 %v4484_v41, %s3436_s26  ;;  %3316 = vmatprep.mubr.msk.bf16.mxu0 %vm2152_vm12, %v3399_v9 }
 0x18c   : > { %1793 = vrot.lane.b32.xlu0 %v4490_v16, %s3436_s26  ;;  %v579_v1 = vrot.slane %v284_v48, 1 }
 0x18d   : > { %v748_v10 = vpop.permute.xlu1 %747 }
 0x18e   : > { %825 = vst.msk [vmem:[#allocation2 + $0x4c] sm:$0xf] %vm805_vm4, %v748_v10  ;;  %v746_v42 = vpop.permute.xlu0 %745 }
 0x18f   : > { %824 = vst.msk [vmem:[#allocation2 + $0x48] sm:$0xf] %vm805_vm4, %v746_v42  ;;  %1933 = vrot.lane.b32.xlu1 %v4451_v30, %s3437_s4  ;;  %v580_v42 = vsel %vm500_vm0, %v4336_v50, %v579_v1 }
 0x190   : > { %1931 = vrot.lane.b32.xlu0 %v4457_v3, %s3437_s4  ;;  %v4650_v54 = vpack.c.bf16 %v580_v42, %v580_v42 }
 0x191   : > { %v1082_v46 = vpop.permute.xlu1 %1081 }
 0x192   : > { %1161 = vst.msk [vmem:[#allocation2 + $0x44] sm:$0xf] %vm1143_vm5, %v1082_v46  ;;  %v1080_v61 = vpop.permute.xlu0 %1079  ;;  %v3400_v20 = vld [vmem:[#allocation2 + $0x38] sm:$0xff]   ;;  %v4656_v46 = vpack.c.bf16 %v4352_v26, %v4352_v26 }
 0x193   : > { %1160 = vst.msk [vmem:[#allocation2 + $0x40] sm:$0xf] %vm1143_vm5, %v1080_v61  ;;  %759 = vrot.lane.b32.xlu1 %v4431_v8, %s3430_s18  ;;  %v3306_v57 = vpop.f32.mrf.mxu0  ;;  %3317 = vmatmul.mubr.msk.bf16.gmra.mxu0 %vm2152_vm12, %v3400_v20 }
 0x194   : > { %757 = vrot.lane.b32.xlu0 %v4437_v58, %s3430_s18  ;;  %2369 = vst.msk [vmem:[#allocation3 + $0x10] sm:$0xff] %vm2366_vm13, %v3306_v57 }
 0x195   : > { %v1086_v4 = vpop.permute.xlu1 %1085  ;;  %v2239_v22 = vpop.f32.mrf.mxu0 }
 0x196   : > { %1163 = vst.msk [vmem:[#allocation2 + $0x4c] sm:$0xf] %vm1143_vm5, %v1086_v4  ;;  %v1084_v11 = vpop.permute.xlu0 %1083 }
 0x197   : > { %1162 = vst.msk [vmem:[#allocation2 + $0x48] sm:$0xf] %vm1143_vm5, %v1084_v11  ;;  %1937 = vrot.lane.b32.xlu1 %v4511_v0, %s3437_s4  ;;  %v3307_v18 = vpop.f32.mrf.mxu0 }
 0x198   : > { %2367 = vst.msk [vmem:[#allocation3] sm:$0xff] %vm2366_vm13, %v2239_v22  ;;  %1935 = vrot.lane.b32.xlu0 %v4518_v40, %s3437_s4  ;;  %2370 = vst.msk [vmem:[#allocation3 + $0x18] sm:$0xff] %vm2366_vm13, %v3307_v18 }
 0x199   : > { %v1217_v53 = vpop.permute.xlu1 %1216  ;;  %v2242_v15 = vpop.f32.mrf.mxu0 }
 0x19a   : > { %1296 = vst.msk [vmem:[#allocation2 + $0x44] sm:$0xf] %vm1278_vm6, %v1217_v53  ;;  %v1215_v7 = vpop.permute.xlu0 %1214 }
 0x19b   : > { %1295 = vst.msk [vmem:[#allocation2 + $0x40] sm:$0xf] %vm1278_vm6, %v1215_v7  ;;  %763 = vrot.lane.b32.xlu1 %v4484_v41, %s3430_s18  ;;  %v4540_v14 = vld [vmem:[#allocation3 + $0x10] sm:$0xff] }
 0x19c   : > { %2368 = vst.msk [vmem:[#allocation3 + $0x8] sm:$0xff] %vm2366_vm13, %v2242_v15  ;;  %761 = vrot.lane.b32.xlu0 %v4490_v16, %s3430_s18  ;;  %v3249_v32 = vpack.c.bf16 %v4540_v14, %v4540_v14 }
 0x19d   : > { %v1221_v51 = vpop.permute.xlu1 %1220 }
 0x19e   : > { %1298 = vst.msk [vmem:[#allocation2 + $0x4c] sm:$0xf] %vm1278_vm6, %v1221_v51  ;;  %v1219_v45 = vpop.permute.xlu0 %1218 }
 0x19f   : > { %v4546_v36 = vld [vmem:[#allocation3] sm:$0xff]  ;;  %2562 = vst.msk [vmem:[%s4538_s8 + $0x8] sm:$0xf] %vm2559_vm14, %v3249_v32  ;;  %1097 = vrot.lane.b32.xlu1 %v4451_v30, %s3431_s19  ;;  %v4556_v8 = vld [vmem:[#allocation3 + $0x18] sm:$0xff] }
 0x1a0   : > { %v3247_v43 = vpack.c.bf16 %v4546_v36, %v4546_v36  ;;  %1297 = vst.msk [vmem:[#allocation2 + $0x48] sm:$0xf] %vm1278_vm6, %v1219_v45  ;;  %1095 = vrot.lane.b32.xlu0 %v4457_v3, %s3431_s19  ;;  %v3250_v58 = vpack.c.bf16 %v4556_v8, %v4556_v8 }
 0x1a1   : > { %v1362_v23 = vpop.permute.xlu1 %1361 }
 0x1a2   : > { %2560 = vst.msk [vmem:[%s4538_s8] sm:$0xf] %vm2559_vm14, %v3247_v43  ;;  %v1360_v17 = vpop.permute.xlu0 %1359  ;;  %2563 = vst.msk [vmem:[%s4538_s8 + $0xc] sm:$0xf] %vm2559_vm14, %v3250_v58 }
 0x1a3   : > { %v4565_v6 = vld [vmem:[#allocation3 + $0x8] sm:$0xff]  ;;  %1441 = vst.msk [vmem:[#allocation2 + $0x44] sm:$0xf] %vm1423_vm7, %v1362_v23  ;;  %1440 = vst.msk [vmem:[#allocation2 + $0x40] sm:$0xf] %vm1423_vm7, %v1360_v17  ;;  %1101 = vrot.lane.b32.xlu1 %v4511_v0, %s3431_s19 }
 0x1a4   : > { %v3248_v28 = vpack.c.bf16 %v4565_v6, %v4565_v6  ;;  %1099 = vrot.lane.b32.xlu0 %v4518_v40, %s3431_s19 }
 0x1a5   : > { %v1366_v30 = vpop.permute.xlu1 %1365 }
 0x1a6   : > { %2561 = vst.msk [vmem:[%s4538_s8 + $0x4] sm:$0xf] %vm2559_vm14, %v3248_v28  ;;  %v1364_v3 = vpop.permute.xlu0 %1363 }
 0x1a7   : > { %1443 = vst.msk [vmem:[#allocation2 + $0x4c] sm:$0xf] %vm1423_vm7, %v1366_v30  ;;  %1442 = vst.msk [vmem:[#allocation2 + $0x48] sm:$0xf] %vm1423_vm7, %v1364_v3  ;;  %1232 = vrot.lane.b32.xlu1 %v4145_v47, %s3432_s20 }
 0x1a8   : > { %1230 = vrot.lane.b32.xlu0 %v4147_v29, %s3432_s20 }
 0x1a9   : > { %v1504_v63 = vpop.permute.xlu1 %1503 }
 0x1aa   : > { %1583 = vst.msk [vmem:[#allocation2 + $0x44] sm:$0xf] %vm1565_vm8, %v1504_v63  ;;  %v1502_v5 = vpop.permute.xlu0 %1501  ;;  %v233_v63 = vld [vmem:[%s3475_s17 + $0xc8] sm:$0x1] }
 0x1ab   : > { %1582 = vst.msk [vmem:[#allocation2 + $0x40] sm:$0xf] %vm1565_vm8, %v1502_v5  ;;  %1236 = vrot.lane.b32.xlu1 %v4246_v31, %s3432_s20  ;;  %v287_v19 = vunpack.c.l.bf16 %v233_v63 }
 0x1ac   : > { %1234 = vrot.lane.b32.xlu0 %v4248_v33, %s3432_s20 }
 0x1ad   : > { %v1508_v47 = vpop.permute.xlu1 %1507 }
 0x1ae   : > { %1585 = vst.msk [vmem:[#allocation2 + $0x4c] sm:$0xf] %vm1565_vm8, %v1508_v47  ;;  %v1506_v29 = vpop.permute.xlu0 %1505 }
 0x1af   : > { %1584 = vst.msk [vmem:[#allocation2 + $0x48] sm:$0xf] %vm1565_vm8, %v1506_v29  ;;  %1377 = vrot.lane.b32.xlu1 %v4484_v41, %s3433_s21  ;;  %v232_v29 = vld [vmem:[%s3475_s17 + $0xc4] sm:$0xf] }
 0x1b0   : > { %1375 = vrot.lane.b32.xlu0 %v4490_v16, %s3433_s21 }
 0x1b1   : > { %v1639_v21 = vpop.permute.xlu1 %1638 }
 0x1b2   : > { %1718 = vst.msk [vmem:[#allocation2 + $0x44] sm:$0xf] %vm1700_vm9, %v1639_v21  ;;  %v1637_v39 = vpop.permute.xlu0 %1636 }
 0x1b3   : > { %1717 = vst.msk [vmem:[#allocation2 + $0x40] sm:$0xf] %vm1700_vm9, %v1637_v39  ;;  %1381 = vrot.lane.b32.xlu1 %v4597_v38, %s3433_s21 }
 0x1b4   : > { %1379 = vrot.lane.b32.xlu0 %v4603_v59, %s3433_s21 }
 0x1b5   : > { %v1643_v34 = vpop.permute.xlu1 %1642 }
 0x1b6   : > { %1720 = vst.msk [vmem:[#allocation2 + $0x4c] sm:$0xf] %vm1700_vm9, %v1643_v34  ;;  %v1641_v62 = vpop.permute.xlu0 %1640  ;;  %v3236_v34 = vcombine.low %v232_v29, %v232_v29 }
 0x1b7   : > { %1719 = vst.msk [vmem:[#allocation2 + $0x48] sm:$0xf] %vm1700_vm9, %v1641_v62  ;;  %1519 = vrot.lane.b32.xlu1 %v4511_v0, %s3434_s22  ;;  %v917_v0 = vrot.slane %v284_v48, 2 }
 0x1b8   : > { %1517 = vrot.lane.b32.xlu0 %v4518_v40, %s3434_s22 }
 0x1b9   : > { %v1784_v41 = vpop.permute.xlu1 %1783  ;;  %v918_v40 = vsel %vm838_vm2, %v4369_v27, %v917_v0  ;;  %v4684_v27 = vpack.c.bf16 %v4386_v56, %v4386_v56 }
 0x1ba   : > { %1863 = vst.msk [vmem:[#allocation2 + $0x44] sm:$0xf] %vm1845_vm10, %v1784_v41  ;;  %v1782_v16 = vpop.permute.xlu0 %1781  ;;  %v4677_v18 = vpack.c.bf16 %v918_v40, %v918_v40 }
 0x1bb   : > { %1862 = vst.msk [vmem:[#allocation2 + $0x40] sm:$0xf] %vm1845_vm10, %v1782_v16  ;;  %1523 = vrot.lane.b32.xlu1 %v4617_v25, %s3434_s22 }
 0x1bc   : > { %1521 = vrot.lane.b32.xlu0 %v4623_v44, %s3434_s22 }
 0x1bd   : > { %v1788_v24 = vpop.permute.xlu1 %1787 }
 0x1be   : > { %1865 = vst.msk [vmem:[#allocation2 + $0x4c] sm:$0xf] %vm1845_vm10, %v1788_v24  ;;  %v1786_v9 = vpop.permute.xlu0 %1785 }
 0x1bf   : > { %1864 = vst.msk [vmem:[#allocation2 + $0x48] sm:$0xf] %vm1845_vm10, %v1786_v9  ;;  %1654 = vrot.lane.b32.xlu1 %v4246_v31, %s3435_s23 }
 0x1c0   : > { %1652 = vrot.lane.b32.xlu0 %v4248_v33, %s3435_s23 }
 0x1c1   : > { %v1926_v35 = vpop.permute.xlu1 %1925 }
 0x1c2   : > { %2005 = vst.msk [vmem:[#allocation2 + $0x44] sm:$0xf] %vm1987_vm11, %v1926_v35  ;;  %v1924_v10 = vpop.permute.xlu0 %1923 }
 0x1c3   : > { %2004 = vst.msk [vmem:[#allocation2 + $0x40] sm:$0xf] %vm1987_vm11, %v1924_v10  ;;  %1658 = vrot.lane.b32.xlu1 %v4321_v60, %s3435_s23  ;;  %v1459_v10 = vrot.slane %v287_v19, 2 }
 0x1c4   : > { %1656 = vrot.lane.b32.xlu0 %v4323_v2, %s3435_s23 }
 0x1c5   : > { %v752_v31 = vpop.permute.xlu1 %751 }
 0x1c6   : > { %827 = vst.msk [vmem:[#allocation2 + $0x54] sm:$0xf] %vm805_vm4, %v752_v31  ;;  %v750_v33 = vpop.permute.xlu0 %749 }
 0x1c7   : > { %826 = vst.msk [vmem:[#allocation2 + $0x50] sm:$0xf] %vm805_vm4, %v750_v33  ;;  %1799 = vrot.lane.b32.xlu1 %v4597_v38, %s3436_s26 }
 0x1c8   : > { %1797 = vrot.lane.b32.xlu0 %v4603_v59, %s3436_s26 }
 0x1c9   : > { %v1930_v61 = vpop.permute.xlu1 %1929 }
 0x1ca   : > { %2007 = vst.msk [vmem:[#allocation2 + $0x4c] sm:$0xf] %vm1987_vm11, %v1930_v61  ;;  %v1928_v50 = vpop.permute.xlu0 %1927  ;;  %v3405_v20 = vld [vmem:[#allocation2 + $0x40] sm:$0xff]  }
 0x1cb   : > { %2006 = vst.msk [vmem:[#allocation2 + $0x48] sm:$0xf] %vm1987_vm11, %v1928_v50  ;;  %1803 = vrot.lane.b32.xlu1 %v4650_v54, %s3436_s26  ;;  %3320 = vmatprep.mubr.msk.bf16.mxu1 %vm2152_vm12, %v3405_v20 }
 0x1cc   : > { %1801 = vrot.lane.b32.xlu0 %v4656_v46, %s3436_s26 }
 0x1cd   : > { %v756_v57 = vpop.permute.xlu1 %755 }
 0x1ce   : > { %829 = vst.msk [vmem:[#allocation2 + $0x5c] sm:$0xf] %vm805_vm4, %v756_v57  ;;  %v754_v26 = vpop.permute.xlu0 %753 }
 0x1cf   : > { %828 = vst.msk [vmem:[#allocation2 + $0x58] sm:$0xf] %vm805_vm4, %v754_v26  ;;  %1941 = vrot.lane.b32.xlu1 %v4617_v25, %s3437_s4  ;;  %v236_v26 = vld [vmem:[%s3475_s17 + $0xd4] sm:$0x1] }
 0x1d0   : > { %1939 = vrot.lane.b32.xlu0 %v4623_v44, %s3437_s4 }
 0x1d1   : > { %v1090_v4 = vpop.permute.xlu1 %1089 }
 0x1d2   : > { %1165 = vst.msk [vmem:[#allocation2 + $0x54] sm:$0xf] %vm1143_vm5, %v1090_v4  ;;  %v1088_v11 = vpop.permute.xlu0 %1087  ;;  %v3406_v22 = vld [vmem:[#allocation2 + $0x48] sm:$0xff]   ;;  %v235_v4 = vld [vmem:[%s3475_s17 + $0xd0] sm:$0xf] }
 0x1d3   : > { %1164 = vst.msk [vmem:[#allocation2 + $0x50] sm:$0xf] %vm1143_vm5, %v1088_v11  ;;  %767 = vrot.lane.b32.xlu1 %v4597_v38, %s3430_s18  ;;  %v3310_v53 = vpop.f32.mrf.mxu0  ;;  %3321 = vmatmul.mubr.msk.bf16.vlgmr.msra.gmra.mxu1 %vm2152_vm12, %v3406_v22  ;;  %v286_v38 = vunpack.c.l.bf16 %v232_v29  ;;  %v289_v11 = vunpack.c.l.bf16 %v235_v4  ;;  %v234_v22 = vld [vmem:[%s3475_s17 + $0xcc] sm:$0xf] }
 0x1d4   : > { %765 = vrot.lane.b32.xlu0 %v4603_v59, %s3430_s18  ;;  %2373 = vst.msk [vmem:[#allocation3 + $0x30] sm:$0xff] %vm2366_vm13, %v3310_v53  ;;  %v231_v59 = vld [vmem:[%s3475_s17 + $0xc0] sm:$0xf]  ;;  %s181_s17 = scalar_lea.vmem %s5218_s3, %s2942_s14 }
 0x1d5   : > { %v1094_v7 = vpop.permute.xlu1 %1093  ;;  %v2255_v32 = vpop.f32.mrf.mxu0  ;;  %v285_v39 = vunpack.c.l.bf16 %v231_v59  ;;  %v1315_v62 = vrot.slane %v286_v38, 1  ;;  %v1457_v1 = vrot.slane %v286_v38, 2  ;;  %v1879_v63 = vrot.slane %v289_v11, 2 }
 0x1d6   : > { %1167 = vst.msk [vmem:[#allocation2 + $0x5c] sm:$0xf] %vm1143_vm5, %v1094_v7  ;;  %v1092_v15 = vpop.permute.xlu0 %1091  ;;  %v288_v7 = vunpack.c.l.bf16 %v234_v22 }
 0x1d7   : > { %1166 = vst.msk [vmem:[#allocation2 + $0x58] sm:$0xf] %vm1143_vm5, %v1092_v15  ;;  %1945 = vrot.lane.b32.xlu1 %v4677_v18, %s3437_s4  ;;  %v3311_v51 = vpop.f32.mrf.mxu0  ;;  %v1314_v55 = vrot.slane %v285_v39, 1  ;;  %v1456_v42 = vrot.slane %v285_v39, 2  ;;  %v3242_v15 = vcombine.low %v235_v4, %v235_v4 }
 0x1d8   : > { %2371 = vst.msk [vmem:[#allocation3 + $0x20] sm:$0xff] %vm2366_vm13, %v2255_v32  ;;  %1943 = vrot.lane.b32.xlu0 %v4684_v27, %s3437_s4  ;;  %2374 = vst.msk [vmem:[#allocation3 + $0x38] sm:$0xff] %vm2366_vm13, %v3311_v51  ;;  %v1737_v32 = vrot.slane %v289_v11, 1  ;;  %v3241_v51 = vcombine.low %v234_v22, %v234_v22  ;;  %v1878_v29 = vrot.slane %v288_v7, 2 }
 0x1d9   : > { %v1225_v56 = vpop.permute.xlu1 %1224  ;;  %v2258_v43 = vpop.f32.mrf.mxu0  ;;  %v1316_v24 = vsel %vm500_vm0, %v1314_v55, %v1315_v62 }
 0x1da   : > { %1300 = vst.msk [vmem:[#allocation2 + $0x54] sm:$0xf] %vm1278_vm6, %v1225_v56  ;;  %v1223_v45 = vpop.permute.xlu0 %1222  ;;  %v3237_v35 = vpack.c.bf16 %v1316_v24, %v1316_v24 }
 0x1db   : > { %1299 = vst.msk [vmem:[#allocation2 + $0x50] sm:$0xf] %vm1278_vm6, %v1223_v45  ;;  %771 = vrot.lane.b32.xlu1 %v4650_v54, %s3430_s18  ;;  %v4700_v58 = vld [vmem:[#allocation3 + $0x30] sm:$0xff] }
 0x1dc   : > { %2372 = vst.msk [vmem:[#allocation3 + $0x28] sm:$0xff] %vm2366_vm13, %v2258_v43  ;;  %769 = vrot.lane.b32.xlu0 %v4656_v46, %s3430_s18  ;;  %v3253_v23 = vpack.c.bf16 %v4700_v58, %v4700_v58  ;;  %v1736_v43 = vrot.slane %v288_v7, 1 }
 0x1dd   : > { %v1229_v52 = vpop.permute.xlu1 %1228 }
 0x1de   : > { %1302 = vst.msk [vmem:[#allocation2 + $0x5c] sm:$0xf] %vm1278_vm6, %v1229_v52  ;;  %v1227_v28 = vpop.permute.xlu0 %1226 }
 0x1df   : > { %v4706_v17 = vld [vmem:[#allocation3 + $0x20] sm:$0xff]  ;;  %2566 = vst.msk [vmem:[%s4538_s8 + $0x18] sm:$0xf] %vm2559_vm14, %v3253_v23  ;;  %1105 = vrot.lane.b32.xlu1 %v4617_v25, %s3431_s19  ;;  %v4716_v30 = vld [vmem:[#allocation3 + $0x38] sm:$0xff]  ;;  %v3235_v25 = vcombine.low %v231_v59, %v231_v59 }
 0x1e0   : > { %v3251_v12 = vpack.c.bf16 %v4706_v17, %v4706_v17  ;;  %1301 = vst.msk [vmem:[#allocation2 + $0x58] sm:$0xf] %vm1278_vm6, %v1227_v28  ;;  %1103 = vrot.lane.b32.xlu0 %v4623_v44, %s3431_s19  ;;  %v3254_v3 = vpack.c.bf16 %v4716_v30, %v4716_v30  ;;  %v1317_v44 = vrot.slane %v287_v19, 1 }
 0x1e1   : > { %v1370_v49 = vpop.permute.xlu1 %1369 }
 0x1e2   : > { %2564 = vst.msk [vmem:[%s4538_s8 + $0x10] sm:$0xf] %vm2559_vm14, %v3251_v12  ;;  %v1368_v37 = vpop.permute.xlu0 %1367  ;;  %2567 = vst.msk [vmem:[%s4538_s8 + $0x1c] sm:$0xf] %vm2559_vm14, %v3254_v3  ;;  %v1738_v12 = vsel %vm500_vm0, %v1736_v43, %v1737_v32 }
 0x1e3   : > { %v4725_v5 = vld [vmem:[#allocation3 + $0x28] sm:$0xff]  ;;  %1445 = vst.msk [vmem:[#allocation2 + $0x54] sm:$0xf] %vm1423_vm7, %v1370_v49  ;;  %1444 = vst.msk [vmem:[#allocation2 + $0x50] sm:$0xf] %vm1423_vm7, %v1368_v37  ;;  %1109 = vrot.lane.b32.xlu1 %v4677_v18, %s3431_s19  ;;  %v3243_v37 = vpack.c.bf16 %v1738_v12, %v1738_v12 }
 0x1e4   : > { %v3252_v47 = vpack.c.bf16 %v4725_v5, %v4725_v5  ;;  %1107 = vrot.lane.b32.xlu0 %v4684_v27, %s3431_s19 }
 0x1e5   : > { %v1374_v21 = vpop.permute.xlu1 %1373 }
 0x1e6   : > { %2565 = vst.msk [vmem:[%s4538_s8 + $0x14] sm:$0xf] %vm2559_vm14, %v3252_v47  ;;  %v1372_v13 = vpop.permute.xlu0 %1371 }
 0x1e7   : > { %1447 = vst.msk [vmem:[#allocation2 + $0x5c] sm:$0xf] %vm1423_vm7, %v1374_v21  ;;  %1446 = vst.msk [vmem:[#allocation2 + $0x58] sm:$0xf] %vm1423_vm7, %v1372_v13  ;;  %1240 = vrot.lane.b32.xlu1 %v4321_v60, %s3432_s20  ;;  %v1318_v60 = vsel %vm500_vm0, %v1315_v62, %v1317_v44  ;;  %v1880_v13 = vsel %vm838_vm2, %v1878_v29, %v1879_v63 }
 0x1e8   : > { %1238 = vrot.lane.b32.xlu0 %v4323_v2, %s3432_s20  ;;  %v3238_v9 = vpack.c.bf16 %v1318_v60, %v1318_v60 }
 0x1e9   : > { %v1512_v41 = vpop.permute.xlu1 %1511 }
 0x1ea   : > { %1587 = vst.msk [vmem:[#allocation2 + $0x54] sm:$0xf] %vm1565_vm8, %v1512_v41  ;;  %v1510_v16 = vpop.permute.xlu0 %1509 }
 0x1eb   : > { %1586 = vst.msk [vmem:[#allocation2 + $0x50] sm:$0xf] %vm1565_vm8, %v1510_v16  ;;  %1244 = vrot.lane.b32.xlu1 %v3236_v34, %s3432_s20 }
 0x1ec   : > { %1242 = vrot.lane.b32.xlu0 %v3235_v25, %s3432_s20 }
 0x1ed   : > { %v1516_v48 = vpop.permute.xlu1 %1515 }
 0x1ee   : > { %1589 = vst.msk [vmem:[#allocation2 + $0x5c] sm:$0xf] %vm1565_vm8, %v1516_v48  ;;  %v1514_v2 = vpop.permute.xlu0 %1513 }
 0x1ef   : > { %1588 = vst.msk [vmem:[#allocation2 + $0x58] sm:$0xf] %vm1565_vm8, %v1514_v2  ;;  %1385 = vrot.lane.b32.xlu1 %v4650_v54, %s3433_s21  ;;  %v1460_v54 = vsel %vm838_vm2, %v1457_v1, %v1459_v10 }
 0x1f0   : > { %1383 = vrot.lane.b32.xlu0 %v4656_v46, %s3433_s21  ;;  %v1458_v46 = vsel %vm838_vm2, %v1456_v42, %v1457_v1  ;;  %v3240_v20 = vpack.c.bf16 %v1460_v54, %v1460_v54 }
 0x1f1   : > { %v1647_v31 = vpop.permute.xlu1 %1646  ;;  %v3239_v0 = vpack.c.bf16 %v1458_v46, %v1458_v46 }
 0x1f2   : > { %1722 = vst.msk [vmem:[#allocation2 + $0x54] sm:$0xf] %vm1700_vm9, %v1647_v31  ;;  %v1645_v33 = vpop.permute.xlu0 %1644 }
 0x1f3   : > { %1721 = vst.msk [vmem:[#allocation2 + $0x50] sm:$0xf] %vm1700_vm9, %v1645_v33  ;;  %1389 = vrot.lane.b32.xlu1 %v3238_v9, %s3433_s21 }
 0x1f4   : > { %1387 = vrot.lane.b32.xlu0 %v3237_v35, %s3433_s21 }
 0x1f5   : > { %v1651_v61 = vpop.permute.xlu1 %1650 }
 0x1f6   : > { %1724 = vst.msk [vmem:[#allocation2 + $0x5c] sm:$0xf] %vm1700_vm9, %v1651_v61  ;;  %v1649_v50 = vpop.permute.xlu0 %1648 }
 0x1f7   : > { %1723 = vst.msk [vmem:[#allocation2 + $0x58] sm:$0xf] %vm1700_vm9, %v1649_v50  ;;  %1527 = vrot.lane.b32.xlu1 %v4677_v18, %s3434_s22  ;;  %v290_v18 = vunpack.c.l.bf16 %v236_v26 }
 0x1f8   : > { %1525 = vrot.lane.b32.xlu0 %v4684_v27, %s3434_s22 }
 0x1f9   : > { %v1792_v57 = vpop.permute.xlu1 %1791  ;;  %v1739_v56 = vrot.slane %v290_v18, 1  ;;  %v1881_v47 = vrot.slane %v290_v18, 2 }
 0x1fa   : > { %1867 = vst.msk [vmem:[#allocation2 + $0x54] sm:$0xf] %vm1845_vm10, %v1792_v57  ;;  %v1790_v40 = vpop.permute.xlu0 %1789 }
 0x1fb   : > { %1866 = vst.msk [vmem:[#allocation2 + $0x50] sm:$0xf] %vm1845_vm10, %v1790_v40  ;;  %1531 = vrot.lane.b32.xlu1 %v3240_v20, %s3434_s22  ;;  %v1740_v52 = vsel %vm500_vm0, %v1737_v32, %v1739_v56  ;;  %v1882_v21 = vsel %vm838_vm2, %v1879_v63, %v1881_v47  ;;  %vm2687_vm0 = vcmask 130048   ;;  %vm2844_vm2 = vcmask 1040384  }
 0x1fc   : > { %1529 = vrot.lane.b32.xlu0 %v3239_v0, %s3434_s22  ;;  %v3244_v49 = vpack.c.bf16 %v1740_v52, %v1740_v52  ;;  %v3246_v62 = vpack.c.bf16 %v1882_v21, %v1882_v21 }
 0x1fd   : > { %v1796_v53 = vpop.permute.xlu1 %1795 }
 0x1fe   : > { %1869 = vst.msk [vmem:[#allocation2 + $0x5c] sm:$0xf] %vm1845_vm10, %v1796_v53  ;;  %v1794_v27 = vpop.permute.xlu0 %1793 }
 0x1ff   : > { %1868 = vst.msk [vmem:[#allocation2 + $0x58] sm:$0xf] %vm1845_vm10, %v1794_v27  ;;  %1662 = vrot.lane.b32.xlu1 %v3236_v34, %s3435_s23 }
 0x200   : > { %1660 = vrot.lane.b32.xlu0 %v3235_v25, %s3435_s23  ;;  %v3245_v25 = vpack.c.bf16 %v1880_v13, %v1880_v13 }
 0x201   : > { %v1934_v45 = vpop.permute.xlu1 %1933 }
 0x202   : > { %2009 = vst.msk [vmem:[#allocation2 + $0x54] sm:$0xf] %vm1987_vm11, %v1934_v45  ;;  %v1932_v23 = vpop.permute.xlu0 %1931 }
 0x203   : > { %2008 = vst.msk [vmem:[#allocation2 + $0x50] sm:$0xf] %vm1987_vm11, %v1932_v23  ;;  %1666 = vrot.lane.b32.xlu1 %v3242_v15, %s3435_s23 }
 0x204   : > { %1664 = vrot.lane.b32.xlu0 %v3241_v51, %s3435_s23 }
 0x205   : > { %v760_v28 = vpop.permute.xlu1 %759 }
 0x206   : > { %831 = vst.msk [vmem:[#allocation2 + $0x64] sm:$0xf] %vm805_vm4, %v760_v28  ;;  %v758_v3 = vpop.permute.xlu0 %757 }
 0x207   : > { %830 = vst.msk [vmem:[#allocation2 + $0x60] sm:$0xf] %vm805_vm4, %v758_v3  ;;  %1807 = vrot.lane.b32.xlu1 %v3238_v9, %s3436_s26 }
 0x208   : > { %1805 = vrot.lane.b32.xlu0 %v3237_v35, %s3436_s26 }
 0x209   : > { %v1938_v38 = vpop.permute.xlu1 %1937 }
 0x20a   : > { %2011 = vst.msk [vmem:[#allocation2 + $0x5c] sm:$0xf] %vm1987_vm11, %v1938_v38  ;;  %v1936_v59 = vpop.permute.xlu0 %1935  ;;  %v3411_v19 = vld [vmem:[#allocation2 + $0x50] sm:$0xff]  }
 0x20b   : > { %2010 = vst.msk [vmem:[#allocation2 + $0x58] sm:$0xf] %vm1987_vm11, %v1936_v59  ;;  %1811 = vrot.lane.b32.xlu1 %v3244_v49, %s3436_s26  ;;  %3324 = vmatprep.mubr.msk.bf16.mxu1 %vm2152_vm12, %v3411_v19 }
 0x20c   : > { %1809 = vrot.lane.b32.xlu0 %v3243_v37, %s3436_s26 }
 0x20d   : > { %v764_v39 = vpop.permute.xlu1 %763 }
 0x20e   : > { %833 = vst.msk [vmem:[#allocation2 + $0x6c] sm:$0xf] %vm805_vm4, %v764_v39  ;;  %v762_v34 = vpop.permute.xlu0 %761 }
 0x20f   : > { %832 = vst.msk [vmem:[#allocation2 + $0x68] sm:$0xf] %vm805_vm4, %v762_v34  ;;  %1949 = vrot.lane.b32.xlu1 %v3240_v20, %s3437_s4 }
 0x210   : > { %1947 = vrot.lane.b32.xlu0 %v3239_v0, %s3437_s4 }
 0x211   : > { %v1098_v44 = vpop.permute.xlu1 %1097 }
 0x212   : > { %1169 = vst.msk [vmem:[#allocation2 + $0x64] sm:$0xf] %vm1143_vm5, %v1098_v44  ;;  %v1096_v41 = vpop.permute.xlu0 %1095  ;;  %v3412_v55 = vld [vmem:[#allocation2 + $0x58] sm:$0xff]  }
 0x213   : > { %1168 = vst.msk [vmem:[#allocation2 + $0x60] sm:$0xf] %vm1143_vm5, %v1096_v41  ;;  %1953 = vrot.lane.b32.xlu1 %v3246_v62, %s3437_s4  ;;  %v3314_v16 = vpop.f32.mrf.mxu0  ;;  %3325 = vmatmul.mubr.msk.bf16.gmra.mxu1 %vm2152_vm12, %v3412_v55 }
 0x214   : > { %1951 = vrot.lane.b32.xlu0 %v3245_v25, %s3437_s4  ;;  %2377 = vst.msk [vmem:[#allocation3 + $0x50] sm:$0xff] %vm2366_vm13, %v3314_v16 }
 0x215   : > { %v1102_v60 = vpop.permute.xlu1 %1101  ;;  %v2271_v24 = vpop.f32.mrf.mxu0 }
 0x216   : > { %1171 = vst.msk [vmem:[#allocation2 + $0x6c] sm:$0xf] %vm1143_vm5, %v1102_v60  ;;  %v1100_v48 = vpop.permute.xlu0 %1099 }
 0x217   : > { %1170 = vst.msk [vmem:[#allocation2 + $0x68] sm:$0xf] %vm1143_vm5, %v1100_v48  ;;  %v3315_v2 = vpop.f32.mrf.mxu0 }
 0x218   : > { %2375 = vst.msk [vmem:[#allocation3 + $0x40] sm:$0xff] %vm2366_vm13, %v2271_v24  ;;  %2378 = vst.msk [vmem:[#allocation3 + $0x58] sm:$0xff] %vm2366_vm13, %v3315_v2 }
 0x219   : > { %v1233_v9 = vpop.permute.xlu1 %1232  ;;  %v2274_v35 = vpop.f32.mrf.mxu0 }
 0x21a   : > { %1304 = vst.msk [vmem:[#allocation2 + $0x64] sm:$0xf] %vm1278_vm6, %v1233_v9  ;;  %v1231_v1 = vpop.permute.xlu0 %1230 }
 0x21b   : > { %1303 = vst.msk [vmem:[#allocation2 + $0x60] sm:$0xf] %vm1278_vm6, %v1231_v1  ;;  %v4816_v10 = vld [vmem:[#allocation3 + $0x50] sm:$0xff] }
 0x21c   : > { %2376 = vst.msk [vmem:[#allocation3 + $0x48] sm:$0xff] %vm2366_vm13, %v2274_v35  ;;  %v3257_v42 = vpack.c.bf16 %v4816_v10, %v4816_v10 }
 0x21d   : > { %v1237_v31 = vpop.permute.xlu1 %1236 }
 0x21e   : > { %1306 = vst.msk [vmem:[#allocation2 + $0x6c] sm:$0xf] %vm1278_vm6, %v1237_v31  ;;  %v1235_v54 = vpop.permute.xlu0 %1234 }
 0x21f   : > { %v4820_v33 = vld [vmem:[#allocation3 + $0x40] sm:$0xff]  ;;  %2570 = vst.msk [vmem:[%s4538_s8 + $0x28] sm:$0xf] %vm2559_vm14, %v3257_v42  ;;  %v4828_v46 = vld [vmem:[#allocation3 + $0x58] sm:$0xff] }
 0x220   : > { %v3255_v61 = vpack.c.bf16 %v4820_v33, %v4820_v33  ;;  %1305 = vst.msk [vmem:[#allocation2 + $0x68] sm:$0xf] %vm1278_vm6, %v1235_v54  ;;  %v3258_v50 = vpack.c.bf16 %v4828_v46, %v4828_v46 }
 0x221   : > { %v1378_v20 = vpop.permute.xlu1 %1377 }
 0x222   : > { %2568 = vst.msk [vmem:[%s4538_s8 + $0x20] sm:$0xf] %vm2559_vm14, %v3255_v61  ;;  %v1376_v57 = vpop.permute.xlu0 %1375  ;;  %2571 = vst.msk [vmem:[%s4538_s8 + $0x2c] sm:$0xf] %vm2559_vm14, %v3258_v50 }
 0x223   : > { %v4834_v0 = vld [vmem:[#allocation3 + $0x48] sm:$0xff]  ;;  %1449 = vst.msk [vmem:[#allocation2 + $0x64] sm:$0xf] %vm1423_vm7, %v1378_v20  ;;  %1448 = vst.msk [vmem:[#allocation2 + $0x60] sm:$0xf] %vm1423_vm7, %v1376_v57 }
 0x224   : > { %v3256_v26 = vpack.c.bf16 %v4834_v0, %v4834_v0 }
 0x225   : > { %v1382_v40 = vpop.permute.xlu1 %1381 }
 0x226   : > { %2569 = vst.msk [vmem:[%s4538_s8 + $0x24] sm:$0xf] %vm2559_vm14, %v3256_v26  ;;  %v1380_v4 = vpop.permute.xlu0 %1379 }
 0x227   : > { %1451 = vst.msk [vmem:[#allocation2 + $0x6c] sm:$0xf] %vm1423_vm7, %v1382_v40  ;;  %1450 = vst.msk [vmem:[#allocation2 + $0x68] sm:$0xf] %vm1423_vm7, %v1380_v4 }
 0x229   : > { %v1520_v11 = vpop.permute.xlu1 %1519 }
 0x22a   : > { %1591 = vst.msk [vmem:[#allocation2 + $0x64] sm:$0xf] %vm1565_vm8, %v1520_v11  ;;  %v1518_v22 = vpop.permute.xlu0 %1517 }
 0x22b   : > { %1590 = vst.msk [vmem:[#allocation2 + $0x60] sm:$0xf] %vm1565_vm8, %v1518_v22 }
 0x22d   : > { %v1524_v18 = vpop.permute.xlu1 %1523 }
 0x22e   : > { %1593 = vst.msk [vmem:[#allocation2 + $0x6c] sm:$0xf] %vm1565_vm8, %v1524_v18  ;;  %v1522_v53 = vpop.permute.xlu0 %1521 }
 0x22f   : > { %1592 = vst.msk [vmem:[#allocation2 + $0x68] sm:$0xf] %vm1565_vm8, %v1522_v53 }
 0x231   : > { %v1655_v7 = vpop.permute.xlu1 %1654 }
 0x232   : > { %1726 = vst.msk [vmem:[#allocation2 + $0x64] sm:$0xf] %vm1700_vm9, %v1655_v7  ;;  %v1653_v27 = vpop.permute.xlu0 %1652 }
 0x233   : > { %1725 = vst.msk [vmem:[#allocation2 + $0x60] sm:$0xf] %vm1700_vm9, %v1653_v27 }
 0x235   : > { %v1659_v15 = vpop.permute.xlu1 %1658 }
 0x236   : > { %1728 = vst.msk [vmem:[#allocation2 + $0x6c] sm:$0xf] %vm1700_vm9, %v1659_v15  ;;  %v1657_v32 = vpop.permute.xlu0 %1656 }
 0x237   : > { %1727 = vst.msk [vmem:[#allocation2 + $0x68] sm:$0xf] %vm1700_vm9, %v1657_v32 }
 0x239   : > { %v1800_v51 = vpop.permute.xlu1 %1799 }
 0x23a   : > { %1871 = vst.msk [vmem:[#allocation2 + $0x64] sm:$0xf] %vm1845_vm10, %v1800_v51  ;;  %v1798_v56 = vpop.permute.xlu0 %1797 }
 0x23b   : > { %1870 = vst.msk [vmem:[#allocation2 + $0x60] sm:$0xf] %vm1845_vm10, %v1798_v56 }
 0x23d   : > { %v1804_v45 = vpop.permute.xlu1 %1803 }
 0x23e   : > { %1873 = vst.msk [vmem:[#allocation2 + $0x6c] sm:$0xf] %vm1845_vm10, %v1804_v45  ;;  %v1802_v43 = vpop.permute.xlu0 %1801 }
 0x23f   : > { %1872 = vst.msk [vmem:[#allocation2 + $0x68] sm:$0xf] %vm1845_vm10, %v1802_v43 }
 0x241   : > { %v1942_v23 = vpop.permute.xlu1 %1941 }
 0x242   : > { %2013 = vst.msk [vmem:[#allocation2 + $0x64] sm:$0xf] %vm1987_vm11, %v1942_v23  ;;  %v1940_v52 = vpop.permute.xlu0 %1939 }
 0x243   : > { %2012 = vst.msk [vmem:[#allocation2 + $0x60] sm:$0xf] %vm1987_vm11, %v1940_v52 }
 0x245   : > { %v768_v28 = vpop.permute.xlu1 %767 }
 0x246   : > { %835 = vst.msk [vmem:[#allocation2 + $0x74] sm:$0xf] %vm805_vm4, %v768_v28  ;;  %v766_v12 = vpop.permute.xlu0 %765 }
 0x247   : > { %834 = vst.msk [vmem:[#allocation2 + $0x70] sm:$0xf] %vm805_vm4, %v766_v12 }
 0x249   : > { %v1946_v3 = vpop.permute.xlu1 %1945 }
 0x24a   : > { %2015 = vst.msk [vmem:[#allocation2 + $0x6c] sm:$0xf] %vm1987_vm11, %v1946_v3  ;;  %v1944_v49 = vpop.permute.xlu0 %1943  ;;  %v3413_v63 = vld [vmem:[#allocation2 + $0x60] sm:$0xff]  }
 0x24b   : > { %2014 = vst.msk [vmem:[#allocation2 + $0x68] sm:$0xf] %vm1987_vm11, %v1944_v49  ;;  %3328 = vmatprep.mubr.msk.bf16.mxu1 %vm2152_vm12, %v3413_v63 }
 0x24d   : > { %v772_v37 = vpop.permute.xlu1 %771 }
 0x24e   : > { %837 = vst.msk [vmem:[#allocation2 + $0x7c] sm:$0xf] %vm805_vm4, %v772_v37  ;;  %v770_v47 = vpop.permute.xlu0 %769 }
 0x24f   : > { %836 = vst.msk [vmem:[#allocation2 + $0x78] sm:$0xf] %vm805_vm4, %v770_v47 }
 0x251   : > { %v1106_v29 = vpop.permute.xlu1 %1105 }
 0x252   : > { %1173 = vst.msk [vmem:[#allocation2 + $0x74] sm:$0xf] %vm1143_vm5, %v1106_v29  ;;  %v1104_v38 = vpop.permute.xlu0 %1103  ;;  %v3414_v59 = vld [vmem:[#allocation2 + $0x68] sm:$0xff]  }
 0x253   : > { %1172 = vst.msk [vmem:[#allocation2 + $0x70] sm:$0xf] %vm1143_vm5, %v1104_v38  ;;  %v3318_v19 = vpop.f32.mrf.mxu0  ;;  %3329 = vmatmul.mubr.msk.bf16.gmra.mxu1 %vm2152_vm12, %v3414_v59 }
 0x254   : > { %2381 = vst.msk [vmem:[#allocation3 + $0x70] sm:$0xff] %vm2366_vm13, %v3318_v19 }
 0x255   : > { %v1110_v21 = vpop.permute.xlu1 %1109  ;;  %v2287_v13 = vpop.f32.mrf.mxu0 }
 0x256   : > { %1175 = vst.msk [vmem:[#allocation2 + $0x7c] sm:$0xf] %vm1143_vm5, %v1110_v21  ;;  %v1108_v39 = vpop.permute.xlu0 %1107 }
 0x257   : > { %1174 = vst.msk [vmem:[#allocation2 + $0x78] sm:$0xf] %vm1143_vm5, %v1108_v39  ;;  %v3319_v34 = vpop.f32.mrf.mxu0 }
 0x258   : > { %2379 = vst.msk [vmem:[#allocation3 + $0x60] sm:$0xff] %vm2366_vm13, %v2287_v13  ;;  %2382 = vst.msk [vmem:[#allocation3 + $0x78] sm:$0xff] %vm2366_vm13, %v3319_v34 }
 0x259   : > { %v1241_v62 = vpop.permute.xlu1 %1240  ;;  %v2290_v44 = vpop.f32.mrf.mxu0 }
 0x25a   : > { %1308 = vst.msk [vmem:[#allocation2 + $0x74] sm:$0xf] %vm1278_vm6, %v1241_v62  ;;  %v1239_v25 = vpop.permute.xlu0 %1238 }
 0x25b   : > { %1307 = vst.msk [vmem:[#allocation2 + $0x70] sm:$0xf] %vm1278_vm6, %v1239_v25  ;;  %v4878_v41 = vld [vmem:[#allocation3 + $0x70] sm:$0xff] }
 0x25c   : > { %2380 = vst.msk [vmem:[#allocation3 + $0x68] sm:$0xff] %vm2366_vm13, %v2290_v44  ;;  %v3261_v55 = vpack.c.bf16 %v4878_v41, %v4878_v41 }
 0x25d   : > { %v1245_v16 = vpop.permute.xlu1 %1244 }
 0x25e   : > { %1310 = vst.msk [vmem:[#allocation2 + $0x7c] sm:$0xf] %vm1278_vm6, %v1245_v16  ;;  %v1243_v48 = vpop.permute.xlu0 %1242 }
 0x25f   : > { %v4882_v60 = vld [vmem:[#allocation3 + $0x60] sm:$0xff]  ;;  %2574 = vst.msk [vmem:[%s4538_s8 + $0x38] sm:$0xf] %vm2559_vm14, %v3261_v55  ;;  %v4890_v2 = vld [vmem:[#allocation3 + $0x78] sm:$0xff] }
 0x260   : > { %v3259_v24 = vpack.c.bf16 %v4882_v60, %v4882_v60  ;;  %1309 = vst.msk [vmem:[#allocation2 + $0x78] sm:$0xf] %vm1278_vm6, %v1243_v48  ;;  %v3262_v9 = vpack.c.bf16 %v4890_v2, %v4890_v2 }
 0x261   : > { %v1386_v1 = vpop.permute.xlu1 %1385 }
 0x262   : > { %2572 = vst.msk [vmem:[%s4538_s8 + $0x30] sm:$0xf] %vm2559_vm14, %v3259_v24  ;;  %v1384_v42 = vpop.permute.xlu0 %1383  ;;  %2575 = vst.msk [vmem:[%s4538_s8 + $0x3c] sm:$0xf] %vm2559_vm14, %v3262_v9  ;;  %v2593_v9 = vsel %vm2366_vm13, %v4565_v6, 0.0 }
 0x263   : > { %v4896_v35 = vld [vmem:[#allocation3 + $0x68] sm:$0xff]  ;;  %1453 = vst.msk [vmem:[#allocation2 + $0x74] sm:$0xf] %vm1423_vm7, %v1386_v1  ;;  %1452 = vst.msk [vmem:[#allocation2 + $0x70] sm:$0xf] %vm1423_vm7, %v1384_v42  ;;  %v2592_v1 = vsel %vm2366_vm13, %v4546_v36, 0.0 }
 0x264   : > { %v3260_v31 = vpack.c.bf16 %v4896_v35, %v4896_v35  ;;  %v2594_v42 = vadd.f32 %v2593_v9, %v2592_v1 }
 0x265   : > { %v1390_v54 = vpop.permute.xlu1 %1389 }
 0x266   : > { %2573 = vst.msk [vmem:[%s4538_s8 + $0x34] sm:$0xf] %vm2559_vm14, %v3260_v31  ;;  %v1388_v61 = vpop.permute.xlu0 %1387  ;;  %v2595_v31 = vsel %vm2366_vm13, %v4540_v14, 0.0 }
 0x267   : > { %1455 = vst.msk [vmem:[#allocation2 + $0x7c] sm:$0xf] %vm1423_vm7, %v1390_v54  ;;  %1454 = vst.msk [vmem:[#allocation2 + $0x78] sm:$0xf] %vm1423_vm7, %v1388_v61  ;;  %v2596_v54 = vadd.f32 %v2595_v31, %v2594_v42  ;;  %v2597_v61 = vsel %vm2366_vm13, %v4556_v8, 0.0 }
 0x269   : > { %v1528_v50 = vpop.permute.xlu1 %1527 }
 0x26a   : > { %1595 = vst.msk [vmem:[#allocation2 + $0x74] sm:$0xf] %vm1565_vm8, %v1528_v50  ;;  %v1526_v20 = vpop.permute.xlu0 %1525  ;;  %v2599_v50 = vsel %vm2366_vm13, %v4706_v17, 0.0 }
 0x26b   : > { %1594 = vst.msk [vmem:[#allocation2 + $0x70] sm:$0xf] %vm1565_vm8, %v1526_v20  ;;  %v2598_v20 = vadd.f32 %v2597_v61, %v2596_v54 }
 0x26d   : > { %v1532_v57 = vpop.permute.xlu1 %1531  ;;  %v2600_v6 = vadd.f32 %v2599_v50, %v2598_v20 }
 0x26e   : > { %1597 = vst.msk [vmem:[#allocation2 + $0x7c] sm:$0xf] %vm1565_vm8, %v1532_v57  ;;  %v1530_v26 = vpop.permute.xlu0 %1529 }
 0x26f   : > { %1596 = vst.msk [vmem:[#allocation2 + $0x78] sm:$0xf] %vm1565_vm8, %v1530_v26  ;;  %v2601_v26 = vsel %vm2366_vm13, %v4725_v5, 0.0 }
 0x270   : > { %v2602_v14 = vadd.f32 %v2601_v26, %v2600_v6 }
 0x271   : > { %v1663_v40 = vpop.permute.xlu1 %1662 }
 0x272   : > { %1730 = vst.msk [vmem:[#allocation2 + $0x74] sm:$0xf] %vm1700_vm9, %v1663_v40  ;;  %v1661_v4 = vpop.permute.xlu0 %1660 }
 0x273   : > { %1729 = vst.msk [vmem:[#allocation2 + $0x70] sm:$0xf] %vm1700_vm9, %v1661_v4  ;;  %v2603_v4 = vsel %vm2366_vm13, %v4700_v58, 0.0 }
 0x275   : > { %v1667_v11 = vpop.permute.xlu1 %1666 }
 0x276   : > { %1732 = vst.msk [vmem:[#allocation2 + $0x7c] sm:$0xf] %vm1700_vm9, %v1667_v11  ;;  %v1665_v22 = vpop.permute.xlu0 %1664  ;;  %v2604_v11 = vadd.f32 %v2603_v4, %v2602_v14 }
 0x277   : > { %1731 = vst.msk [vmem:[#allocation2 + $0x78] sm:$0xf] %vm1700_vm9, %v1665_v22 }
 0x279   : > { %v1808_v18 = vpop.permute.xlu1 %1807 }
 0x27a   : > { %1875 = vst.msk [vmem:[#allocation2 + $0x74] sm:$0xf] %vm1845_vm10, %v1808_v18  ;;  %v1806_v53 = vpop.permute.xlu0 %1805 }
 0x27b   : > { %1874 = vst.msk [vmem:[#allocation2 + $0x70] sm:$0xf] %vm1845_vm10, %v1806_v53 }
 0x27d   : > { %v1812_v7 = vpop.permute.xlu1 %1811 }
 0x27e   : > { %1877 = vst.msk [vmem:[#allocation2 + $0x7c] sm:$0xf] %vm1845_vm10, %v1812_v7  ;;  %v1810_v27 = vpop.permute.xlu0 %1809  ;;  %v2605_v7 = vsel %vm2366_vm13, %v4716_v30, 0.0 }
 0x27f   : > { %1876 = vst.msk [vmem:[#allocation2 + $0x78] sm:$0xf] %vm1845_vm10, %v1810_v27  ;;  %v2607_v27 = vsel %vm2366_vm13, %v4820_v33, 0.0 }
 0x281   : > { %v1950_v15 = vpop.permute.xlu1 %1949 }
 0x282   : > { %2017 = vst.msk [vmem:[#allocation2 + $0x74] sm:$0xf] %vm1987_vm11, %v1950_v15  ;;  %v1948_v32 = vpop.permute.xlu0 %1947  ;;  %v2606_v15 = vadd.f32 %v2605_v7, %v2604_v11 }
 0x283   : > { %2016 = vst.msk [vmem:[#allocation2 + $0x70] sm:$0xf] %vm1987_vm11, %v1948_v32 }
 0x285   : > { %v1954_v51 = vpop.permute.xlu1 %1953 }
 0x286   : > { %2019 = vst.msk [vmem:[#allocation2 + $0x7c] sm:$0xf] %vm1987_vm11, %v1954_v51  ;;  %v1952_v56 = vpop.permute.xlu0 %1951  ;;  %v2609_v51 = vsel %vm2366_vm13, %v4834_v0, 0.0 }
 0x287   : > { %2018 = vst.msk [vmem:[#allocation2 + $0x78] sm:$0xf] %vm1987_vm11, %v1952_v56 }
 0x28a   : > { %v3415_v45 = vld [vmem:[#allocation2 + $0x70] sm:$0xff]  }
 0x28b   : > { %3332 = vmatprep.mubr.msk.bf16.mxu1 %vm2152_vm12, %v3415_v45  ;;  %v2608_v45 = vadd.f32 %v2607_v27, %v2606_v15 }
 0x28e   : > { %v3416_v43 = vld [vmem:[#allocation2 + $0x78] sm:$0xff]  }
 0x28f   : > { %3333 = vmatmul.mubr.msk.bf16.gmra.mxu1 %vm2152_vm12, %v3416_v43 }
 0x293   : > { %v3322_v23 = vpop.f32.mrf.mxu1 }
 0x294   : > { %2385 = vst.msk [vmem:[#allocation3 + $0x90] sm:$0xff] %vm2366_vm13, %v3322_v23 }
 0x295   : > { %v2303_v52 = vpop.f32.mrf.mxu1 }
 0x296   : > { %2383 = vst.msk [vmem:[#allocation3 + $0x80] sm:$0xff] %vm2366_vm13, %v2303_v52  ;;  %v2610_v52 = vadd.f32 %v2609_v51, %v2608_v45 }
 0x297   : > { %v3323_v28 = vpop.f32.mrf.mxu1 }
 0x298   : > { %2386 = vst.msk [vmem:[#allocation3 + $0x98] sm:$0xff] %vm2366_vm13, %v3323_v28  ;;  %v2611_v28 = vsel %vm2366_vm13, %v4816_v10, 0.0 }
 0x299   : > { %v2306_v12 = vpop.f32.mrf.mxu1 }
 0x29a   : > { %2384 = vst.msk [vmem:[#allocation3 + $0x88] sm:$0xff] %vm2366_vm13, %v2306_v12  ;;  %v2612_v12 = vadd.f32 %v2611_v28, %v2610_v52 }
 0x29b   : > { %v4930_v3 = vld [vmem:[#allocation3 + $0x90] sm:$0xff] }
 0x29c   : > { %v3265_v49 = vpack.c.bf16 %v4930_v3, %v4930_v3  ;;  %v2627_v42 = vsel %vm2366_vm13, %v4930_v3, 0.0 }
 0x29d   : > { %v4934_v63 = vld [vmem:[#allocation3 + $0x80] sm:$0xff] }
 0x29e   : > { %2578 = vst.msk [vmem:[%s4538_s8 + $0x48] sm:$0xf] %vm2559_vm14, %v3265_v49  ;;  %v3263_v37 = vpack.c.bf16 %v4934_v63, %v4934_v63  ;;  %v2613_v49 = vsel %vm2366_vm13, %v4828_v46, 0.0 }
 0x29f   : > { %v4940_v47 = vld [vmem:[#allocation3 + $0x98] sm:$0xff] }
 0x2a0   : > { %2576 = vst.msk [vmem:[%s4538_s8 + $0x40] sm:$0xf] %vm2559_vm14, %v3263_v37  ;;  %v3266_v29 = vpack.c.bf16 %v4940_v47, %v4940_v47  ;;  %v2615_v37 = vsel %vm2366_vm13, %v4882_v60, 0.0  ;;  %v2629_v54 = vsel %vm2366_vm13, %v4940_v47, 0.0 }
 0x2a1   : > { %v4946_v38 = vld [vmem:[#allocation3 + $0x88] sm:$0xff] }
 0x2a2   : > { %2579 = vst.msk [vmem:[%s4538_s8 + $0x4c] sm:$0xf] %vm2559_vm14, %v3266_v29  ;;  %v3264_v59 = vpack.c.bf16 %v4946_v38, %v4946_v38  ;;  %v2614_v29 = vadd.f32 %v2613_v49, %v2612_v12 }
 0x2a4   : > { %2577 = vst.msk [vmem:[%s4538_s8 + $0x44] sm:$0xf] %vm2559_vm14, %v3264_v59  ;;  %v2617_v59 = vsel %vm2366_vm13, %v4896_v35, 0.0 }
 0x2d3   : > { %v3326_v19 = vpop.f32.mrf.mxu1 }
 0x2d4   : > { %2389 = vst.msk [vmem:[#allocation3 + $0xb0] sm:$0xff] %vm2366_vm13, %v3326_v19  ;;  %v2616_v19 = vadd.f32 %v2615_v37, %v2614_v29 }
 0x2d5   : > { %v2319_v21 = vpop.f32.mrf.mxu1 }
 0x2d6   : > { %2387 = vst.msk [vmem:[#allocation3 + $0xa0] sm:$0xff] %vm2366_vm13, %v2319_v21  ;;  %v2618_v21 = vadd.f32 %v2617_v59, %v2616_v19 }
 0x2d7   : > { %v3327_v39 = vpop.f32.mrf.mxu1 }
 0x2d8   : > { %2390 = vst.msk [vmem:[#allocation3 + $0xb8] sm:$0xff] %vm2366_vm13, %v3327_v39  ;;  %v2619_v39 = vsel %vm2366_vm13, %v4878_v41, 0.0 }
 0x2d9   : > { %v2322_v13 = vpop.f32.mrf.mxu1 }
 0x2da   : > { %2388 = vst.msk [vmem:[#allocation3 + $0xa8] sm:$0xff] %vm2366_vm13, %v2322_v13  ;;  %v2620_v13 = vadd.f32 %v2619_v39, %v2618_v21 }
 0x2db   : > { %v4958_v34 = vld [vmem:[#allocation3 + $0xb0] sm:$0xff] }
 0x2dc   : > { %v3269_v62 = vpack.c.bf16 %v4958_v34, %v4958_v34  ;;  %v2635_v6 = vsel %vm2366_vm13, %v4958_v34, 0.0 }
 0x2dd   : > { %v4962_v25 = vld [vmem:[#allocation3 + $0xa0] sm:$0xff] }
 0x2de   : > { %2582 = vst.msk [vmem:[%s4538_s8 + $0x58] sm:$0xf] %vm2559_vm14, %v3269_v62  ;;  %v3267_v44 = vpack.c.bf16 %v4962_v25, %v4962_v25  ;;  %v2621_v62 = vsel %vm2366_vm13, %v4890_v2, 0.0  ;;  %v2631_v61 = vsel %vm2366_vm13, %v4962_v25, 0.0 }
 0x2df   : > { %v4968_v55 = vld [vmem:[#allocation3 + $0xb8] sm:$0xff] }
 0x2e0   : > { %2580 = vst.msk [vmem:[%s4538_s8 + $0x50] sm:$0xf] %vm2559_vm14, %v3267_v44  ;;  %v3270_v16 = vpack.c.bf16 %v4968_v55, %v4968_v55  ;;  %v2623_v44 = vsel %vm2366_vm13, %v4934_v63, 0.0  ;;  %v2637_v14 = vsel %vm2366_vm13, %v4968_v55, 0.0 }
 0x2e1   : > { %v4974_v48 = vld [vmem:[#allocation3 + $0xa8] sm:$0xff] }
 0x2e2   : > { %2583 = vst.msk [vmem:[%s4538_s8 + $0x5c] sm:$0xf] %vm2559_vm14, %v3270_v16  ;;  %v3268_v24 = vpack.c.bf16 %v4974_v48, %v4974_v48  ;;  %v2622_v16 = vadd.f32 %v2621_v62, %v2620_v13  ;;  %v2633_v20 = vsel %vm2366_vm13, %v4974_v48, 0.0 }
 0x2e4   : > { %2581 = vst.msk [vmem:[%s4538_s8 + $0x54] sm:$0xf] %vm2559_vm14, %v3268_v24  ;;  %v2625_v24 = vsel %vm2366_vm13, %v4946_v38, 0.0  ;;  %v2624_v9 = vadd.f32 %v2623_v44, %v2622_v16 }
 0x2e6   : > { %v2626_v1 = vadd.f32 %v2625_v24, %v2624_v9 }
 0x2e8   : > { %v2628_v31 = vadd.f32 %v2627_v42, %v2626_v1 }
 0x2ea   : > { %v2630_v50 = vadd.f32 %v2629_v54, %v2628_v31 }
 0x313   : > { %v3330_v57 = vpop.f32.mrf.mxu1 }
 0x314   : > { %2393 = vst.msk [vmem:[#allocation3 + $0xd0] sm:$0xff] %vm2366_vm13, %v3330_v57  ;;  %v2632_v57 = vadd.f32 %v2631_v61, %v2630_v50 }
 0x315   : > { %v2335_v36 = vpop.f32.mrf.mxu1 }
 0x316   : > { %2391 = vst.msk [vmem:[#allocation3 + $0xc0] sm:$0xff] %vm2366_vm13, %v2335_v36  ;;  %v2634_v26 = vadd.f32 %v2633_v20, %v2632_v57 }
 0x317   : > { %v3331_v40 = vpop.f32.mrf.mxu1 }
 0x318   : > { %2394 = vst.msk [vmem:[#allocation3 + $0xd8] sm:$0xff] %vm2366_vm13, %v3331_v40  ;;  %v2636_v36 = vadd.f32 %v2635_v6, %v2634_v26 }
 0x319   : > { %v2338_v8 = vpop.f32.mrf.mxu1 }
 0x31a   : > { %2392 = vst.msk [vmem:[#allocation3 + $0xc8] sm:$0xff] %vm2366_vm13, %v2338_v8  ;;  %v2638_v4 = vadd.f32 %v2637_v14, %v2636_v36 }
 0x31b   : > { %v5000_v22 = vld [vmem:[#allocation3 + $0xd0] sm:$0xff] }
 0x31c   : > { %v3273_v18 = vpack.c.bf16 %v5000_v22, %v5000_v22  ;;  %v2643_v51 = vsel %vm2366_vm13, %v5000_v22, 0.0 }
 0x31d   : > { %v5004_v53 = vld [vmem:[#allocation3 + $0xc0] sm:$0xff] }
 0x31e   : > { %v3271_v58 = vpack.c.bf16 %v5004_v53, %v5004_v53  ;;  %2586 = vst.msk [vmem:[%s4538_s8 + $0x68] sm:$0xf] %vm2559_vm14, %v3273_v18  ;;  %v2639_v40 = vsel %vm2366_vm13, %v5004_v53, 0.0 }
 0x31f   : > { %v5014_v32 = vld [vmem:[#allocation3 + $0xd8] sm:$0xff]  ;;  %v2640_v7 = vadd.f32 %v2639_v40, %v2638_v4  ;;  %v2691_v4 = vlaneseq }
 0x320   : > { %v3274_v56 = vpack.c.bf16 %v5014_v32, %v5014_v32  ;;  %2584 = vst.msk [vmem:[%s4538_s8 + $0x60] sm:$0xf] %vm2559_vm14, %v3271_v58  ;;  %v2645_v12 = vsel %vm2366_vm13, %v5014_v32, 0.0 }
 0x321   : > { %v5022_v43 = vld [vmem:[#allocation3 + $0xc8] sm:$0xff] }
 0x322   : > { %v3272_v23 = vpack.c.bf16 %v5022_v43, %v5022_v43  ;;  %2587 = vst.msk [vmem:[%s4538_s8 + $0x6c] sm:$0xf] %vm2559_vm14, %v3274_v56  ;;  %v2641_v11 = vsel %vm2366_vm13, %v5022_v43, 0.0 }
 0x323   : > { %v2642_v58 = vadd.f32 %v2641_v11, %v2640_v7  ;;  %v2692_v11 = vshrl.u32 %v2691_v4, 7 }
 0x324   : > { %2585 = vst.msk [vmem:[%s4538_s8 + $0x64] sm:$0xf] %vm2559_vm14, %v3272_v23 }
 0x325   : > { %v2644_v45 = vadd.f32 %v2643_v51, %v2642_v58 }
 0x327   : > { %v2646_v29 = vadd.f32 %v2645_v12, %v2644_v45  ;;  %v3418_v12 = vld [vmem:[#allocation3 + $0x8] sm:$0xff] }
 0x34f   : > { %v3334_v8 = vpop.f32.mrf.mxu1 }
 0x350   : > { %2397 = vst.msk [vmem:[#allocation3 + $0xf0] sm:$0xff] %vm2366_vm13, %v3334_v8 }
 0x351   : > { %v2351_v18 = vpop.f32.mrf.mxu1 }
 0x352   : > { %2395 = vst.msk [vmem:[#allocation3 + $0xe0] sm:$0xff] %vm2366_vm13, %v2351_v18 }
 0x353   : > { %v3335_v27 = vpop.f32.mrf.mxu1 }
 0x354   : > { %2398 = vst.msk [vmem:[#allocation3 + $0xf8] sm:$0xff] %vm2366_vm13, %v3335_v27 }
 0x355   : > { %v2354_v15 = vpop.f32.mrf.mxu1 }
 0x356   : > { %2396 = vst.msk [vmem:[#allocation3 + $0xe8] sm:$0xff] %vm2366_vm13, %v2354_v15  ;;  %v2693_v15 = vsub.s32 0, %v2692_v11 }
 0x357   : > { %v5068_v56 = vld [vmem:[#allocation3 + $0xf0] sm:$0xff] }
 0x358   : > { %v3277_v23 = vpack.c.bf16 %v5068_v56, %v5068_v56  ;;  %v2651_v44 = vsel %vm2366_vm13, %v5068_v56, 0.0 }
 0x359   : > { %v5072_v52 = vld [vmem:[#allocation3 + $0xe0] sm:$0xff] }
 0x35a   : > { %v3275_v28 = vpack.c.bf16 %v5072_v52, %v5072_v52  ;;  %2590 = vst.msk [vmem:[%s4538_s8 + $0x78] sm:$0xf] %vm2559_vm14, %v3277_v23  ;;  %v2647_v49 = vsel %vm2366_vm13, %v5072_v52, 0.0  ;;  %v3417_v23 = vld [vmem:[#allocation3] sm:$0xff] }
 0x35b   : > { %v5082_v37 = vld [vmem:[#allocation3 + $0xf8] sm:$0xff]  ;;  %v2648_v21 = vadd.f32 %v2647_v49, %v2646_v29  ;;  %v3419_v29 = vld [vmem:[#allocation3 + $0x10] sm:$0xff] }
 0x35c   : > { %v3278_v59 = vpack.c.bf16 %v5082_v37, %v5082_v37  ;;  %2588 = vst.msk [vmem:[%s4538_s8 + $0x70] sm:$0xf] %vm2559_vm14, %v3275_v28  ;;  %v2653_v24 = vsel %vm2366_vm13, %v5082_v37, 0.0 }
 0x35d   : > { %v5088_v19 = vld [vmem:[#allocation3 + $0xe8] sm:$0xff] }
 0x35e   : > { %2591 = vst.msk [vmem:[%s4538_s8 + $0x7c] sm:$0xf] %vm2559_vm14, %v3278_v59  ;;  %v2649_v39 = vsel %vm2366_vm13, %v5088_v19, 0.0  ;;  %v3276_v13 = vpack.c.bf16 %v5088_v19, %v5088_v19 }
 0x35f   : > { %v2650_v62 = vadd.f32 %v2649_v39, %v2648_v21  ;;  %v3420_v21 = vld [vmem:[#allocation3 + $0x18] sm:$0xff] }
 0x360   : > { %2589 = vst.msk [vmem:[%s4538_s8 + $0x74] sm:$0xf] %vm2559_vm14, %v3276_v13 }
 0x361   : > { %v2652_v16 = vadd.f32 %v2651_v44, %v2650_v62 }
 0x363   : > { %v2654_v9 = vadd.f32 %v2653_v24, %v2652_v16 }
 0x365   : > { %v2655_v1 = vrot.slane %v2654_v9, 4 }
 0x367   : > { %v2656_v42 = vadd.f32 %v2655_v1, %v2654_v9 }
 0x369   : > { %v2657_v31 = vrot.slane %v2656_v42, 2 }
 0x36b   : > { %v2658_v54 = vadd.f32 %v2657_v31, %v2656_v42 }
 0x36d   : > { %v2659_v61 = vrot.slane %v2658_v54, 1 }
 0x36f   : > { %v2660_v50 = vadd.f32 %v2659_v61, %v2658_v54  ;;  %v3421_v54 = vld [vmem:[#allocation3 + $0x30] sm:$0xff] }
 0x371   : > { %2666 = vrot.lane.b32.xlu1 %v2660_v50, %s3438_s9  ;;  %2662 = vrot.lane.b32.xlu0 %v2660_v50, %s3439_s10 }
 0x375   : > { %2670 = vrot.lane.b32.xlu0 %v2660_v50, %s3440_s11 }
 0x3e3   : > { %v2663_v20 = vpop.permute.xlu0 %2662  ;;  %v2667_v26 = vpop.permute.xlu1 %2666 }
 0x3e4   : > { %v2665_v57 = vadd.f32 %v2663_v20, %v2660_v50 }
 0x3e6   : > { %v2669_v6 = vadd.f32 %v2667_v26, %v2665_v57 }
 0x3e7   : > { %v2671_v36 = vpop.permute.xlu0 %2670 }
 0x3e8   : > { %v5105_v14 = vadd.f32 %v2671_v36, %v2669_v6 }
 0x3ea   : > { %v2674_v40 = vmul.f32 0.0009765625, %v5105_v14 }
 0x3ec   : > { %2679 = vrot.lane.b32.xlu0 %v2674_v40, %s3433_s21  ;;  %2676 = vrot.lane.b32.xlu1 %v2674_v40, %s3431_s19 }
 0x3f0   : > { %2682 = vrot.lane.b32.xlu1 %v2674_v40, %s3435_s23 }
 0x45e   : > { %v2677_v8 = vpop.permute.xlu1 %2676  ;;  %v2680_v18 = vpop.permute.xlu0 %2679 }
 0x45f   : > { %v2686_v7 = vsel %vm2685_vm15, %v2674_v40, %v2677_v8 }
 0x460   : > { %v2688_v58 = vsel %vm2687_vm0, %v2686_v7, %v2680_v18 }
 0x462   : > { %v2683_v27 = vpop.permute.xlu1 %2682 }
 0x463   : > { %v2690_v51 = vsel %vm2689_vm1, %v2688_v58, %v2683_v27 }
 0x464   : > { %v5111_v45 = vrot.slane %v2690_v51, %v2693_v15 }
 0x466   : > { %v2695_v28 = vsub.f32 %v3417_v23, %v5111_v45  ;;  %v2696_v49 = vsub.f32 %v3418_v12, %v5111_v45  ;;  %v2697_v59 = vsub.f32 %v3419_v29, %v5111_v45  ;;  %v2698_v39 = vsub.f32 %v3420_v21, %v5111_v45 }
 0x467   : > { %v2699_v44 = vsub.f32 %v4706_v17, %v5111_v45  ;;  %v2700_v24 = vsub.f32 %v4725_v5, %v5111_v45  ;;  %v2701_v61 = vsub.f32 %v3421_v54, %v5111_v45  ;;  %v2702_v17 = vsub.f32 %v4716_v30, %v5111_v45 }
 0x468   : > { %v2727_v13 = vmul.f32 %v2695_v28, %v2695_v28  ;;  %v2728_v62 = vmul.f32 %v2696_v49, %v2696_v49  ;;  %v2729_v16 = vmul.f32 %v2697_v59, %v2697_v59  ;;  %v2730_v9 = vmul.f32 %v2698_v39, %v2698_v39 }
 0x469   : > { %v2731_v50 = vmul.f32 %v2699_v44, %v2699_v44  ;;  %v2732_v26 = vmul.f32 %v2700_v24, %v2700_v24  ;;  %v2703_v36 = vsub.f32 %v4820_v33, %v5111_v45  ;;  %v2733_v40 = vmul.f32 %v2701_v61, %v2701_v61 }
 0x46a   : > { %v2759_v1 = vsel %vm2366_vm13, %v2727_v13, 0.0  ;;  %v2760_v42 = vsel %vm2366_vm13, %v2728_v62, 0.0  ;;  %v2762_v20 = vsel %vm2366_vm13, %v2729_v16, 0.0  ;;  %v2764_v6 = vsel %vm2366_vm13, %v2730_v9, 0.0 }
 0x46b   : > { %v2761_v31 = vadd.f32 %v2760_v42, %v2759_v1  ;;  %v2766_v8 = vsel %vm2366_vm13, %v2731_v50, 0.0  ;;  %v2704_v11 = vsub.f32 %v4834_v0, %v5111_v45  ;;  %v2734_v18 = vmul.f32 %v2702_v17, %v2702_v17 }
 0x46c   : > { %v2768_v7 = vsel %vm2366_vm13, %v2732_v26, 0.0  ;;  %v2705_v30 = vsub.f32 %v4816_v10, %v5111_v45  ;;  %v2735_v58 = vmul.f32 %v2703_v36, %v2703_v36  ;;  %v2770_v15 = vsel %vm2366_vm13, %v2733_v40, 0.0 }
 0x46d   : > { %v2763_v57 = vadd.f32 %v2762_v20, %v2761_v31  ;;  %v2706_v33 = vsub.f32 %v4828_v46, %v5111_v45  ;;  %v2736_v23 = vmul.f32 %v2704_v11, %v2704_v11  ;;  %v2772_v28 = vsel %vm2366_vm13, %v2734_v18, 0.0 }
 0x46e   : > { %v2707_v0 = vsub.f32 %v4882_v60, %v5111_v45  ;;  %v2737_v49 = vmul.f32 %v2705_v30, %v2705_v30  ;;  %v2774_v29 = vsel %vm2366_vm13, %v2735_v58, 0.0  ;;  %v2708_v10 = vsub.f32 %v4896_v35, %v5111_v45 }
 0x46f   : > { %v2765_v5 = vadd.f32 %v2764_v6, %v2763_v57  ;;  %v2738_v21 = vmul.f32 %v2706_v33, %v2706_v33  ;;  %v2776_v39 = vsel %vm2366_vm13, %v2736_v23, 0.0  ;;  %v2709_v46 = vsub.f32 %v4878_v41, %v5111_v45 }
 0x470   : > { %v2739_v62 = vmul.f32 %v2707_v0, %v2707_v0  ;;  %v2778_v44 = vsel %vm2366_vm13, %v2737_v49, 0.0  ;;  %v2710_v60 = vsub.f32 %v4890_v2, %v5111_v45  ;;  %v2740_v24 = vmul.f32 %v2708_v10, %v2708_v10 }
 0x471   : > { %v2767_v4 = vadd.f32 %v2766_v8, %v2765_v5  ;;  %v2780_v9 = vsel %vm2366_vm13, %v2738_v21, 0.0  ;;  %v2711_v35 = vsub.f32 %v4934_v63, %v5111_v45  ;;  %v2741_v42 = vmul.f32 %v2709_v46, %v2709_v46 }
 0x472   : > { %v2782_v31 = vsel %vm2366_vm13, %v2739_v62, 0.0  ;;  %v2712_v41 = vsub.f32 %v4946_v38, %v5111_v45  ;;  %v2742_v61 = vmul.f32 %v2710_v60, %v2710_v60  ;;  %v2784_v50 = vsel %vm2366_vm13, %v2740_v24, 0.0 }
 0x473   : > { %v2769_v27 = vadd.f32 %v2768_v7, %v2767_v4  ;;  %v2713_v2 = vsub.f32 %v4930_v3, %v5111_v45  ;;  %v2743_v57 = vmul.f32 %v2711_v35, %v2711_v35  ;;  %v2786_v17 = vsel %vm2366_vm13, %v2741_v42, 0.0 }
 0x474   : > { %v2714_v63 = vsub.f32 %v4940_v47, %v5111_v45  ;;  %v2744_v6 = vmul.f32 %v2712_v41, %v2712_v41  ;;  %v2788_v5 = vsel %vm2366_vm13, %v2742_v61, 0.0  ;;  %v2715_v38 = vsub.f32 %v4962_v25, %v5111_v45 }
 0x475   : > { %v2771_v51 = vadd.f32 %v2770_v15, %v2769_v27  ;;  %v2745_v40 = vmul.f32 %v2713_v2, %v2713_v2  ;;  %v2790_v8 = vsel %vm2366_vm13, %v2743_v57, 0.0  ;;  %v2716_v3 = vsub.f32 %v4974_v48, %v5111_v45 }
 0x476   : > { %v2746_v11 = vmul.f32 %v2714_v63, %v2714_v63  ;;  %v2792_v18 = vsel %vm2366_vm13, %v2744_v6, 0.0  ;;  %v2717_v47 = vsub.f32 %v4958_v34, %v5111_v45  ;;  %v2747_v27 = vmul.f32 %v2715_v38, %v2715_v38 }
 0x477   : > { %v2773_v12 = vadd.f32 %v2772_v28, %v2771_v51  ;;  %v2794_v30 = vsel %vm2366_vm13, %v2745_v40, 0.0  ;;  %v2718_v25 = vsub.f32 %v4968_v55, %v5111_v45  ;;  %v2748_v15 = vmul.f32 %v2716_v3, %v2716_v3 }
 0x478   : > { %v2796_v51 = vsel %vm2366_vm13, %v2746_v11, 0.0  ;;  %v2719_v48 = vsub.f32 %v5004_v53, %v5111_v45  ;;  %v2749_v23 = vmul.f32 %v2717_v47, %v2717_v47  ;;  %v2798_v28 = vsel %vm2366_vm13, %v2747_v27, 0.0 }
 0x479   : > { %v2775_v59 = vadd.f32 %v2774_v29, %v2773_v12  ;;  %v2720_v34 = vsub.f32 %v5022_v43, %v5111_v45  ;;  %v2750_v0 = vmul.f32 %v2718_v25, %v2718_v25  ;;  %v2800_v49 = vsel %vm2366_vm13, %v2748_v15, 0.0 }
 0x47a   : > { %v2721_v55 = vsub.f32 %v5000_v22, %v5111_v45  ;;  %v2802_v10 = vsel %vm2366_vm13, %v2749_v23, 0.0  ;;  %v2722_v53 = vsub.f32 %v5014_v32, %v5111_v45  ;;  %v2723_v43 = vsub.f32 %v5072_v52, %v5111_v45 }
 0x47b   : > { %v2777_v13 = vadd.f32 %v2776_v39, %v2775_v59  ;;  %v2751_v59 = vmul.f32 %v2719_v48, %v2719_v48  ;;  %v2752_v39 = vmul.f32 %v2720_v34, %v2720_v34  ;;  %v2724_v22 = vsub.f32 %v5088_v19, %v5111_v45 }
 0x47c   : > { %v2753_v62 = vmul.f32 %v2721_v55, %v2721_v55  ;;  %v2754_v60 = vmul.f32 %v2722_v53, %v2722_v53  ;;  %v2725_v32 = vsub.f32 %v5068_v56, %v5111_v45  ;;  %v2726_v52 = vsub.f32 %v5082_v37, %v5111_v45 }
 0x47d   : > { %v2779_v16 = vadd.f32 %v2778_v44, %v2777_v13  ;;  %v2804_v13 = vsel %vm2366_vm13, %v2750_v0, 0.0  ;;  %v2806_v44 = vsel %vm2366_vm13, %v2751_v59, 0.0  ;;  %v2808_v24 = vsel %vm2366_vm13, %v2752_v39, 0.0 }
 0x47e   : > { %v2810_v35 = vsel %vm2366_vm13, %v2753_v62, 0.0  ;;  %v2757_v61 = vmul.f32 %v2725_v32, %v2725_v32 }
 0x47f   : > { %v2781_v1 = vadd.f32 %v2780_v9, %v2779_v16 }
 0x480   : > { %v2818_v56 = vsel %vm2366_vm13, %v2757_v61, 0.0 }
 0x481   : > { %v2783_v54 = vadd.f32 %v2782_v31, %v2781_v1  ;;  %v2755_v1 = vmul.f32 %v2723_v43, %v2723_v43  ;;  %v2756_v31 = vmul.f32 %v2724_v22, %v2724_v22 }
 0x483   : > { %v2785_v20 = vadd.f32 %v2784_v50, %v2783_v54  ;;  %v2812_v54 = vsel %vm2366_vm13, %v2754_v60, 0.0  ;;  %v2814_v19 = vsel %vm2366_vm13, %v2755_v1, 0.0  ;;  %v2816_v2 = vsel %vm2366_vm13, %v2756_v31, 0.0 }
 0x485   : > { %v2787_v26 = vadd.f32 %v2786_v17, %v2785_v20  ;;  %v2758_v20 = vmul.f32 %v2726_v52, %v2726_v52 }
 0x487   : > { %v2789_v36 = vadd.f32 %v2788_v5, %v2787_v26  ;;  %v2820_v26 = vsel %vm2366_vm13, %v2758_v20, 0.0 }
 0x489   : > { %v2791_v4 = vadd.f32 %v2790_v8, %v2789_v36 }
 0x48b   : > { %v2793_v7 = vadd.f32 %v2792_v18, %v2791_v4 }
 0x48d   : > { %v2795_v58 = vadd.f32 %v2794_v30, %v2793_v7 }
 0x48f   : > { %v2797_v33 = vadd.f32 %v2796_v51, %v2795_v58 }
 0x491   : > { %v2799_v12 = vadd.f32 %v2798_v28, %v2797_v33 }
 0x493   : > { %v2801_v29 = vadd.f32 %v2800_v49, %v2799_v12 }
 0x495   : > { %v2803_v21 = vadd.f32 %v2802_v10, %v2801_v29 }
 0x497   : > { %v2805_v46 = vadd.f32 %v2804_v13, %v2803_v21 }
 0x499   : > { %v2807_v16 = vadd.f32 %v2806_v44, %v2805_v46 }
 0x49b   : > { %v2809_v9 = vadd.f32 %v2808_v24, %v2807_v16 }
 0x49d   : > { %v2811_v42 = vadd.f32 %v2810_v35, %v2809_v9 }
 0x49f   : > { %v2813_v41 = vadd.f32 %v2812_v54, %v2811_v42 }
 0x4a1   : > { %v2815_v50 = vadd.f32 %v2814_v19, %v2813_v41 }
 0x4a3   : > { %v2817_v57 = vadd.f32 %v2816_v2, %v2815_v50 }
 0x4a5   : > { %v2819_v17 = vadd.f32 %v2818_v56, %v2817_v57 }
 0x4a7   : > { %v2821_v63 = vadd.f32 %v2820_v26, %v2819_v17 }
 0x4a9   : > { %v2822_v37 = vrot.slane %v2821_v63, 4 }
 0x4ab   : > { %v2823_v45 = vadd.f32 %v2822_v37, %v2821_v63 }
 0x4ad   : > { %v2824_v6 = vrot.slane %v2823_v45, 2 }
 0x4af   : > { %v2825_v5 = vadd.f32 %v2824_v6, %v2823_v45 }
 0x4b1   : > { %v2826_v36 = vrot.slane %v2825_v5, 1 }
 0x4b3   : > { %v2827_v38 = vadd.f32 %v2826_v36, %v2825_v5 }
 0x4b5   : > { %2833 = vrot.lane.b32.xlu1 %v2827_v38, %s3438_s9  ;;  %2829 = vrot.lane.b32.xlu0 %v2827_v38, %s3439_s10 }
 0x4b9   : > { %2837 = vrot.lane.b32.xlu0 %v2827_v38, %s3440_s11 }
 0x527   : > { %v2830_v40 = vpop.permute.xlu0 %2829  ;;  %v2834_v4 = vpop.permute.xlu1 %2833 }
 0x528   : > { %v2832_v8 = vadd.f32 %v2830_v40, %v2827_v38 }
 0x52a   : > { %v2836_v3 = vadd.f32 %v2834_v4, %v2832_v8 }
 0x52b   : > { %v2838_v11 = vpop.permute.xlu0 %2837 }
 0x52c   : > { %v2840_v18 = vadd.f32 %v2838_v11, %v2836_v3 }
 0x52e   : > { %v2842_v7 = vrot.slane %v2840_v18, 7 }
 0x530   : > { %v2845_v47 = vsel %vm2844_vm2, %v5105_v14, %v2842_v7 }
 0x531   : > { %2847 = vst.msk [vmem:[%s181_s17] sm:$0x3] %vm2846_vm3, %v2845_v47 }
 0x532 PF: > { %s14_s12 = sadd.s32 1, %s3428_s12  }
 0x533   : > { %p11_p4 = scmp.ge.s32.totalorder %s14_s12, 4  }
 0x535   :  { %13 = sbr.rel (!%p11_p4) target bundleno = 1 (0x1), region = 70 }

</bundles_post_ra>
